<compile_context>
chip_gen: v7x
topology: tpu7x:2x2x1
jax: 0.10.0
libtpu: 0.0.40
codegen_flags: <defaults>
</compile_context>

<pallas_src>
import jax
import jax.numpy as jnp
from jax import lax
from jax.experimental import pallas as pl
from jax.experimental.pallas import tpu as pltpu

EPS = 1e-5                     # torch.nn.GroupNorm default eps
SUBLANE = 8                    # batch tile = sublane count
LANE = 128                     # hidden padded to a multiple of this

# Set to jnp.bfloat16 on v6e/v7x for 2x MXU throughput (f32 accumulate + f32 gate math stay);
# kept f32 here so the correctness check against the f32 reference has maximal margin.
MXU_OPERAND_DTYPE = jnp.float32


def _round_up(n, m):
    return ((n + m - 1) // m) * m


# ------------------------------ weight preparation ----------------------------
def _prep_lstm(w_ih, w_hh, b_ih, b_hh, hp, dtype):
    """torch-layout LSTM params -> padded, transposed kernel operands.

    w_ih: (4H, D) -> (D, 4*Hp); w_hh: (4H, H) -> (Hp, 4*Hp); bias -> (1, 4*Hp).
    Each gate block (i, f, g, o) is zero-padded from H to Hp lanes; padded hidden lanes stay
    exactly zero through the recurrence, so padding is numerically inert.
    """
    h4, d = w_ih.shape
    h = h4 // 4
    pad = hp - h
    wih = jnp.pad(w_ih.reshape(4, h, d), ((0, 0), (0, pad), (0, 0)))
    wih = wih.reshape(4 * hp, d).T                                   # (D, 4Hp)
    whh = jnp.pad(w_hh.reshape(4, h, h), ((0, 0), (0, pad), (0, pad)))
    whh = whh.reshape(4 * hp, hp).T                                  # (Hp, 4Hp)
    b = jnp.pad((b_ih + b_hh).reshape(4, h), ((0, 0), (0, pad))).reshape(1, 4 * hp)
    return wih.astype(dtype), whh.astype(dtype), b.astype(jnp.float32)


def _prep_fc(fc_w, fc_b, h, hp, dtype):
    """torch fc weight (D, 2H) -> forward/backward (Hp, D) halves + (1, D) bias."""
    d = fc_w.shape[0]
    pad = hp - h
    wf = jnp.pad(fc_w[:, :h].T, ((0, pad), (0, 0)))                  # (Hp, D)
    wb = jnp.pad(fc_w[:, h:].T, ((0, pad), (0, 0)))                  # (Hp, D)
    return wf.astype(dtype), wb.astype(dtype), fc_b.reshape(1, d).astype(jnp.float32)


# --------------------------------- fused kernel --------------------------------
def fused_rnn_kernel(
    x_ref, gamma_ref, beta_ref,
    wih_f_ref, whh_f_ref, b_f_ref,
    wih_b_ref, whh_b_ref, b_b_ref,
    fcw_f_ref, fcw_b_ref, fcb_ref,
    o_ref,
    xg_f_sc, xg_b_sc, hseq_f_sc, hseq_b_sc,
    h_f_sc, c_f_sc, h_b_sc, c_b_sc,
):
    T, Bt, D = x_ref.shape                  # time-major block: (T, batch_tile, D)
    G = wih_f_ref.shape[1]                  # 4 * Hp
    Hp = G // 4
    w_dtype = wih_f_ref.dtype
    inv_td = 1.0 / float(T * D)

    # ---- GroupNorm(num_groups=1): stats over (T, D) per batch element, per-channel affine ----
    x = x_ref[...].astype(jnp.float32)                                       # (T, Bt, D)
    mean = jnp.sum(jnp.sum(x, axis=0, keepdims=True), axis=2, keepdims=True) * inv_td
    xc = x - mean
    var = jnp.sum(jnp.sum(xc * xc, axis=0, keepdims=True), axis=2, keepdims=True) * inv_td
    xn = xc * lax.rsqrt(var + EPS) * gamma_ref[...] + beta_ref[...]          # (T, Bt, D)

    # ---- input projection for all timesteps, both directions (one big MXU matmul each) ----
    xn2d = xn.reshape(T * Bt, D).astype(w_dtype)                             # tile-aligned collapse
    xg_f_sc[...] = (jnp.dot(xn2d, wih_f_ref[...], preferred_element_type=jnp.float32)
                    + b_f_ref[...])                                          # (T*Bt, 4Hp)
    xg_b_sc[...] = (jnp.dot(xn2d, wih_b_ref[...], preferred_element_type=jnp.float32)
                    + b_b_ref[...])

    # ---- init recurrent state (scratch persists across grid steps) ----
    h_f_sc[...] = jnp.zeros_like(h_f_sc)
    c_f_sc[...] = jnp.zeros_like(c_f_sc)
    h_b_sc[...] = jnp.zeros_like(h_b_sc)
    c_b_sc[...] = jnp.zeros_like(c_b_sc)

    def lstm_step(xg_row, h_sc, c_sc, whh_ref):
        # (Bt, 4Hp) gates = precomputed input part + batched recurrent matmul
        gates = xg_row + jnp.dot(h_sc[...].astype(w_dtype), whh_ref[...],
                                 preferred_element_type=jnp.float32)
        i = jax.nn.sigmoid(gates[:, 0 * Hp:1 * Hp])     # lane-aligned full-vreg slices
        f = jax.nn.sigmoid(gates[:, 1 * Hp:2 * Hp])
        g = jnp.tanh(gates[:, 2 * Hp:3 * Hp])
        o = jax.nn.sigmoid(gates[:, 3 * Hp:4 * Hp])
        c = f * c_sc[...] + i * g
        h = o * jnp.tanh(c)
        c_sc[...] = c
        h_sc[...] = h
        return h

    def step(t, carry):
        # forward direction at time t
        rf = t * Bt
        hf = lstm_step(xg_f_sc[pl.ds(rf, Bt), :], h_f_sc, c_f_sc, whh_f_ref)
        hseq_f_sc[pl.ds(rf, Bt), :] = hf                # lane-dense (Bt, 128) VMEM store
        # backward direction at time T-1-t (in-kernel reversal; no flipped HBM copies)
        rb = (T - 1 - t) * Bt
        hb = lstm_step(xg_b_sc[pl.ds(rb, Bt), :], h_b_sc, c_b_sc, whh_b_ref)
        hseq_b_sc[pl.ds(rb, Bt), :] = hb
        return carry

    lax.fori_loop(0, T, step, 0, unroll=True)

    # ---- fused concat + Linear epilogue: y = [h_f, h_b] @ W_fc^T + b_fc ----
    y = (jnp.dot(hseq_f_sc[...].astype(w_dtype), fcw_f_ref[...],
                 preferred_element_type=jnp.float32)
         + jnp.dot(hseq_b_sc[...].astype(w_dtype), fcw_b_ref[...],
                   preferred_element_type=jnp.float32)
         + fcb_ref[...])                                                     # (T*Bt, D)
    o_ref[...] = y.reshape(T, Bt, D).astype(o_ref.dtype)


# ----------------------------- Full module forward -----------------------------
def rnn_module_forward(x, p, *, matmul_dtype=MXU_OPERAND_DTYPE):
    B, T, D = x.shape
    H = p["w_hh_f"].shape[1]
    Hp = _round_up(H, LANE)                 # lane-dense gates / hidden
    G = 4 * Hp
    Bt = SUBLANE                            # batch tile = 8 sublanes
    Bp = _round_up(B, Bt)
    nb = Bp // Bt

    # one-time parameter repacking (would live at module-init time in practice)
    wih_f, whh_f, b_f = _prep_lstm(p["w_ih_f"], p["w_hh_f"], p["b_ih_f"], p["b_hh_f"], Hp, matmul_dtype)
    wih_b, whh_b, b_b = _prep_lstm(p["w_ih_b"], p["w_hh_b"], p["b_ih_b"], p["b_hh_b"], Hp, matmul_dtype)
    fcw_f, fcw_b, fcb = _prep_fc(p["fc_w"], p["fc_b"], H, Hp, matmul_dtype)
    gamma = p["gn_gamma"].reshape(1, D).astype(jnp.float32)
    beta = p["gn_beta"].reshape(1, D).astype(jnp.float32)

    # (B, T, D) -> time-major (T, Bp, D), batch zero-padded to a sublane multiple (single XLA copy)
    x_tbd = jnp.swapaxes(x, 0, 1)
    if Bp != B:
        x_tbd = jnp.pad(x_tbd, ((0, 0), (0, Bp - B), (0, 0)))

    out = pl.pallas_call(
        fused_rnn_kernel,
        out_shape=jax.ShapeDtypeStruct((T, Bp, D), x.dtype),
        grid=(nb,),
        in_specs=[
            pl.BlockSpec((T, Bt, D), lambda i: (0, i, 0)),   # x (time-major batch tile)
            pl.BlockSpec((1, D), lambda i: (0, 0)),          # gn gamma
            pl.BlockSpec((1, D), lambda i: (0, 0)),          # gn beta
            pl.BlockSpec((D, G), lambda i: (0, 0)),          # w_ih forward
            pl.BlockSpec((Hp, G), lambda i: (0, 0)),         # w_hh forward
            pl.BlockSpec((1, G), lambda i: (0, 0)),          # bias forward
            pl.BlockSpec((D, G), lambda i: (0, 0)),          # w_ih backward
            pl.BlockSpec((Hp, G), lambda i: (0, 0)),         # w_hh backward
            pl.BlockSpec((1, G), lambda i: (0, 0)),          # bias backward
            pl.BlockSpec((Hp, D), lambda i: (0, 0)),         # fc weight, forward half
            pl.BlockSpec((Hp, D), lambda i: (0, 0)),         # fc weight, backward half
            pl.BlockSpec((1, D), lambda i: (0, 0)),          # fc bias
        ],
        out_specs=pl.BlockSpec((T, Bt, D), lambda i: (0, i, 0)),
        scratch_shapes=[
            pltpu.VMEM((T * Bt, G), jnp.float32),            # xg forward   (input gate pre-acts)
            pltpu.VMEM((T * Bt, G), jnp.float32),            # xg backward
            pltpu.VMEM((T * Bt, Hp), jnp.float32),           # h sequence forward (staged in VMEM)
            pltpu.VMEM((T * Bt, Hp), jnp.float32),           # h sequence backward
            pltpu.VMEM((Bt, Hp), jnp.float32),               # h state forward
            pltpu.VMEM((Bt, Hp), jnp.float32),               # c state forward
            pltpu.VMEM((Bt, Hp), jnp.float32),               # h state backward
            pltpu.VMEM((Bt, Hp), jnp.float32),               # c state backward
        ],
        compiler_params=pltpu.CompilerParams(
            dimension_semantics=("parallel",),               # batch tiles are independent
            vmem_limit_bytes=32 * 1024 * 1024,
        ),
    )(x_tbd, gamma, beta, wih_f, whh_f, b_f, wih_b, whh_b, b_b, fcw_f, fcw_b, fcb)

    return jnp.swapaxes(out[:, :B, :], 0, 1)                 # back to (B, T, D)


# ------------------------------ Pure-JAX reference ------------------------------
def reference_forward(x, p):
    mean = jnp.mean(x, axis=(1, 2), keepdims=True)
    var = jnp.mean((x - mean) ** 2, axis=(1, 2), keepdims=True)
    xn = (x - mean) / jnp.sqrt(var + EPS) * p["gn_gamma"] + p["gn_beta"]

    def lstm_dir(xs, w_ih, w_hh, b_ih, b_hh):
        H = w_hh.shape[1]

        def cell(carry, x_t):
            h, c = carry
            gates = x_t @ w_ih.T + b_ih + h @ w_hh.T + b_hh
            i, f, g, o = jnp.split(gates, 4, axis=-1)
            i, f, o = jax.nn.sigmoid(i), jax.nn.sigmoid(f), jax.nn.sigmoid(o)
            g = jnp.tanh(g)
            c = f * c + i * g
            h = o * jnp.tanh(c)
            return (h, c), h

        h0 = jnp.zeros((xs.shape[0], H), xs.dtype)
        (_, _), hs = lax.scan(cell, (h0, h0), jnp.swapaxes(xs, 0, 1))
        return jnp.swapaxes(hs, 0, 1)

    h_f = lstm_dir(xn, p["w_ih_f"], p["w_hh_f"], p["b_ih_f"], p["b_hh_f"])
    h_b = lstm_dir(xn[:, ::-1], p["w_ih_b"], p["w_hh_b"], p["b_ih_b"], p["b_hh_b"])[:, ::-1]
    h = jnp.concatenate([h_f, h_b], -1)
    return h @ p["fc_w"].T + p["fc_b"]


# -------------------------------------- main -------------------------------------
if __name__ == "__main__":
    B, T, D, H = 2, 8, 16, 32     # batch, seq, input_dim, hidden_dim (bidirectional LSTM)

    key = jax.random.PRNGKey(0)
    keys = jax.random.split(key, 12)
    scale = 1.0 / jnp.sqrt(H)

    params = {
        "gn_gamma": jnp.ones((D,), jnp.float32),
        "gn_beta": jnp.zeros((D,), jnp.float32),
        # forward direction LSTM weights (torch layout)
        "w_ih_f": scale * jax.random.normal(keys[0], (4 * H, D), jnp.float32),
        "w_hh_f": scale * jax.random.normal(keys[1], (4 * H, H), jnp.float32),
        "b_ih_f": scale * jax.random.normal(keys[2], (4 * H,), jnp.float32),
        "b_hh_f": scale * jax.random.normal(keys[3], (4 * H,), jnp.float32),
        # reverse direction LSTM weights
        "w_ih_b": scale * jax.random.normal(keys[4], (4 * H, D), jnp.float32),
        "w_hh_b": scale * jax.random.normal(keys[5], (4 * H, H), jnp.float32),
        "b_ih_b": scale * jax.random.normal(keys[6], (4 * H,), jnp.float32),
        "b_hh_b": scale * jax.random.normal(keys[7], (4 * H,), jnp.float32),
        # fc: Linear(2H -> D)
        "fc_w": scale * jax.random.normal(keys[8], (D, 2 * H), jnp.float32),
        "fc_b": scale * jax.random.normal(keys[9], (D,), jnp.float32),
    }

    x = jax.random.normal(keys[10], (B, T, D), jnp.float32)

    out = jax.block_until_ready(rnn_module_forward(x, params))
    ref = jax.block_until_ready(reference_forward(x, params))

    assert out.shape == (B, T, D)
    err = float(jnp.max(jnp.abs(out - ref)))
    assert err < 1e-2, err

    print("KERNEL_OK")
</pallas_src>

<mosaic_0001>
module attributes {stable_mosaic.version = 11 : i64} {
  func.func @fused_rnn_kernel(%arg0: i32, %arg1: memref<8x8x16xf32, #tpu.memory_space<vmem>>, %arg2: memref<1x16xf32, #tpu.memory_space<vmem>>, %arg3: memref<1x16xf32, #tpu.memory_space<vmem>>, %arg4: memref<16x512xf32, #tpu.memory_space<vmem>>, %arg5: memref<128x512xf32, #tpu.memory_space<vmem>>, %arg6: memref<1x512xf32, #tpu.memory_space<vmem>>, %arg7: memref<16x512xf32, #tpu.memory_space<vmem>>, %arg8: memref<128x512xf32, #tpu.memory_space<vmem>>, %arg9: memref<1x512xf32, #tpu.memory_space<vmem>>, %arg10: memref<128x16xf32, #tpu.memory_space<vmem>>, %arg11: memref<128x16xf32, #tpu.memory_space<vmem>>, %arg12: memref<1x16xf32, #tpu.memory_space<vmem>>, %arg13: memref<8x8x16xf32, #tpu.memory_space<vmem>>, %arg14: memref<64x512xf32, #tpu.memory_space<vmem>>, %arg15: memref<64x512xf32, #tpu.memory_space<vmem>>, %arg16: memref<64x128xf32, #tpu.memory_space<vmem>>, %arg17: memref<64x128xf32, #tpu.memory_space<vmem>>, %arg18: memref<8x128xf32, #tpu.memory_space<vmem>>, %arg19: memref<8x128xf32, #tpu.memory_space<vmem>>, %arg20: memref<8x128xf32, #tpu.memory_space<vmem>>, %arg21: memref<8x128xf32, #tpu.memory_space<vmem>>) attributes {dimension_semantics = [#tpu.dimension_semantics<parallel>], iteration_bounds = array<i64: 1>, scalar_prefetch = 0 : i64, scratch_operands = 8 : i64, tpu.core_type = #tpu.core_type<tc>, window_params = [{transform_indices = @transform_0, window_bounds = array<i64: 8, 8, 16>}, {pipeline_mode = #tpu.pipeline_mode<synchronous>, transform_indices = @transform_1, window_bounds = array<i64: 1, 16>}, {pipeline_mode = #tpu.pipeline_mode<synchronous>, transform_indices = @transform_2, window_bounds = array<i64: 1, 16>}, {pipeline_mode = #tpu.pipeline_mode<synchronous>, transform_indices = @transform_3, window_bounds = array<i64: 16, 512>}, {pipeline_mode = #tpu.pipeline_mode<synchronous>, transform_indices = @transform_4, window_bounds = array<i64: 128, 512>}, {pipeline_mode = #tpu.pipeline_mode<synchronous>, transform_indices = @transform_5, window_bounds = array<i64: 1, 512>}, {pipeline_mode = #tpu.pipeline_mode<synchronous>, transform_indices = @transform_6, window_bounds = array<i64: 16, 512>}, {pipeline_mode = #tpu.pipeline_mode<synchronous>, transform_indices = @transform_7, window_bounds = array<i64: 128, 512>}, {pipeline_mode = #tpu.pipeline_mode<synchronous>, transform_indices = @transform_8, window_bounds = array<i64: 1, 512>}, {pipeline_mode = #tpu.pipeline_mode<synchronous>, transform_indices = @transform_9, window_bounds = array<i64: 128, 16>}, {pipeline_mode = #tpu.pipeline_mode<synchronous>, transform_indices = @transform_10, window_bounds = array<i64: 128, 16>}, {pipeline_mode = #tpu.pipeline_mode<synchronous>, transform_indices = @transform_11, window_bounds = array<i64: 1, 16>}, {transform_indices = @transform_12, window_bounds = array<i64: 8, 8, 16>}]} {
    %c0 = arith.constant 0 : index
    %c0_0 = arith.constant 0 : index
    %c0_1 = arith.constant 0 : index
    %0 = vector.load %arg1[%c0, %c0_0, %c0_1] : memref<8x8x16xf32, #tpu.memory_space<vmem>>, vector<8x8x16xf32>
    %cst = arith.constant dense<0.000000e+00> : vector<8x16xf32>
    %1 = vector.multi_reduction <add>, %0, %cst [0] : vector<8x8x16xf32> to vector<8x16xf32>
    %2 = vector.shape_cast %1 : vector<8x16xf32> to vector<1x8x16xf32>
    %cst_2 = arith.constant dense<0.000000e+00> : vector<1x8xf32>
    %3 = vector.multi_reduction <add>, %2, %cst_2 [2] : vector<1x8x16xf32> to vector<1x8xf32>
    %4 = vector.shape_cast %3 : vector<1x8xf32> to vector<1x8x1xf32>
    %cst_3 = arith.constant 7.812500e-03 : f32
    %5 = vector.broadcast %cst_3 : f32 to vector<1x8x1xf32>
    %6 = arith.mulf %4, %5 : vector<1x8x1xf32>
    %7 = vector.broadcast %6 : vector<1x8x1xf32> to vector<8x8x16xf32>
    %8 = arith.subf %0, %7 : vector<8x8x16xf32>
    %9 = arith.mulf %8, %8 : vector<8x8x16xf32>
    %cst_4 = arith.constant dense<0.000000e+00> : vector<8x16xf32>
    %10 = vector.multi_reduction <add>, %9, %cst_4 [0] : vector<8x8x16xf32> to vector<8x16xf32>
    %11 = vector.shape_cast %10 : vector<8x16xf32> to vector<1x8x16xf32>
    %cst_5 = arith.constant dense<0.000000e+00> : vector<1x8xf32>
    %12 = vector.multi_reduction <add>, %11, %cst_5 [2] : vector<1x8x16xf32> to vector<1x8xf32>
    %13 = vector.shape_cast %12 : vector<1x8xf32> to vector<1x8x1xf32>
    %cst_6 = arith.constant 7.812500e-03 : f32
    %14 = vector.broadcast %cst_6 : f32 to vector<1x8x1xf32>
    %15 = arith.mulf %13, %14 : vector<1x8x1xf32>
    %cst_7 = arith.constant 9.99999974E-6 : f32
    %16 = vector.broadcast %cst_7 : f32 to vector<1x8x1xf32>
    %17 = arith.addf %15, %16 : vector<1x8x1xf32>
    %18 = math.rsqrt %17 : vector<1x8x1xf32>
    %19 = vector.broadcast %18 : vector<1x8x1xf32> to vector<8x8x16xf32>
    %20 = arith.mulf %8, %19 : vector<8x8x16xf32>
    %c0_8 = arith.constant 0 : index
    %c0_9 = arith.constant 0 : index
    %21 = vector.load %arg2[%c0_8, %c0_9] : memref<1x16xf32, #tpu.memory_space<vmem>>, vector<1x16xf32>
    %22 = vector.shape_cast %21 : vector<1x16xf32> to vector<1x1x16xf32>
    %23 = vector.broadcast %22 : vector<1x1x16xf32> to vector<8x8x16xf32>
    %24 = arith.mulf %20, %23 : vector<8x8x16xf32>
    %c0_10 = arith.constant 0 : index
    %c0_11 = arith.constant 0 : index
    %25 = vector.load %arg3[%c0_10, %c0_11] : memref<1x16xf32, #tpu.memory_space<vmem>>, vector<1x16xf32>
    %26 = vector.shape_cast %25 : vector<1x16xf32> to vector<1x1x16xf32>
    %27 = vector.broadcast %26 : vector<1x1x16xf32> to vector<8x8x16xf32>
    %28 = arith.addf %24, %27 : vector<8x8x16xf32>
    %29 = vector.shape_cast %28 : vector<8x8x16xf32> to vector<64x16xf32>
    %c0_12 = arith.constant 0 : index
    %c0_13 = arith.constant 0 : index
    %30 = vector.load %arg4[%c0_12, %c0_13] : memref<16x512xf32, #tpu.memory_space<vmem>>, vector<16x512xf32>
    %cst_14 = arith.constant dense<0.000000e+00> : vector<64x512xf32>
    %31 = tpu.matmul %29, %30, %cst_14 {dimension_numbers = #tpu.dot_dimension_numbers<[1], [0], [0], [1], [0, 0, 1, 1], [], []>} : vector<64x16xf32>, vector<16x512xf32>, vector<64x512xf32> -> vector<64x512xf32>
    %c0_15 = arith.constant 0 : index
    %c0_16 = arith.constant 0 : index
    %32 = vector.load %arg6[%c0_15, %c0_16] : memref<1x512xf32, #tpu.memory_space<vmem>>, vector<1x512xf32>
    %33 = vector.broadcast %32 : vector<1x512xf32> to vector<64x512xf32>
    %34 = arith.addf %31, %33 : vector<64x512xf32>
    %c0_17 = arith.constant 0 : index
    %c0_18 = arith.constant 0 : index
    %35 = vector.load %arg14[%c0_17, %c0_18] : memref<64x512xf32, #tpu.memory_space<vmem>>, vector<64x512xf32>
    tpu.vector_store %arg14[%c0_17, %c0_18], %34 {strides = array<i32>} : memref<64x512xf32, #tpu.memory_space<vmem>>, vector<64x512xf32>,
    %c0_19 = arith.constant 0 : index
    %c0_20 = arith.constant 0 : index
    %36 = vector.load %arg7[%c0_19, %c0_20] : memref<16x512xf32, #tpu.memory_space<vmem>>, vector<16x512xf32>
    %cst_21 = arith.constant dense<0.000000e+00> : vector<64x512xf32>
    %37 = tpu.matmul %29, %36, %cst_21 {dimension_numbers = #tpu.dot_dimension_numbers<[1], [0], [0], [1], [0, 0, 1, 1], [], []>} : vector<64x16xf32>, vector<16x512xf32>, vector<64x512xf32> -> vector<64x512xf32>
    %c0_22 = arith.constant 0 : index
    %c0_23 = arith.constant 0 : index
    %38 = vector.load %arg9[%c0_22, %c0_23] : memref<1x512xf32, #tpu.memory_space<vmem>>, vector<1x512xf32>
    %39 = vector.broadcast %38 : vector<1x512xf32> to vector<64x512xf32>
    %40 = arith.addf %37, %39 : vector<64x512xf32>
    %c0_24 = arith.constant 0 : index
    %c0_25 = arith.constant 0 : index
    %41 = vector.load %arg15[%c0_24, %c0_25] : memref<64x512xf32, #tpu.memory_space<vmem>>, vector<64x512xf32>
    tpu.vector_store %arg15[%c0_24, %c0_25], %40 {strides = array<i32>} : memref<64x512xf32, #tpu.memory_space<vmem>>, vector<64x512xf32>,
    %cst_26 = arith.constant 0.000000e+00 : f32
    %42 = vector.broadcast %cst_26 : f32 to vector<8x128xf32>
    %c0_27 = arith.constant 0 : index
    %c0_28 = arith.constant 0 : index
    %43 = vector.load %arg18[%c0_27, %c0_28] : memref<8x128xf32, #tpu.memory_space<vmem>>, vector<8x128xf32>
    tpu.vector_store %arg18[%c0_27, %c0_28], %42 {strides = array<i32>} : memref<8x128xf32, #tpu.memory_space<vmem>>, vector<8x128xf32>,
    %cst_29 = arith.constant 0.000000e+00 : f32
    %44 = vector.broadcast %cst_29 : f32 to vector<8x128xf32>
    %c0_30 = arith.constant 0 : index
    %c0_31 = arith.constant 0 : index
    %45 = vector.load %arg19[%c0_30, %c0_31] : memref<8x128xf32, #tpu.memory_space<vmem>>, vector<8x128xf32>
    tpu.vector_store %arg19[%c0_30, %c0_31], %44 {strides = array<i32>} : memref<8x128xf32, #tpu.memory_space<vmem>>, vector<8x128xf32>,
    %cst_32 = arith.constant 0.000000e+00 : f32
    %46 = vector.broadcast %cst_32 : f32 to vector<8x128xf32>
    %c0_33 = arith.constant 0 : index
    %c0_34 = arith.constant 0 : index
    %47 = vector.load %arg20[%c0_33, %c0_34] : memref<8x128xf32, #tpu.memory_space<vmem>>, vector<8x128xf32>
    tpu.vector_store %arg20[%c0_33, %c0_34], %46 {strides = array<i32>} : memref<8x128xf32, #tpu.memory_space<vmem>>, vector<8x128xf32>,
    %cst_35 = arith.constant 0.000000e+00 : f32
    %48 = vector.broadcast %cst_35 : f32 to vector<8x128xf32>
    %c0_36 = arith.constant 0 : index
    %c0_37 = arith.constant 0 : index
    %49 = vector.load %arg21[%c0_36, %c0_37] : memref<8x128xf32, #tpu.memory_space<vmem>>, vector<8x128xf32>
    tpu.vector_store %arg21[%c0_36, %c0_37], %48 {strides = array<i32>} : memref<8x128xf32, #tpu.memory_space<vmem>>, vector<8x128xf32>,
    %c0_i32 = arith.constant 0 : i32
    %c8_i32 = arith.constant 8 : i32
    %50 = arith.muli %c0_i32, %c8_i32 : i32
    %51 = arith.index_cast %50 : i32 to index
    %c0_38 = arith.constant 0 : index
    %52 = vector.load %arg14[%51, %c0_38] : memref<64x512xf32, #tpu.memory_space<vmem>>, vector<8x512xf32>
    %c0_39 = arith.constant 0 : index
    %c0_40 = arith.constant 0 : index
    %53 = vector.load %arg18[%c0_39, %c0_40] : memref<8x128xf32, #tpu.memory_space<vmem>>, vector<8x128xf32>
    %c0_41 = arith.constant 0 : index
    %c0_42 = arith.constant 0 : index
    %54 = vector.load %arg5[%c0_41, %c0_42] : memref<128x512xf32, #tpu.memory_space<vmem>>, vector<128x512xf32>
    %cst_43 = arith.constant dense<0.000000e+00> : vector<8x512xf32>
    %55 = tpu.matmul %53, %54, %cst_43 {dimension_numbers = #tpu.dot_dimension_numbers<[1], [0], [0], [1], [0, 0, 1, 1], [], []>} : vector<8x128xf32>, vector<128x512xf32>, vector<8x512xf32> -> vector<8x512xf32>
    %56 = arith.addf %52, %55 : vector<8x512xf32>
    %57 = vector.extract_strided_slice %56 {offsets = [0, 0], sizes = [8, 128], strides = [1, 1]} : vector<8x512xf32> to vector<8x128xf32>
    %58 = arith.negf %57 : vector<8x128xf32>
    %59 = math.exp %58 : vector<8x128xf32>
    %cst_44 = arith.constant 1.000000e+00 : f32
    %60 = vector.broadcast %cst_44 : f32 to vector<8x128xf32>
    %61 = arith.addf %60, %59 : vector<8x128xf32>
    %62 = arith.divf %60, %61 : vector<8x128xf32>
    %63 = vector.extract_strided_slice %56 {offsets = [0, 128], sizes = [8, 128], strides = [1, 1]} : vector<8x512xf32> to vector<8x128xf32>
    %64 = arith.negf %63 : vector<8x128xf32>
    %65 = math.exp %64 : vector<8x128xf32>
    %cst_45 = arith.constant 1.000000e+00 : f32
    %66 = vector.broadcast %cst_45 : f32 to vector<8x128xf32>
    %67 = arith.addf %66, %65 : vector<8x128xf32>
    %68 = arith.divf %66, %67 : vector<8x128xf32>
    %69 = vector.extract_strided_slice %56 {offsets = [0, 256], sizes = [8, 128], strides = [1, 1]} : vector<8x512xf32> to vector<8x128xf32>
    %70 = math.tanh %69 : vector<8x128xf32>
    %71 = vector.extract_strided_slice %56 {offsets = [0, 384], sizes = [8, 128], strides = [1, 1]} : vector<8x512xf32> to vector<8x128xf32>
    %72 = arith.negf %71 : vector<8x128xf32>
    %73 = math.exp %72 : vector<8x128xf32>
    %cst_46 = arith.constant 1.000000e+00 : f32
    %74 = vector.broadcast %cst_46 : f32 to vector<8x128xf32>
    %75 = arith.addf %74, %73 : vector<8x128xf32>
    %76 = arith.divf %74, %75 : vector<8x128xf32>
    %c0_47 = arith.constant 0 : index
    %c0_48 = arith.constant 0 : index
    %77 = vector.load %arg19[%c0_47, %c0_48] : memref<8x128xf32, #tpu.memory_space<vmem>>, vector<8x128xf32>
    %78 = arith.mulf %68, %77 : vector<8x128xf32>
    %79 = arith.mulf %62, %70 : vector<8x128xf32>
    %80 = arith.addf %78, %79 : vector<8x128xf32>
    %81 = math.tanh %80 : vector<8x128xf32>
    %82 = arith.mulf %76, %81 : vector<8x128xf32>
    %c0_49 = arith.constant 0 : index
    %c0_50 = arith.constant 0 : index
    %83 = vector.load %arg19[%c0_49, %c0_50] : memref<8x128xf32, #tpu.memory_space<vmem>>, vector<8x128xf32>
    tpu.vector_store %arg19[%c0_49, %c0_50], %80 {strides = array<i32>} : memref<8x128xf32, #tpu.memory_space<vmem>>, vector<8x128xf32>,
    %c0_51 = arith.constant 0 : index
    %c0_52 = arith.constant 0 : index
    %84 = vector.load %arg18[%c0_51, %c0_52] : memref<8x128xf32, #tpu.memory_space<vmem>>, vector<8x128xf32>
    tpu.vector_store %arg18[%c0_51, %c0_52], %82 {strides = array<i32>} : memref<8x128xf32, #tpu.memory_space<vmem>>, vector<8x128xf32>,
    %85 = arith.index_cast %50 : i32 to index
    %c0_53 = arith.constant 0 : index
    %86 = vector.load %arg16[%85, %c0_53] : memref<64x128xf32, #tpu.memory_space<vmem>>, vector<8x128xf32>
    tpu.vector_store %arg16[%85, %c0_53], %82 {strides = array<i32>} : memref<64x128xf32, #tpu.memory_space<vmem>>, vector<8x128xf32>,
    %c7_i32 = arith.constant 7 : i32
    %87 = arith.subi %c7_i32, %c0_i32 : i32
    %c8_i32_54 = arith.constant 8 : i32
    %88 = arith.muli %87, %c8_i32_54 : i32
    %89 = arith.index_cast %88 : i32 to index
    %c0_55 = arith.constant 0 : index
    %90 = vector.load %arg15[%89, %c0_55] : memref<64x512xf32, #tpu.memory_space<vmem>>, vector<8x512xf32>
    %c0_56 = arith.constant 0 : index
    %c0_57 = arith.constant 0 : index
    %91 = vector.load %arg20[%c0_56, %c0_57] : memref<8x128xf32, #tpu.memory_space<vmem>>, vector<8x128xf32>
    %c0_58 = arith.constant 0 : index
    %c0_59 = arith.constant 0 : index
    %92 = vector.load %arg8[%c0_58, %c0_59] : memref<128x512xf32, #tpu.memory_space<vmem>>, vector<128x512xf32>
    %cst_60 = arith.constant dense<0.000000e+00> : vector<8x512xf32>
    %93 = tpu.matmul %91, %92, %cst_60 {dimension_numbers = #tpu.dot_dimension_numbers<[1], [0], [0], [1], [0, 0, 1, 1], [], []>} : vector<8x128xf32>, vector<128x512xf32>, vector<8x512xf32> -> vector<8x512xf32>
    %94 = arith.addf %90, %93 : vector<8x512xf32>
    %95 = vector.extract_strided_slice %94 {offsets = [0, 0], sizes = [8, 128], strides = [1, 1]} : vector<8x512xf32> to vector<8x128xf32>
    %96 = arith.negf %95 : vector<8x128xf32>
    %97 = math.exp %96 : vector<8x128xf32>
    %cst_61 = arith.constant 1.000000e+00 : f32
    %98 = vector.broadcast %cst_61 : f32 to vector<8x128xf32>
    %99 = arith.addf %98, %97 : vector<8x128xf32>
    %100 = arith.divf %98, %99 : vector<8x128xf32>
    %101 = vector.extract_strided_slice %94 {offsets = [0, 128], sizes = [8, 128], strides = [1, 1]} : vector<8x512xf32> to vector<8x128xf32>
    %102 = arith.negf %101 : vector<8x128xf32>
    %103 = math.exp %102 : vector<8x128xf32>
    %cst_62 = arith.constant 1.000000e+00 : f32
    %104 = vector.broadcast %cst_62 : f32 to vector<8x128xf32>
    %105 = arith.addf %104, %103 : vector<8x128xf32>
    %106 = arith.divf %104, %105 : vector<8x128xf32>
    %107 = vector.extract_strided_slice %94 {offsets = [0, 256], sizes = [8, 128], strides = [1, 1]} : vector<8x512xf32> to vector<8x128xf32>
    %108 = math.tanh %107 : vector<8x128xf32>
    %109 = vector.extract_strided_slice %94 {offsets = [0, 384], sizes = [8, 128], strides = [1, 1]} : vector<8x512xf32> to vector<8x128xf32>
    %110 = arith.negf %109 : vector<8x128xf32>
    %111 = math.exp %110 : vector<8x128xf32>
    %cst_63 = arith.constant 1.000000e+00 : f32
    %112 = vector.broadcast %cst_63 : f32 to vector<8x128xf32>
    %113 = arith.addf %112, %111 : vector<8x128xf32>
    %114 = arith.divf %112, %113 : vector<8x128xf32>
    %c0_64 = arith.constant 0 : index
    %c0_65 = arith.constant 0 : index
    %115 = vector.load %arg21[%c0_64, %c0_65] : memref<8x128xf32, #tpu.memory_space<vmem>>, vector<8x128xf32>
    %116 = arith.mulf %106, %115 : vector<8x128xf32>
    %117 = arith.mulf %100, %108 : vector<8x128xf32>
    %118 = arith.addf %116, %117 : vector<8x128xf32>
    %119 = math.tanh %118 : vector<8x128xf32>
    %120 = arith.mulf %114, %119 : vector<8x128xf32>
    %c0_66 = arith.constant 0 : index
    %c0_67 = arith.constant 0 : index
    %121 = vector.load %arg21[%c0_66, %c0_67] : memref<8x128xf32, #tpu.memory_space<vmem>>, vector<8x128xf32>
    tpu.vector_store %arg21[%c0_66, %c0_67], %118 {strides = array<i32>} : memref<8x128xf32, #tpu.memory_space<vmem>>, vector<8x128xf32>,
    %c0_68 = arith.constant 0 : index
    %c0_69 = arith.constant 0 : index
    %122 = vector.load %arg20[%c0_68, %c0_69] : memref<8x128xf32, #tpu.memory_space<vmem>>, vector<8x128xf32>
    tpu.vector_store %arg20[%c0_68, %c0_69], %120 {strides = array<i32>} : memref<8x128xf32, #tpu.memory_space<vmem>>, vector<8x128xf32>,
    %123 = arith.index_cast %88 : i32 to index
    %c0_70 = arith.constant 0 : index
    %124 = vector.load %arg17[%123, %c0_70] : memref<64x128xf32, #tpu.memory_space<vmem>>, vector<8x128xf32>
    tpu.vector_store %arg17[%123, %c0_70], %120 {strides = array<i32>} : memref<64x128xf32, #tpu.memory_space<vmem>>, vector<8x128xf32>,
    %c1_i32 = arith.constant 1 : i32
    %c8_i32_71 = arith.constant 8 : i32
    %125 = arith.muli %c1_i32, %c8_i32_71 : i32
    %126 = arith.index_cast %125 : i32 to index
    %c0_72 = arith.constant 0 : index
    %127 = vector.load %arg14[%126, %c0_72] : memref<64x512xf32, #tpu.memory_space<vmem>>, vector<8x512xf32>
    %c0_73 = arith.constant 0 : index
    %c0_74 = arith.constant 0 : index
    %128 = vector.load %arg18[%c0_73, %c0_74] : memref<8x128xf32, #tpu.memory_space<vmem>>, vector<8x128xf32>
    %c0_75 = arith.constant 0 : index
    %c0_76 = arith.constant 0 : index
    %129 = vector.load %arg5[%c0_75, %c0_76] : memref<128x512xf32, #tpu.memory_space<vmem>>, vector<128x512xf32>
    %cst_77 = arith.constant dense<0.000000e+00> : vector<8x512xf32>
    %130 = tpu.matmul %128, %129, %cst_77 {dimension_numbers = #tpu.dot_dimension_numbers<[1], [0], [0], [1], [0, 0, 1, 1], [], []>} : vector<8x128xf32>, vector<128x512xf32>, vector<8x512xf32> -> vector<8x512xf32>
    %131 = arith.addf %127, %130 : vector<8x512xf32>
    %132 = vector.extract_strided_slice %131 {offsets = [0, 0], sizes = [8, 128], strides = [1, 1]} : vector<8x512xf32> to vector<8x128xf32>
    %133 = arith.negf %132 : vector<8x128xf32>
    %134 = math.exp %133 : vector<8x128xf32>
    %cst_78 = arith.constant 1.000000e+00 : f32
    %135 = vector.broadcast %cst_78 : f32 to vector<8x128xf32>
    %136 = arith.addf %135, %134 : vector<8x128xf32>
    %137 = arith.divf %135, %136 : vector<8x128xf32>
    %138 = vector.extract_strided_slice %131 {offsets = [0, 128], sizes = [8, 128], strides = [1, 1]} : vector<8x512xf32> to vector<8x128xf32>
    %139 = arith.negf %138 : vector<8x128xf32>
    %140 = math.exp %139 : vector<8x128xf32>
    %cst_79 = arith.constant 1.000000e+00 : f32
    %141 = vector.broadcast %cst_79 : f32 to vector<8x128xf32>
    %142 = arith.addf %141, %140 : vector<8x128xf32>
    %143 = arith.divf %141, %142 : vector<8x128xf32>
    %144 = vector.extract_strided_slice %131 {offsets = [0, 256], sizes = [8, 128], strides = [1, 1]} : vector<8x512xf32> to vector<8x128xf32>
    %145 = math.tanh %144 : vector<8x128xf32>
    %146 = vector.extract_strided_slice %131 {offsets = [0, 384], sizes = [8, 128], strides = [1, 1]} : vector<8x512xf32> to vector<8x128xf32>
    %147 = arith.negf %146 : vector<8x128xf32>
    %148 = math.exp %147 : vector<8x128xf32>
    %cst_80 = arith.constant 1.000000e+00 : f32
    %149 = vector.broadcast %cst_80 : f32 to vector<8x128xf32>
    %150 = arith.addf %149, %148 : vector<8x128xf32>
    %151 = arith.divf %149, %150 : vector<8x128xf32>
    %c0_81 = arith.constant 0 : index
    %c0_82 = arith.constant 0 : index
    %152 = vector.load %arg19[%c0_81, %c0_82] : memref<8x128xf32, #tpu.memory_space<vmem>>, vector<8x128xf32>
    %153 = arith.mulf %143, %152 : vector<8x128xf32>
    %154 = arith.mulf %137, %145 : vector<8x128xf32>
    %155 = arith.addf %153, %154 : vector<8x128xf32>
    %156 = math.tanh %155 : vector<8x128xf32>
    %157 = arith.mulf %151, %156 : vector<8x128xf32>
    %c0_83 = arith.constant 0 : index
    %c0_84 = arith.constant 0 : index
    %158 = vector.load %arg19[%c0_83, %c0_84] : memref<8x128xf32, #tpu.memory_space<vmem>>, vector<8x128xf32>
    tpu.vector_store %arg19[%c0_83, %c0_84], %155 {strides = array<i32>} : memref<8x128xf32, #tpu.memory_space<vmem>>, vector<8x128xf32>,
    %c0_85 = arith.constant 0 : index
    %c0_86 = arith.constant 0 : index
    %159 = vector.load %arg18[%c0_85, %c0_86] : memref<8x128xf32, #tpu.memory_space<vmem>>, vector<8x128xf32>
    tpu.vector_store %arg18[%c0_85, %c0_86], %157 {strides = array<i32>} : memref<8x128xf32, #tpu.memory_space<vmem>>, vector<8x128xf32>,
    %160 = arith.index_cast %125 : i32 to index
    %c0_87 = arith.constant 0 : index
    %161 = vector.load %arg16[%160, %c0_87] : memref<64x128xf32, #tpu.memory_space<vmem>>, vector<8x128xf32>
    tpu.vector_store %arg16[%160, %c0_87], %157 {strides = array<i32>} : memref<64x128xf32, #tpu.memory_space<vmem>>, vector<8x128xf32>,
    %c7_i32_88 = arith.constant 7 : i32
    %162 = arith.subi %c7_i32_88, %c1_i32 : i32
    %c8_i32_89 = arith.constant 8 : i32
    %163 = arith.muli %162, %c8_i32_89 : i32
    %164 = arith.index_cast %163 : i32 to index
    %c0_90 = arith.constant 0 : index
    %165 = vector.load %arg15[%164, %c0_90] : memref<64x512xf32, #tpu.memory_space<vmem>>, vector<8x512xf32>
    %c0_91 = arith.constant 0 : index
    %c0_92 = arith.constant 0 : index
    %166 = vector.load %arg20[%c0_91, %c0_92] : memref<8x128xf32, #tpu.memory_space<vmem>>, vector<8x128xf32>
    %c0_93 = arith.constant 0 : index
    %c0_94 = arith.constant 0 : index
    %167 = vector.load %arg8[%c0_93, %c0_94] : memref<128x512xf32, #tpu.memory_space<vmem>>, vector<128x512xf32>
    %cst_95 = arith.constant dense<0.000000e+00> : vector<8x512xf32>
    %168 = tpu.matmul %166, %167, %cst_95 {dimension_numbers = #tpu.dot_dimension_numbers<[1], [0], [0], [1], [0, 0, 1, 1], [], []>} : vector<8x128xf32>, vector<128x512xf32>, vector<8x512xf32> -> vector<8x512xf32>
    %169 = arith.addf %165, %168 : vector<8x512xf32>
    %170 = vector.extract_strided_slice %169 {offsets = [0, 0], sizes = [8, 128], strides = [1, 1]} : vector<8x512xf32> to vector<8x128xf32>
    %171 = arith.negf %170 : vector<8x128xf32>
    %172 = math.exp %171 : vector<8x128xf32>
    %cst_96 = arith.constant 1.000000e+00 : f32
    %173 = vector.broadcast %cst_96 : f32 to vector<8x128xf32>
    %174 = arith.addf %173, %172 : vector<8x128xf32>
    %175 = arith.divf %173, %174 : vector<8x128xf32>
    %176 = vector.extract_strided_slice %169 {offsets = [0, 128], sizes = [8, 128], strides = [1, 1]} : vector<8x512xf32> to vector<8x128xf32>
    %177 = arith.negf %176 : vector<8x128xf32>
    %178 = math.exp %177 : vector<8x128xf32>
    %cst_97 = arith.constant 1.000000e+00 : f32
    %179 = vector.broadcast %cst_97 : f32 to vector<8x128xf32>
    %180 = arith.addf %179, %178 : vector<8x128xf32>
    %181 = arith.divf %179, %180 : vector<8x128xf32>
    %182 = vector.extract_strided_slice %169 {offsets = [0, 256], sizes = [8, 128], strides = [1, 1]} : vector<8x512xf32> to vector<8x128xf32>
    %183 = math.tanh %182 : vector<8x128xf32>
    %184 = vector.extract_strided_slice %169 {offsets = [0, 384], sizes = [8, 128], strides = [1, 1]} : vector<8x512xf32> to vector<8x128xf32>
    %185 = arith.negf %184 : vector<8x128xf32>
    %186 = math.exp %185 : vector<8x128xf32>
    %cst_98 = arith.constant 1.000000e+00 : f32
    %187 = vector.broadcast %cst_98 : f32 to vector<8x128xf32>
    %188 = arith.addf %187, %186 : vector<8x128xf32>
    %189 = arith.divf %187, %188 : vector<8x128xf32>
    %c0_99 = arith.constant 0 : index
    %c0_100 = arith.constant 0 : index
    %190 = vector.load %arg21[%c0_99, %c0_100] : memref<8x128xf32, #tpu.memory_space<vmem>>, vector<8x128xf32>
    %191 = arith.mulf %181, %190 : vector<8x128xf32>
    %192 = arith.mulf %175, %183 : vector<8x128xf32>
    %193 = arith.addf %191, %192 : vector<8x128xf32>
    %194 = math.tanh %193 : vector<8x128xf32>
    %195 = arith.mulf %189, %194 : vector<8x128xf32>
    %c0_101 = arith.constant 0 : index
    %c0_102 = arith.constant 0 : index
    %196 = vector.load %arg21[%c0_101, %c0_102] : memref<8x128xf32, #tpu.memory_space<vmem>>, vector<8x128xf32>
    tpu.vector_store %arg21[%c0_101, %c0_102], %193 {strides = array<i32>} : memref<8x128xf32, #tpu.memory_space<vmem>>, vector<8x128xf32>,
    %c0_103 = arith.constant 0 : index
    %c0_104 = arith.constant 0 : index
    %197 = vector.load %arg20[%c0_103, %c0_104] : memref<8x128xf32, #tpu.memory_space<vmem>>, vector<8x128xf32>
    tpu.vector_store %arg20[%c0_103, %c0_104], %195 {strides = array<i32>} : memref<8x128xf32, #tpu.memory_space<vmem>>, vector<8x128xf32>,
    %198 = arith.index_cast %163 : i32 to index
    %c0_105 = arith.constant 0 : index
    %199 = vector.load %arg17[%198, %c0_105] : memref<64x128xf32, #tpu.memory_space<vmem>>, vector<8x128xf32>
    tpu.vector_store %arg17[%198, %c0_105], %195 {strides = array<i32>} : memref<64x128xf32, #tpu.memory_space<vmem>>, vector<8x128xf32>,
    %c2_i32 = arith.constant 2 : i32
    %c8_i32_106 = arith.constant 8 : i32
    %200 = arith.muli %c2_i32, %c8_i32_106 : i32
    %201 = arith.index_cast %200 : i32 to index
    %c0_107 = arith.constant 0 : index
    %202 = vector.load %arg14[%201, %c0_107] : memref<64x512xf32, #tpu.memory_space<vmem>>, vector<8x512xf32>
    %c0_108 = arith.constant 0 : index
    %c0_109 = arith.constant 0 : index
    %203 = vector.load %arg18[%c0_108, %c0_109] : memref<8x128xf32, #tpu.memory_space<vmem>>, vector<8x128xf32>
    %c0_110 = arith.constant 0 : index
    %c0_111 = arith.constant 0 : index
    %204 = vector.load %arg5[%c0_110, %c0_111] : memref<128x512xf32, #tpu.memory_space<vmem>>, vector<128x512xf32>
    %cst_112 = arith.constant dense<0.000000e+00> : vector<8x512xf32>
    %205 = tpu.matmul %203, %204, %cst_112 {dimension_numbers = #tpu.dot_dimension_numbers<[1], [0], [0], [1], [0, 0, 1, 1], [], []>} : vector<8x128xf32>, vector<128x512xf32>, vector<8x512xf32> -> vector<8x512xf32>
    %206 = arith.addf %202, %205 : vector<8x512xf32>
    %207 = vector.extract_strided_slice %206 {offsets = [0, 0], sizes = [8, 128], strides = [1, 1]} : vector<8x512xf32> to vector<8x128xf32>
    %208 = arith.negf %207 : vector<8x128xf32>
    %209 = math.exp %208 : vector<8x128xf32>
    %cst_113 = arith.constant 1.000000e+00 : f32
    %210 = vector.broadcast %cst_113 : f32 to vector<8x128xf32>
    %211 = arith.addf %210, %209 : vector<8x128xf32>
    %212 = arith.divf %210, %211 : vector<8x128xf32>
    %213 = vector.extract_strided_slice %206 {offsets = [0, 128], sizes = [8, 128], strides = [1, 1]} : vector<8x512xf32> to vector<8x128xf32>
    %214 = arith.negf %213 : vector<8x128xf32>
    %215 = math.exp %214 : vector<8x128xf32>
    %cst_114 = arith.constant 1.000000e+00 : f32
    %216 = vector.broadcast %cst_114 : f32 to vector<8x128xf32>
    %217 = arith.addf %216, %215 : vector<8x128xf32>
    %218 = arith.divf %216, %217 : vector<8x128xf32>
    %219 = vector.extract_strided_slice %206 {offsets = [0, 256], sizes = [8, 128], strides = [1, 1]} : vector<8x512xf32> to vector<8x128xf32>
    %220 = math.tanh %219 : vector<8x128xf32>
    %221 = vector.extract_strided_slice %206 {offsets = [0, 384], sizes = [8, 128], strides = [1, 1]} : vector<8x512xf32> to vector<8x128xf32>
    %222 = arith.negf %221 : vector<8x128xf32>
    %223 = math.exp %222 : vector<8x128xf32>
    %cst_115 = arith.constant 1.000000e+00 : f32
    %224 = vector.broadcast %cst_115 : f32 to vector<8x128xf32>
    %225 = arith.addf %224, %223 : vector<8x128xf32>
    %226 = arith.divf %224, %225 : vector<8x128xf32>
    %c0_116 = arith.constant 0 : index
    %c0_117 = arith.constant 0 : index
    %227 = vector.load %arg19[%c0_116, %c0_117] : memref<8x128xf32, #tpu.memory_space<vmem>>, vector<8x128xf32>
    %228 = arith.mulf %218, %227 : vector<8x128xf32>
    %229 = arith.mulf %212, %220 : vector<8x128xf32>
    %230 = arith.addf %228, %229 : vector<8x128xf32>
    %231 = math.tanh %230 : vector<8x128xf32>
    %232 = arith.mulf %226, %231 : vector<8x128xf32>
    %c0_118 = arith.constant 0 : index
    %c0_119 = arith.constant 0 : index
    %233 = vector.load %arg19[%c0_118, %c0_119] : memref<8x128xf32, #tpu.memory_space<vmem>>, vector<8x128xf32>
    tpu.vector_store %arg19[%c0_118, %c0_119], %230 {strides = array<i32>} : memref<8x128xf32, #tpu.memory_space<vmem>>, vector<8x128xf32>,
    %c0_120 = arith.constant 0 : index
    %c0_121 = arith.constant 0 : index
    %234 = vector.load %arg18[%c0_120, %c0_121] : memref<8x128xf32, #tpu.memory_space<vmem>>, vector<8x128xf32>
    tpu.vector_store %arg18[%c0_120, %c0_121], %232 {strides = array<i32>} : memref<8x128xf32, #tpu.memory_space<vmem>>, vector<8x128xf32>,
    %235 = arith.index_cast %200 : i32 to index
    %c0_122 = arith.constant 0 : index
    %236 = vector.load %arg16[%235, %c0_122] : memref<64x128xf32, #tpu.memory_space<vmem>>, vector<8x128xf32>
    tpu.vector_store %arg16[%235, %c0_122], %232 {strides = array<i32>} : memref<64x128xf32, #tpu.memory_space<vmem>>, vector<8x128xf32>,
    %c7_i32_123 = arith.constant 7 : i32
    %237 = arith.subi %c7_i32_123, %c2_i32 : i32
    %c8_i32_124 = arith.constant 8 : i32
    %238 = arith.muli %237, %c8_i32_124 : i32
    %239 = arith.index_cast %238 : i32 to index
    %c0_125 = arith.constant 0 : index
    %240 = vector.load %arg15[%239, %c0_125] : memref<64x512xf32, #tpu.memory_space<vmem>>, vector<8x512xf32>
    %c0_126 = arith.constant 0 : index
    %c0_127 = arith.constant 0 : index
    %241 = vector.load %arg20[%c0_126, %c0_127] : memref<8x128xf32, #tpu.memory_space<vmem>>, vector<8x128xf32>
    %c0_128 = arith.constant 0 : index
    %c0_129 = arith.constant 0 : index
    %242 = vector.load %arg8[%c0_128, %c0_129] : memref<128x512xf32, #tpu.memory_space<vmem>>, vector<128x512xf32>
    %cst_130 = arith.constant dense<0.000000e+00> : vector<8x512xf32>
    %243 = tpu.matmul %241, %242, %cst_130 {dimension_numbers = #tpu.dot_dimension_numbers<[1], [0], [0], [1], [0, 0, 1, 1], [], []>} : vector<8x128xf32>, vector<128x512xf32>, vector<8x512xf32> -> vector<8x512xf32>
    %244 = arith.addf %240, %243 : vector<8x512xf32>
    %245 = vector.extract_strided_slice %244 {offsets = [0, 0], sizes = [8, 128], strides = [1, 1]} : vector<8x512xf32> to vector<8x128xf32>
    %246 = arith.negf %245 : vector<8x128xf32>
    %247 = math.exp %246 : vector<8x128xf32>
    %cst_131 = arith.constant 1.000000e+00 : f32
    %248 = vector.broadcast %cst_131 : f32 to vector<8x128xf32>
    %249 = arith.addf %248, %247 : vector<8x128xf32>
    %250 = arith.divf %248, %249 : vector<8x128xf32>
    %251 = vector.extract_strided_slice %244 {offsets = [0, 128], sizes = [8, 128], strides = [1, 1]} : vector<8x512xf32> to vector<8x128xf32>
    %252 = arith.negf %251 : vector<8x128xf32>
    %253 = math.exp %252 : vector<8x128xf32>
    %cst_132 = arith.constant 1.000000e+00 : f32
    %254 = vector.broadcast %cst_132 : f32 to vector<8x128xf32>
    %255 = arith.addf %254, %253 : vector<8x128xf32>
    %256 = arith.divf %254, %255 : vector<8x128xf32>
    %257 = vector.extract_strided_slice %244 {offsets = [0, 256], sizes = [8, 128], strides = [1, 1]} : vector<8x512xf32> to vector<8x128xf32>
    %258 = math.tanh %257 : vector<8x128xf32>
    %259 = vector.extract_strided_slice %244 {offsets = [0, 384], sizes = [8, 128], strides = [1, 1]} : vector<8x512xf32> to vector<8x128xf32>
    %260 = arith.negf %259 : vector<8x128xf32>
    %261 = math.exp %260 : vector<8x128xf32>
    %cst_133 = arith.constant 1.000000e+00 : f32
    %262 = vector.broadcast %cst_133 : f32 to vector<8x128xf32>
    %263 = arith.addf %262, %261 : vector<8x128xf32>
    %264 = arith.divf %262, %263 : vector<8x128xf32>
    %c0_134 = arith.constant 0 : index
    %c0_135 = arith.constant 0 : index
    %265 = vector.load %arg21[%c0_134, %c0_135] : memref<8x128xf32, #tpu.memory_space<vmem>>, vector<8x128xf32>
    %266 = arith.mulf %256, %265 : vector<8x128xf32>
    %267 = arith.mulf %250, %258 : vector<8x128xf32>
    %268 = arith.addf %266, %267 : vector<8x128xf32>
    %269 = math.tanh %268 : vector<8x128xf32>
    %270 = arith.mulf %264, %269 : vector<8x128xf32>
    %c0_136 = arith.constant 0 : index
    %c0_137 = arith.constant 0 : index
    %271 = vector.load %arg21[%c0_136, %c0_137] : memref<8x128xf32, #tpu.memory_space<vmem>>, vector<8x128xf32>
    tpu.vector_store %arg21[%c0_136, %c0_137], %268 {strides = array<i32>} : memref<8x128xf32, #tpu.memory_space<vmem>>, vector<8x128xf32>,
    %c0_138 = arith.constant 0 : index
    %c0_139 = arith.constant 0 : index
    %272 = vector.load %arg20[%c0_138, %c0_139] : memref<8x128xf32, #tpu.memory_space<vmem>>, vector<8x128xf32>
    tpu.vector_store %arg20[%c0_138, %c0_139], %270 {strides = array<i32>} : memref<8x128xf32, #tpu.memory_space<vmem>>, vector<8x128xf32>,
    %273 = arith.index_cast %238 : i32 to index
    %c0_140 = arith.constant 0 : index
    %274 = vector.load %arg17[%273, %c0_140] : memref<64x128xf32, #tpu.memory_space<vmem>>, vector<8x128xf32>
    tpu.vector_store %arg17[%273, %c0_140], %270 {strides = array<i32>} : memref<64x128xf32, #tpu.memory_space<vmem>>, vector<8x128xf32>,
    %c3_i32 = arith.constant 3 : i32
    %c8_i32_141 = arith.constant 8 : i32
    %275 = arith.muli %c3_i32, %c8_i32_141 : i32
    %276 = arith.index_cast %275 : i32 to index
    %c0_142 = arith.constant 0 : index
    %277 = vector.load %arg14[%276, %c0_142] : memref<64x512xf32, #tpu.memory_space<vmem>>, vector<8x512xf32>
    %c0_143 = arith.constant 0 : index
    %c0_144 = arith.constant 0 : index
    %278 = vector.load %arg18[%c0_143, %c0_144] : memref<8x128xf32, #tpu.memory_space<vmem>>, vector<8x128xf32>
    %c0_145 = arith.constant 0 : index
    %c0_146 = arith.constant 0 : index
    %279 = vector.load %arg5[%c0_145, %c0_146] : memref<128x512xf32, #tpu.memory_space<vmem>>, vector<128x512xf32>
    %cst_147 = arith.constant dense<0.000000e+00> : vector<8x512xf32>
    %280 = tpu.matmul %278, %279, %cst_147 {dimension_numbers = #tpu.dot_dimension_numbers<[1], [0], [0], [1], [0, 0, 1, 1], [], []>} : vector<8x128xf32>, vector<128x512xf32>, vector<8x512xf32> -> vector<8x512xf32>
    %281 = arith.addf %277, %280 : vector<8x512xf32>
    %282 = vector.extract_strided_slice %281 {offsets = [0, 0], sizes = [8, 128], strides = [1, 1]} : vector<8x512xf32> to vector<8x128xf32>
    %283 = arith.negf %282 : vector<8x128xf32>
    %284 = math.exp %283 : vector<8x128xf32>
    %cst_148 = arith.constant 1.000000e+00 : f32
    %285 = vector.broadcast %cst_148 : f32 to vector<8x128xf32>
    %286 = arith.addf %285, %284 : vector<8x128xf32>
    %287 = arith.divf %285, %286 : vector<8x128xf32>
    %288 = vector.extract_strided_slice %281 {offsets = [0, 128], sizes = [8, 128], strides = [1, 1]} : vector<8x512xf32> to vector<8x128xf32>
    %289 = arith.negf %288 : vector<8x128xf32>
    %290 = math.exp %289 : vector<8x128xf32>
    %cst_149 = arith.constant 1.000000e+00 : f32
    %291 = vector.broadcast %cst_149 : f32 to vector<8x128xf32>
    %292 = arith.addf %291, %290 : vector<8x128xf32>
    %293 = arith.divf %291, %292 : vector<8x128xf32>
    %294 = vector.extract_strided_slice %281 {offsets = [0, 256], sizes = [8, 128], strides = [1, 1]} : vector<8x512xf32> to vector<8x128xf32>
    %295 = math.tanh %294 : vector<8x128xf32>
    %296 = vector.extract_strided_slice %281 {offsets = [0, 384], sizes = [8, 128], strides = [1, 1]} : vector<8x512xf32> to vector<8x128xf32>
    %297 = arith.negf %296 : vector<8x128xf32>
    %298 = math.exp %297 : vector<8x128xf32>
    %cst_150 = arith.constant 1.000000e+00 : f32
    %299 = vector.broadcast %cst_150 : f32 to vector<8x128xf32>
    %300 = arith.addf %299, %298 : vector<8x128xf32>
    %301 = arith.divf %299, %300 : vector<8x128xf32>
    %c0_151 = arith.constant 0 : index
    %c0_152 = arith.constant 0 : index
    %302 = vector.load %arg19[%c0_151, %c0_152] : memref<8x128xf32, #tpu.memory_space<vmem>>, vector<8x128xf32>
    %303 = arith.mulf %293, %302 : vector<8x128xf32>
    %304 = arith.mulf %287, %295 : vector<8x128xf32>
    %305 = arith.addf %303, %304 : vector<8x128xf32>
    %306 = math.tanh %305 : vector<8x128xf32>
    %307 = arith.mulf %301, %306 : vector<8x128xf32>
    %c0_153 = arith.constant 0 : index
    %c0_154 = arith.constant 0 : index
    %308 = vector.load %arg19[%c0_153, %c0_154] : memref<8x128xf32, #tpu.memory_space<vmem>>, vector<8x128xf32>
    tpu.vector_store %arg19[%c0_153, %c0_154], %305 {strides = array<i32>} : memref<8x128xf32, #tpu.memory_space<vmem>>, vector<8x128xf32>,
    %c0_155 = arith.constant 0 : index
    %c0_156 = arith.constant 0 : index
    %309 = vector.load %arg18[%c0_155, %c0_156] : memref<8x128xf32, #tpu.memory_space<vmem>>, vector<8x128xf32>
    tpu.vector_store %arg18[%c0_155, %c0_156], %307 {strides = array<i32>} : memref<8x128xf32, #tpu.memory_space<vmem>>, vector<8x128xf32>,
    %310 = arith.index_cast %275 : i32 to index
    %c0_157 = arith.constant 0 : index
    %311 = vector.load %arg16[%310, %c0_157] : memref<64x128xf32, #tpu.memory_space<vmem>>, vector<8x128xf32>
    tpu.vector_store %arg16[%310, %c0_157], %307 {strides = array<i32>} : memref<64x128xf32, #tpu.memory_space<vmem>>, vector<8x128xf32>,
    %c7_i32_158 = arith.constant 7 : i32
    %312 = arith.subi %c7_i32_158, %c3_i32 : i32
    %c8_i32_159 = arith.constant 8 : i32
    %313 = arith.muli %312, %c8_i32_159 : i32
    %314 = arith.index_cast %313 : i32 to index
    %c0_160 = arith.constant 0 : index
    %315 = vector.load %arg15[%314, %c0_160] : memref<64x512xf32, #tpu.memory_space<vmem>>, vector<8x512xf32>
    %c0_161 = arith.constant 0 : index
    %c0_162 = arith.constant 0 : index
    %316 = vector.load %arg20[%c0_161, %c0_162] : memref<8x128xf32, #tpu.memory_space<vmem>>, vector<8x128xf32>
    %c0_163 = arith.constant 0 : index
    %c0_164 = arith.constant 0 : index
    %317 = vector.load %arg8[%c0_163, %c0_164] : memref<128x512xf32, #tpu.memory_space<vmem>>, vector<128x512xf32>
    %cst_165 = arith.constant dense<0.000000e+00> : vector<8x512xf32>
    %318 = tpu.matmul %316, %317, %cst_165 {dimension_numbers = #tpu.dot_dimension_numbers<[1], [0], [0], [1], [0, 0, 1, 1], [], []>} : vector<8x128xf32>, vector<128x512xf32>, vector<8x512xf32> -> vector<8x512xf32>
    %319 = arith.addf %315, %318 : vector<8x512xf32>
    %320 = vector.extract_strided_slice %319 {offsets = [0, 0], sizes = [8, 128], strides = [1, 1]} : vector<8x512xf32> to vector<8x128xf32>
    %321 = arith.negf %320 : vector<8x128xf32>
    %322 = math.exp %321 : vector<8x128xf32>
    %cst_166 = arith.constant 1.000000e+00 : f32
    %323 = vector.broadcast %cst_166 : f32 to vector<8x128xf32>
    %324 = arith.addf %323, %322 : vector<8x128xf32>
    %325 = arith.divf %323, %324 : vector<8x128xf32>
    %326 = vector.extract_strided_slice %319 {offsets = [0, 128], sizes = [8, 128], strides = [1, 1]} : vector<8x512xf32> to vector<8x128xf32>
    %327 = arith.negf %326 : vector<8x128xf32>
    %328 = math.exp %327 : vector<8x128xf32>
    %cst_167 = arith.constant 1.000000e+00 : f32
    %329 = vector.broadcast %cst_167 : f32 to vector<8x128xf32>
    %330 = arith.addf %329, %328 : vector<8x128xf32>
    %331 = arith.divf %329, %330 : vector<8x128xf32>
    %332 = vector.extract_strided_slice %319 {offsets = [0, 256], sizes = [8, 128], strides = [1, 1]} : vector<8x512xf32> to vector<8x128xf32>
    %333 = math.tanh %332 : vector<8x128xf32>
    %334 = vector.extract_strided_slice %319 {offsets = [0, 384], sizes = [8, 128], strides = [1, 1]} : vector<8x512xf32> to vector<8x128xf32>
    %335 = arith.negf %334 : vector<8x128xf32>
    %336 = math.exp %335 : vector<8x128xf32>
    %cst_168 = arith.constant 1.000000e+00 : f32
    %337 = vector.broadcast %cst_168 : f32 to vector<8x128xf32>
    %338 = arith.addf %337, %336 : vector<8x128xf32>
    %339 = arith.divf %337, %338 : vector<8x128xf32>
    %c0_169 = arith.constant 0 : index
    %c0_170 = arith.constant 0 : index
    %340 = vector.load %arg21[%c0_169, %c0_170] : memref<8x128xf32, #tpu.memory_space<vmem>>, vector<8x128xf32>
    %341 = arith.mulf %331, %340 : vector<8x128xf32>
    %342 = arith.mulf %325, %333 : vector<8x128xf32>
    %343 = arith.addf %341, %342 : vector<8x128xf32>
    %344 = math.tanh %343 : vector<8x128xf32>
    %345 = arith.mulf %339, %344 : vector<8x128xf32>
    %c0_171 = arith.constant 0 : index
    %c0_172 = arith.constant 0 : index
    %346 = vector.load %arg21[%c0_171, %c0_172] : memref<8x128xf32, #tpu.memory_space<vmem>>, vector<8x128xf32>
    tpu.vector_store %arg21[%c0_171, %c0_172], %343 {strides = array<i32>} : memref<8x128xf32, #tpu.memory_space<vmem>>, vector<8x128xf32>,
    %c0_173 = arith.constant 0 : index
    %c0_174 = arith.constant 0 : index
    %347 = vector.load %arg20[%c0_173, %c0_174] : memref<8x128xf32, #tpu.memory_space<vmem>>, vector<8x128xf32>
    tpu.vector_store %arg20[%c0_173, %c0_174], %345 {strides = array<i32>} : memref<8x128xf32, #tpu.memory_space<vmem>>, vector<8x128xf32>,
    %348 = arith.index_cast %313 : i32 to index
    %c0_175 = arith.constant 0 : index
    %349 = vector.load %arg17[%348, %c0_175] : memref<64x128xf32, #tpu.memory_space<vmem>>, vector<8x128xf32>
    tpu.vector_store %arg17[%348, %c0_175], %345 {strides = array<i32>} : memref<64x128xf32, #tpu.memory_space<vmem>>, vector<8x128xf32>,
    %c4_i32 = arith.constant 4 : i32
    %c8_i32_176 = arith.constant 8 : i32
    %350 = arith.muli %c4_i32, %c8_i32_176 : i32
    %351 = arith.index_cast %350 : i32 to index
    %c0_177 = arith.constant 0 : index
    %352 = vector.load %arg14[%351, %c0_177] : memref<64x512xf32, #tpu.memory_space<vmem>>, vector<8x512xf32>
    %c0_178 = arith.constant 0 : index
    %c0_179 = arith.constant 0 : index
    %353 = vector.load %arg18[%c0_178, %c0_179] : memref<8x128xf32, #tpu.memory_space<vmem>>, vector<8x128xf32>
    %c0_180 = arith.constant 0 : index
    %c0_181 = arith.constant 0 : index
    %354 = vector.load %arg5[%c0_180, %c0_181] : memref<128x512xf32, #tpu.memory_space<vmem>>, vector<128x512xf32>
    %cst_182 = arith.constant dense<0.000000e+00> : vector<8x512xf32>
    %355 = tpu.matmul %353, %354, %cst_182 {dimension_numbers = #tpu.dot_dimension_numbers<[1], [0], [0], [1], [0, 0, 1, 1], [], []>} : vector<8x128xf32>, vector<128x512xf32>, vector<8x512xf32> -> vector<8x512xf32>
    %356 = arith.addf %352, %355 : vector<8x512xf32>
    %357 = vector.extract_strided_slice %356 {offsets = [0, 0], sizes = [8, 128], strides = [1, 1]} : vector<8x512xf32> to vector<8x128xf32>
    %358 = arith.negf %357 : vector<8x128xf32>
    %359 = math.exp %358 : vector<8x128xf32>
    %cst_183 = arith.constant 1.000000e+00 : f32
    %360 = vector.broadcast %cst_183 : f32 to vector<8x128xf32>
    %361 = arith.addf %360, %359 : vector<8x128xf32>
    %362 = arith.divf %360, %361 : vector<8x128xf32>
    %363 = vector.extract_strided_slice %356 {offsets = [0, 128], sizes = [8, 128], strides = [1, 1]} : vector<8x512xf32> to vector<8x128xf32>
    %364 = arith.negf %363 : vector<8x128xf32>
    %365 = math.exp %364 : vector<8x128xf32>
    %cst_184 = arith.constant 1.000000e+00 : f32
    %366 = vector.broadcast %cst_184 : f32 to vector<8x128xf32>
    %367 = arith.addf %366, %365 : vector<8x128xf32>
    %368 = arith.divf %366, %367 : vector<8x128xf32>
    %369 = vector.extract_strided_slice %356 {offsets = [0, 256], sizes = [8, 128], strides = [1, 1]} : vector<8x512xf32> to vector<8x128xf32>
    %370 = math.tanh %369 : vector<8x128xf32>
    %371 = vector.extract_strided_slice %356 {offsets = [0, 384], sizes = [8, 128], strides = [1, 1]} : vector<8x512xf32> to vector<8x128xf32>
    %372 = arith.negf %371 : vector<8x128xf32>
    %373 = math.exp %372 : vector<8x128xf32>
    %cst_185 = arith.constant 1.000000e+00 : f32
    %374 = vector.broadcast %cst_185 : f32 to vector<8x128xf32>
    %375 = arith.addf %374, %373 : vector<8x128xf32>
    %376 = arith.divf %374, %375 : vector<8x128xf32>
    %c0_186 = arith.constant 0 : index
    %c0_187 = arith.constant 0 : index
    %377 = vector.load %arg19[%c0_186, %c0_187] : memref<8x128xf32, #tpu.memory_space<vmem>>, vector<8x128xf32>
    %378 = arith.mulf %368, %377 : vector<8x128xf32>
    %379 = arith.mulf %362, %370 : vector<8x128xf32>
    %380 = arith.addf %378, %379 : vector<8x128xf32>
    %381 = math.tanh %380 : vector<8x128xf32>
    %382 = arith.mulf %376, %381 : vector<8x128xf32>
    %c0_188 = arith.constant 0 : index
    %c0_189 = arith.constant 0 : index
    %383 = vector.load %arg19[%c0_188, %c0_189] : memref<8x128xf32, #tpu.memory_space<vmem>>, vector<8x128xf32>
    tpu.vector_store %arg19[%c0_188, %c0_189], %380 {strides = array<i32>} : memref<8x128xf32, #tpu.memory_space<vmem>>, vector<8x128xf32>,
    %c0_190 = arith.constant 0 : index
    %c0_191 = arith.constant 0 : index
    %384 = vector.load %arg18[%c0_190, %c0_191] : memref<8x128xf32, #tpu.memory_space<vmem>>, vector<8x128xf32>
    tpu.vector_store %arg18[%c0_190, %c0_191], %382 {strides = array<i32>} : memref<8x128xf32, #tpu.memory_space<vmem>>, vector<8x128xf32>,
    %385 = arith.index_cast %350 : i32 to index
    %c0_192 = arith.constant 0 : index
    %386 = vector.load %arg16[%385, %c0_192] : memref<64x128xf32, #tpu.memory_space<vmem>>, vector<8x128xf32>
    tpu.vector_store %arg16[%385, %c0_192], %382 {strides = array<i32>} : memref<64x128xf32, #tpu.memory_space<vmem>>, vector<8x128xf32>,
    %c7_i32_193 = arith.constant 7 : i32
    %387 = arith.subi %c7_i32_193, %c4_i32 : i32
    %c8_i32_194 = arith.constant 8 : i32
    %388 = arith.muli %387, %c8_i32_194 : i32
    %389 = arith.index_cast %388 : i32 to index
    %c0_195 = arith.constant 0 : index
    %390 = vector.load %arg15[%389, %c0_195] : memref<64x512xf32, #tpu.memory_space<vmem>>, vector<8x512xf32>
    %c0_196 = arith.constant 0 : index
    %c0_197 = arith.constant 0 : index
    %391 = vector.load %arg20[%c0_196, %c0_197] : memref<8x128xf32, #tpu.memory_space<vmem>>, vector<8x128xf32>
    %c0_198 = arith.constant 0 : index
    %c0_199 = arith.constant 0 : index
    %392 = vector.load %arg8[%c0_198, %c0_199] : memref<128x512xf32, #tpu.memory_space<vmem>>, vector<128x512xf32>
    %cst_200 = arith.constant dense<0.000000e+00> : vector<8x512xf32>
    %393 = tpu.matmul %391, %392, %cst_200 {dimension_numbers = #tpu.dot_dimension_numbers<[1], [0], [0], [1], [0, 0, 1, 1], [], []>} : vector<8x128xf32>, vector<128x512xf32>, vector<8x512xf32> -> vector<8x512xf32>
    %394 = arith.addf %390, %393 : vector<8x512xf32>
    %395 = vector.extract_strided_slice %394 {offsets = [0, 0], sizes = [8, 128], strides = [1, 1]} : vector<8x512xf32> to vector<8x128xf32>
    %396 = arith.negf %395 : vector<8x128xf32>
    %397 = math.exp %396 : vector<8x128xf32>
    %cst_201 = arith.constant 1.000000e+00 : f32
    %398 = vector.broadcast %cst_201 : f32 to vector<8x128xf32>
    %399 = arith.addf %398, %397 : vector<8x128xf32>
    %400 = arith.divf %398, %399 : vector<8x128xf32>
    %401 = vector.extract_strided_slice %394 {offsets = [0, 128], sizes = [8, 128], strides = [1, 1]} : vector<8x512xf32> to vector<8x128xf32>
    %402 = arith.negf %401 : vector<8x128xf32>
    %403 = math.exp %402 : vector<8x128xf32>
    %cst_202 = arith.constant 1.000000e+00 : f32
    %404 = vector.broadcast %cst_202 : f32 to vector<8x128xf32>
    %405 = arith.addf %404, %403 : vector<8x128xf32>
    %406 = arith.divf %404, %405 : vector<8x128xf32>
    %407 = vector.extract_strided_slice %394 {offsets = [0, 256], sizes = [8, 128], strides = [1, 1]} : vector<8x512xf32> to vector<8x128xf32>
    %408 = math.tanh %407 : vector<8x128xf32>
    %409 = vector.extract_strided_slice %394 {offsets = [0, 384], sizes = [8, 128], strides = [1, 1]} : vector<8x512xf32> to vector<8x128xf32>
    %410 = arith.negf %409 : vector<8x128xf32>
    %411 = math.exp %410 : vector<8x128xf32>
    %cst_203 = arith.constant 1.000000e+00 : f32
    %412 = vector.broadcast %cst_203 : f32 to vector<8x128xf32>
    %413 = arith.addf %412, %411 : vector<8x128xf32>
    %414 = arith.divf %412, %413 : vector<8x128xf32>
    %c0_204 = arith.constant 0 : index
    %c0_205 = arith.constant 0 : index
    %415 = vector.load %arg21[%c0_204, %c0_205] : memref<8x128xf32, #tpu.memory_space<vmem>>, vector<8x128xf32>
    %416 = arith.mulf %406, %415 : vector<8x128xf32>
    %417 = arith.mulf %400, %408 : vector<8x128xf32>
    %418 = arith.addf %416, %417 : vector<8x128xf32>
    %419 = math.tanh %418 : vector<8x128xf32>
    %420 = arith.mulf %414, %419 : vector<8x128xf32>
    %c0_206 = arith.constant 0 : index
    %c0_207 = arith.constant 0 : index
    %421 = vector.load %arg21[%c0_206, %c0_207] : memref<8x128xf32, #tpu.memory_space<vmem>>, vector<8x128xf32>
    tpu.vector_store %arg21[%c0_206, %c0_207], %418 {strides = array<i32>} : memref<8x128xf32, #tpu.memory_space<vmem>>, vector<8x128xf32>,
    %c0_208 = arith.constant 0 : index
    %c0_209 = arith.constant 0 : index
    %422 = vector.load %arg20[%c0_208, %c0_209] : memref<8x128xf32, #tpu.memory_space<vmem>>, vector<8x128xf32>
    tpu.vector_store %arg20[%c0_208, %c0_209], %420 {strides = array<i32>} : memref<8x128xf32, #tpu.memory_space<vmem>>, vector<8x128xf32>,
    %423 = arith.index_cast %388 : i32 to index
    %c0_210 = arith.constant 0 : index
    %424 = vector.load %arg17[%423, %c0_210] : memref<64x128xf32, #tpu.memory_space<vmem>>, vector<8x128xf32>
    tpu.vector_store %arg17[%423, %c0_210], %420 {strides = array<i32>} : memref<64x128xf32, #tpu.memory_space<vmem>>, vector<8x128xf32>,
    %c5_i32 = arith.constant 5 : i32
    %c8_i32_211 = arith.constant 8 : i32
    %425 = arith.muli %c5_i32, %c8_i32_211 : i32
    %426 = arith.index_cast %425 : i32 to index
    %c0_212 = arith.constant 0 : index
    %427 = vector.load %arg14[%426, %c0_212] : memref<64x512xf32, #tpu.memory_space<vmem>>, vector<8x512xf32>
    %c0_213 = arith.constant 0 : index
    %c0_214 = arith.constant 0 : index
    %428 = vector.load %arg18[%c0_213, %c0_214] : memref<8x128xf32, #tpu.memory_space<vmem>>, vector<8x128xf32>
    %c0_215 = arith.constant 0 : index
    %c0_216 = arith.constant 0 : index
    %429 = vector.load %arg5[%c0_215, %c0_216] : memref<128x512xf32, #tpu.memory_space<vmem>>, vector<128x512xf32>
    %cst_217 = arith.constant dense<0.000000e+00> : vector<8x512xf32>
    %430 = tpu.matmul %428, %429, %cst_217 {dimension_numbers = #tpu.dot_dimension_numbers<[1], [0], [0], [1], [0, 0, 1, 1], [], []>} : vector<8x128xf32>, vector<128x512xf32>, vector<8x512xf32> -> vector<8x512xf32>
    %431 = arith.addf %427, %430 : vector<8x512xf32>
    %432 = vector.extract_strided_slice %431 {offsets = [0, 0], sizes = [8, 128], strides = [1, 1]} : vector<8x512xf32> to vector<8x128xf32>
    %433 = arith.negf %432 : vector<8x128xf32>
    %434 = math.exp %433 : vector<8x128xf32>
    %cst_218 = arith.constant 1.000000e+00 : f32
    %435 = vector.broadcast %cst_218 : f32 to vector<8x128xf32>
    %436 = arith.addf %435, %434 : vector<8x128xf32>
    %437 = arith.divf %435, %436 : vector<8x128xf32>
    %438 = vector.extract_strided_slice %431 {offsets = [0, 128], sizes = [8, 128], strides = [1, 1]} : vector<8x512xf32> to vector<8x128xf32>
    %439 = arith.negf %438 : vector<8x128xf32>
    %440 = math.exp %439 : vector<8x128xf32>
    %cst_219 = arith.constant 1.000000e+00 : f32
    %441 = vector.broadcast %cst_219 : f32 to vector<8x128xf32>
    %442 = arith.addf %441, %440 : vector<8x128xf32>
    %443 = arith.divf %441, %442 : vector<8x128xf32>
    %444 = vector.extract_strided_slice %431 {offsets = [0, 256], sizes = [8, 128], strides = [1, 1]} : vector<8x512xf32> to vector<8x128xf32>
    %445 = math.tanh %444 : vector<8x128xf32>
    %446 = vector.extract_strided_slice %431 {offsets = [0, 384], sizes = [8, 128], strides = [1, 1]} : vector<8x512xf32> to vector<8x128xf32>
    %447 = arith.negf %446 : vector<8x128xf32>
    %448 = math.exp %447 : vector<8x128xf32>
    %cst_220 = arith.constant 1.000000e+00 : f32
    %449 = vector.broadcast %cst_220 : f32 to vector<8x128xf32>
    %450 = arith.addf %449, %448 : vector<8x128xf32>
    %451 = arith.divf %449, %450 : vector<8x128xf32>
    %c0_221 = arith.constant 0 : index
    %c0_222 = arith.constant 0 : index
    %452 = vector.load %arg19[%c0_221, %c0_222] : memref<8x128xf32, #tpu.memory_space<vmem>>, vector<8x128xf32>
    %453 = arith.mulf %443, %452 : vector<8x128xf32>
    %454 = arith.mulf %437, %445 : vector<8x128xf32>
    %455 = arith.addf %453, %454 : vector<8x128xf32>
    %456 = math.tanh %455 : vector<8x128xf32>
    %457 = arith.mulf %451, %456 : vector<8x128xf32>
    %c0_223 = arith.constant 0 : index
    %c0_224 = arith.constant 0 : index
    %458 = vector.load %arg19[%c0_223, %c0_224] : memref<8x128xf32, #tpu.memory_space<vmem>>, vector<8x128xf32>
    tpu.vector_store %arg19[%c0_223, %c0_224], %455 {strides = array<i32>} : memref<8x128xf32, #tpu.memory_space<vmem>>, vector<8x128xf32>,
    %c0_225 = arith.constant 0 : index
    %c0_226 = arith.constant 0 : index
    %459 = vector.load %arg18[%c0_225, %c0_226] : memref<8x128xf32, #tpu.memory_space<vmem>>, vector<8x128xf32>
    tpu.vector_store %arg18[%c0_225, %c0_226], %457 {strides = array<i32>} : memref<8x128xf32, #tpu.memory_space<vmem>>, vector<8x128xf32>,
    %460 = arith.index_cast %425 : i32 to index
    %c0_227 = arith.constant 0 : index
    %461 = vector.load %arg16[%460, %c0_227] : memref<64x128xf32, #tpu.memory_space<vmem>>, vector<8x128xf32>
    tpu.vector_store %arg16[%460, %c0_227], %457 {strides = array<i32>} : memref<64x128xf32, #tpu.memory_space<vmem>>, vector<8x128xf32>,
    %c7_i32_228 = arith.constant 7 : i32
    %462 = arith.subi %c7_i32_228, %c5_i32 : i32
    %c8_i32_229 = arith.constant 8 : i32
    %463 = arith.muli %462, %c8_i32_229 : i32
    %464 = arith.index_cast %463 : i32 to index
    %c0_230 = arith.constant 0 : index
    %465 = vector.load %arg15[%464, %c0_230] : memref<64x512xf32, #tpu.memory_space<vmem>>, vector<8x512xf32>
    %c0_231 = arith.constant 0 : index
    %c0_232 = arith.constant 0 : index
    %466 = vector.load %arg20[%c0_231, %c0_232] : memref<8x128xf32, #tpu.memory_space<vmem>>, vector<8x128xf32>
    %c0_233 = arith.constant 0 : index
    %c0_234 = arith.constant 0 : index
    %467 = vector.load %arg8[%c0_233, %c0_234] : memref<128x512xf32, #tpu.memory_space<vmem>>, vector<128x512xf32>
    %cst_235 = arith.constant dense<0.000000e+00> : vector<8x512xf32>
    %468 = tpu.matmul %466, %467, %cst_235 {dimension_numbers = #tpu.dot_dimension_numbers<[1], [0], [0], [1], [0, 0, 1, 1], [], []>} : vector<8x128xf32>, vector<128x512xf32>, vector<8x512xf32> -> vector<8x512xf32>
    %469 = arith.addf %465, %468 : vector<8x512xf32>
    %470 = vector.extract_strided_slice %469 {offsets = [0, 0], sizes = [8, 128], strides = [1, 1]} : vector<8x512xf32> to vector<8x128xf32>
    %471 = arith.negf %470 : vector<8x128xf32>
    %472 = math.exp %471 : vector<8x128xf32>
    %cst_236 = arith.constant 1.000000e+00 : f32
    %473 = vector.broadcast %cst_236 : f32 to vector<8x128xf32>
    %474 = arith.addf %473, %472 : vector<8x128xf32>
    %475 = arith.divf %473, %474 : vector<8x128xf32>
    %476 = vector.extract_strided_slice %469 {offsets = [0, 128], sizes = [8, 128], strides = [1, 1]} : vector<8x512xf32> to vector<8x128xf32>
    %477 = arith.negf %476 : vector<8x128xf32>
    %478 = math.exp %477 : vector<8x128xf32>
    %cst_237 = arith.constant 1.000000e+00 : f32
    %479 = vector.broadcast %cst_237 : f32 to vector<8x128xf32>
    %480 = arith.addf %479, %478 : vector<8x128xf32>
    %481 = arith.divf %479, %480 : vector<8x128xf32>
    %482 = vector.extract_strided_slice %469 {offsets = [0, 256], sizes = [8, 128], strides = [1, 1]} : vector<8x512xf32> to vector<8x128xf32>
    %483 = math.tanh %482 : vector<8x128xf32>
    %484 = vector.extract_strided_slice %469 {offsets = [0, 384], sizes = [8, 128], strides = [1, 1]} : vector<8x512xf32> to vector<8x128xf32>
    %485 = arith.negf %484 : vector<8x128xf32>
    %486 = math.exp %485 : vector<8x128xf32>
    %cst_238 = arith.constant 1.000000e+00 : f32
    %487 = vector.broadcast %cst_238 : f32 to vector<8x128xf32>
    %488 = arith.addf %487, %486 : vector<8x128xf32>
    %489 = arith.divf %487, %488 : vector<8x128xf32>
    %c0_239 = arith.constant 0 : index
    %c0_240 = arith.constant 0 : index
    %490 = vector.load %arg21[%c0_239, %c0_240] : memref<8x128xf32, #tpu.memory_space<vmem>>, vector<8x128xf32>
    %491 = arith.mulf %481, %490 : vector<8x128xf32>
    %492 = arith.mulf %475, %483 : vector<8x128xf32>
    %493 = arith.addf %491, %492 : vector<8x128xf32>
    %494 = math.tanh %493 : vector<8x128xf32>
    %495 = arith.mulf %489, %494 : vector<8x128xf32>
    %c0_241 = arith.constant 0 : index
    %c0_242 = arith.constant 0 : index
    %496 = vector.load %arg21[%c0_241, %c0_242] : memref<8x128xf32, #tpu.memory_space<vmem>>, vector<8x128xf32>
    tpu.vector_store %arg21[%c0_241, %c0_242], %493 {strides = array<i32>} : memref<8x128xf32, #tpu.memory_space<vmem>>, vector<8x128xf32>,
    %c0_243 = arith.constant 0 : index
    %c0_244 = arith.constant 0 : index
    %497 = vector.load %arg20[%c0_243, %c0_244] : memref<8x128xf32, #tpu.memory_space<vmem>>, vector<8x128xf32>
    tpu.vector_store %arg20[%c0_243, %c0_244], %495 {strides = array<i32>} : memref<8x128xf32, #tpu.memory_space<vmem>>, vector<8x128xf32>,
    %498 = arith.index_cast %463 : i32 to index
    %c0_245 = arith.constant 0 : index
    %499 = vector.load %arg17[%498, %c0_245] : memref<64x128xf32, #tpu.memory_space<vmem>>, vector<8x128xf32>
    tpu.vector_store %arg17[%498, %c0_245], %495 {strides = array<i32>} : memref<64x128xf32, #tpu.memory_space<vmem>>, vector<8x128xf32>,
    %c6_i32 = arith.constant 6 : i32
    %c8_i32_246 = arith.constant 8 : i32
    %500 = arith.muli %c6_i32, %c8_i32_246 : i32
    %501 = arith.index_cast %500 : i32 to index
    %c0_247 = arith.constant 0 : index
    %502 = vector.load %arg14[%501, %c0_247] : memref<64x512xf32, #tpu.memory_space<vmem>>, vector<8x512xf32>
    %c0_248 = arith.constant 0 : index
    %c0_249 = arith.constant 0 : index
    %503 = vector.load %arg18[%c0_248, %c0_249] : memref<8x128xf32, #tpu.memory_space<vmem>>, vector<8x128xf32>
    %c0_250 = arith.constant 0 : index
    %c0_251 = arith.constant 0 : index
    %504 = vector.load %arg5[%c0_250, %c0_251] : memref<128x512xf32, #tpu.memory_space<vmem>>, vector<128x512xf32>
    %cst_252 = arith.constant dense<0.000000e+00> : vector<8x512xf32>
    %505 = tpu.matmul %503, %504, %cst_252 {dimension_numbers = #tpu.dot_dimension_numbers<[1], [0], [0], [1], [0, 0, 1, 1], [], []>} : vector<8x128xf32>, vector<128x512xf32>, vector<8x512xf32> -> vector<8x512xf32>
    %506 = arith.addf %502, %505 : vector<8x512xf32>
    %507 = vector.extract_strided_slice %506 {offsets = [0, 0], sizes = [8, 128], strides = [1, 1]} : vector<8x512xf32> to vector<8x128xf32>
    %508 = arith.negf %507 : vector<8x128xf32>
    %509 = math.exp %508 : vector<8x128xf32>
    %cst_253 = arith.constant 1.000000e+00 : f32
    %510 = vector.broadcast %cst_253 : f32 to vector<8x128xf32>
    %511 = arith.addf %510, %509 : vector<8x128xf32>
    %512 = arith.divf %510, %511 : vector<8x128xf32>
    %513 = vector.extract_strided_slice %506 {offsets = [0, 128], sizes = [8, 128], strides = [1, 1]} : vector<8x512xf32> to vector<8x128xf32>
    %514 = arith.negf %513 : vector<8x128xf32>
    %515 = math.exp %514 : vector<8x128xf32>
    %cst_254 = arith.constant 1.000000e+00 : f32
    %516 = vector.broadcast %cst_254 : f32 to vector<8x128xf32>
    %517 = arith.addf %516, %515 : vector<8x128xf32>
    %518 = arith.divf %516, %517 : vector<8x128xf32>
    %519 = vector.extract_strided_slice %506 {offsets = [0, 256], sizes = [8, 128], strides = [1, 1]} : vector<8x512xf32> to vector<8x128xf32>
    %520 = math.tanh %519 : vector<8x128xf32>
    %521 = vector.extract_strided_slice %506 {offsets = [0, 384], sizes = [8, 128], strides = [1, 1]} : vector<8x512xf32> to vector<8x128xf32>
    %522 = arith.negf %521 : vector<8x128xf32>
    %523 = math.exp %522 : vector<8x128xf32>
    %cst_255 = arith.constant 1.000000e+00 : f32
    %524 = vector.broadcast %cst_255 : f32 to vector<8x128xf32>
    %525 = arith.addf %524, %523 : vector<8x128xf32>
    %526 = arith.divf %524, %525 : vector<8x128xf32>
    %c0_256 = arith.constant 0 : index
    %c0_257 = arith.constant 0 : index
    %527 = vector.load %arg19[%c0_256, %c0_257] : memref<8x128xf32, #tpu.memory_space<vmem>>, vector<8x128xf32>
    %528 = arith.mulf %518, %527 : vector<8x128xf32>
    %529 = arith.mulf %512, %520 : vector<8x128xf32>
    %530 = arith.addf %528, %529 : vector<8x128xf32>
    %531 = math.tanh %530 : vector<8x128xf32>
    %532 = arith.mulf %526, %531 : vector<8x128xf32>
    %c0_258 = arith.constant 0 : index
    %c0_259 = arith.constant 0 : index
    %533 = vector.load %arg19[%c0_258, %c0_259] : memref<8x128xf32, #tpu.memory_space<vmem>>, vector<8x128xf32>
    tpu.vector_store %arg19[%c0_258, %c0_259], %530 {strides = array<i32>} : memref<8x128xf32, #tpu.memory_space<vmem>>, vector<8x128xf32>,
    %c0_260 = arith.constant 0 : index
    %c0_261 = arith.constant 0 : index
    %534 = vector.load %arg18[%c0_260, %c0_261] : memref<8x128xf32, #tpu.memory_space<vmem>>, vector<8x128xf32>
    tpu.vector_store %arg18[%c0_260, %c0_261], %532 {strides = array<i32>} : memref<8x128xf32, #tpu.memory_space<vmem>>, vector<8x128xf32>,
    %535 = arith.index_cast %500 : i32 to index
    %c0_262 = arith.constant 0 : index
    %536 = vector.load %arg16[%535, %c0_262] : memref<64x128xf32, #tpu.memory_space<vmem>>, vector<8x128xf32>
    tpu.vector_store %arg16[%535, %c0_262], %532 {strides = array<i32>} : memref<64x128xf32, #tpu.memory_space<vmem>>, vector<8x128xf32>,
    %c7_i32_263 = arith.constant 7 : i32
    %537 = arith.subi %c7_i32_263, %c6_i32 : i32
    %c8_i32_264 = arith.constant 8 : i32
    %538 = arith.muli %537, %c8_i32_264 : i32
    %539 = arith.index_cast %538 : i32 to index
    %c0_265 = arith.constant 0 : index
    %540 = vector.load %arg15[%539, %c0_265] : memref<64x512xf32, #tpu.memory_space<vmem>>, vector<8x512xf32>
    %c0_266 = arith.constant 0 : index
    %c0_267 = arith.constant 0 : index
    %541 = vector.load %arg20[%c0_266, %c0_267] : memref<8x128xf32, #tpu.memory_space<vmem>>, vector<8x128xf32>
    %c0_268 = arith.constant 0 : index
    %c0_269 = arith.constant 0 : index
    %542 = vector.load %arg8[%c0_268, %c0_269] : memref<128x512xf32, #tpu.memory_space<vmem>>, vector<128x512xf32>
    %cst_270 = arith.constant dense<0.000000e+00> : vector<8x512xf32>
    %543 = tpu.matmul %541, %542, %cst_270 {dimension_numbers = #tpu.dot_dimension_numbers<[1], [0], [0], [1], [0, 0, 1, 1], [], []>} : vector<8x128xf32>, vector<128x512xf32>, vector<8x512xf32> -> vector<8x512xf32>
    %544 = arith.addf %540, %543 : vector<8x512xf32>
    %545 = vector.extract_strided_slice %544 {offsets = [0, 0], sizes = [8, 128], strides = [1, 1]} : vector<8x512xf32> to vector<8x128xf32>
    %546 = arith.negf %545 : vector<8x128xf32>
    %547 = math.exp %546 : vector<8x128xf32>
    %cst_271 = arith.constant 1.000000e+00 : f32
    %548 = vector.broadcast %cst_271 : f32 to vector<8x128xf32>
    %549 = arith.addf %548, %547 : vector<8x128xf32>
    %550 = arith.divf %548, %549 : vector<8x128xf32>
    %551 = vector.extract_strided_slice %544 {offsets = [0, 128], sizes = [8, 128], strides = [1, 1]} : vector<8x512xf32> to vector<8x128xf32>
    %552 = arith.negf %551 : vector<8x128xf32>
    %553 = math.exp %552 : vector<8x128xf32>
    %cst_272 = arith.constant 1.000000e+00 : f32
    %554 = vector.broadcast %cst_272 : f32 to vector<8x128xf32>
    %555 = arith.addf %554, %553 : vector<8x128xf32>
    %556 = arith.divf %554, %555 : vector<8x128xf32>
    %557 = vector.extract_strided_slice %544 {offsets = [0, 256], sizes = [8, 128], strides = [1, 1]} : vector<8x512xf32> to vector<8x128xf32>
    %558 = math.tanh %557 : vector<8x128xf32>
    %559 = vector.extract_strided_slice %544 {offsets = [0, 384], sizes = [8, 128], strides = [1, 1]} : vector<8x512xf32> to vector<8x128xf32>
    %560 = arith.negf %559 : vector<8x128xf32>
    %561 = math.exp %560 : vector<8x128xf32>
    %cst_273 = arith.constant 1.000000e+00 : f32
    %562 = vector.broadcast %cst_273 : f32 to vector<8x128xf32>
    %563 = arith.addf %562, %561 : vector<8x128xf32>
    %564 = arith.divf %562, %563 : vector<8x128xf32>
    %c0_274 = arith.constant 0 : index
    %c0_275 = arith.constant 0 : index
    %565 = vector.load %arg21[%c0_274, %c0_275] : memref<8x128xf32, #tpu.memory_space<vmem>>, vector<8x128xf32>
    %566 = arith.mulf %556, %565 : vector<8x128xf32>
    %567 = arith.mulf %550, %558 : vector<8x128xf32>
    %568 = arith.addf %566, %567 : vector<8x128xf32>
    %569 = math.tanh %568 : vector<8x128xf32>
    %570 = arith.mulf %564, %569 : vector<8x128xf32>
    %c0_276 = arith.constant 0 : index
    %c0_277 = arith.constant 0 : index
    %571 = vector.load %arg21[%c0_276, %c0_277] : memref<8x128xf32, #tpu.memory_space<vmem>>, vector<8x128xf32>
    tpu.vector_store %arg21[%c0_276, %c0_277], %568 {strides = array<i32>} : memref<8x128xf32, #tpu.memory_space<vmem>>, vector<8x128xf32>,
    %c0_278 = arith.constant 0 : index
    %c0_279 = arith.constant 0 : index
    %572 = vector.load %arg20[%c0_278, %c0_279] : memref<8x128xf32, #tpu.memory_space<vmem>>, vector<8x128xf32>
    tpu.vector_store %arg20[%c0_278, %c0_279], %570 {strides = array<i32>} : memref<8x128xf32, #tpu.memory_space<vmem>>, vector<8x128xf32>,
    %573 = arith.index_cast %538 : i32 to index
    %c0_280 = arith.constant 0 : index
    %574 = vector.load %arg17[%573, %c0_280] : memref<64x128xf32, #tpu.memory_space<vmem>>, vector<8x128xf32>
    tpu.vector_store %arg17[%573, %c0_280], %570 {strides = array<i32>} : memref<64x128xf32, #tpu.memory_space<vmem>>, vector<8x128xf32>,
    %c7_i32_281 = arith.constant 7 : i32
    %c8_i32_282 = arith.constant 8 : i32
    %575 = arith.muli %c7_i32_281, %c8_i32_282 : i32
    %576 = arith.index_cast %575 : i32 to index
    %c0_283 = arith.constant 0 : index
    %577 = vector.load %arg14[%576, %c0_283] : memref<64x512xf32, #tpu.memory_space<vmem>>, vector<8x512xf32>
    %c0_284 = arith.constant 0 : index
    %c0_285 = arith.constant 0 : index
    %578 = vector.load %arg18[%c0_284, %c0_285] : memref<8x128xf32, #tpu.memory_space<vmem>>, vector<8x128xf32>
    %c0_286 = arith.constant 0 : index
    %c0_287 = arith.constant 0 : index
    %579 = vector.load %arg5[%c0_286, %c0_287] : memref<128x512xf32, #tpu.memory_space<vmem>>, vector<128x512xf32>
    %cst_288 = arith.constant dense<0.000000e+00> : vector<8x512xf32>
    %580 = tpu.matmul %578, %579, %cst_288 {dimension_numbers = #tpu.dot_dimension_numbers<[1], [0], [0], [1], [0, 0, 1, 1], [], []>} : vector<8x128xf32>, vector<128x512xf32>, vector<8x512xf32> -> vector<8x512xf32>
    %581 = arith.addf %577, %580 : vector<8x512xf32>
    %582 = vector.extract_strided_slice %581 {offsets = [0, 0], sizes = [8, 128], strides = [1, 1]} : vector<8x512xf32> to vector<8x128xf32>
    %583 = arith.negf %582 : vector<8x128xf32>
    %584 = math.exp %583 : vector<8x128xf32>
    %cst_289 = arith.constant 1.000000e+00 : f32
    %585 = vector.broadcast %cst_289 : f32 to vector<8x128xf32>
    %586 = arith.addf %585, %584 : vector<8x128xf32>
    %587 = arith.divf %585, %586 : vector<8x128xf32>
    %588 = vector.extract_strided_slice %581 {offsets = [0, 128], sizes = [8, 128], strides = [1, 1]} : vector<8x512xf32> to vector<8x128xf32>
    %589 = arith.negf %588 : vector<8x128xf32>
    %590 = math.exp %589 : vector<8x128xf32>
    %cst_290 = arith.constant 1.000000e+00 : f32
    %591 = vector.broadcast %cst_290 : f32 to vector<8x128xf32>
    %592 = arith.addf %591, %590 : vector<8x128xf32>
    %593 = arith.divf %591, %592 : vector<8x128xf32>
    %594 = vector.extract_strided_slice %581 {offsets = [0, 256], sizes = [8, 128], strides = [1, 1]} : vector<8x512xf32> to vector<8x128xf32>
    %595 = math.tanh %594 : vector<8x128xf32>
    %596 = vector.extract_strided_slice %581 {offsets = [0, 384], sizes = [8, 128], strides = [1, 1]} : vector<8x512xf32> to vector<8x128xf32>
    %597 = arith.negf %596 : vector<8x128xf32>
    %598 = math.exp %597 : vector<8x128xf32>
    %cst_291 = arith.constant 1.000000e+00 : f32
    %599 = vector.broadcast %cst_291 : f32 to vector<8x128xf32>
    %600 = arith.addf %599, %598 : vector<8x128xf32>
    %601 = arith.divf %599, %600 : vector<8x128xf32>
    %c0_292 = arith.constant 0 : index
    %c0_293 = arith.constant 0 : index
    %602 = vector.load %arg19[%c0_292, %c0_293] : memref<8x128xf32, #tpu.memory_space<vmem>>, vector<8x128xf32>
    %603 = arith.mulf %593, %602 : vector<8x128xf32>
    %604 = arith.mulf %587, %595 : vector<8x128xf32>
    %605 = arith.addf %603, %604 : vector<8x128xf32>
    %606 = math.tanh %605 : vector<8x128xf32>
    %607 = arith.mulf %601, %606 : vector<8x128xf32>
    %c0_294 = arith.constant 0 : index
    %c0_295 = arith.constant 0 : index
    %608 = vector.load %arg19[%c0_294, %c0_295] : memref<8x128xf32, #tpu.memory_space<vmem>>, vector<8x128xf32>
    tpu.vector_store %arg19[%c0_294, %c0_295], %605 {strides = array<i32>} : memref<8x128xf32, #tpu.memory_space<vmem>>, vector<8x128xf32>,
    %c0_296 = arith.constant 0 : index
    %c0_297 = arith.constant 0 : index
    %609 = vector.load %arg18[%c0_296, %c0_297] : memref<8x128xf32, #tpu.memory_space<vmem>>, vector<8x128xf32>
    tpu.vector_store %arg18[%c0_296, %c0_297], %607 {strides = array<i32>} : memref<8x128xf32, #tpu.memory_space<vmem>>, vector<8x128xf32>,
    %610 = arith.index_cast %575 : i32 to index
    %c0_298 = arith.constant 0 : index
    %611 = vector.load %arg16[%610, %c0_298] : memref<64x128xf32, #tpu.memory_space<vmem>>, vector<8x128xf32>
    tpu.vector_store %arg16[%610, %c0_298], %607 {strides = array<i32>} : memref<64x128xf32, #tpu.memory_space<vmem>>, vector<8x128xf32>,
    %c7_i32_299 = arith.constant 7 : i32
    %612 = arith.subi %c7_i32_299, %c7_i32_281 : i32
    %c8_i32_300 = arith.constant 8 : i32
    %613 = arith.muli %612, %c8_i32_300 : i32
    %614 = arith.index_cast %613 : i32 to index
    %c0_301 = arith.constant 0 : index
    %615 = vector.load %arg15[%614, %c0_301] : memref<64x512xf32, #tpu.memory_space<vmem>>, vector<8x512xf32>
    %c0_302 = arith.constant 0 : index
    %c0_303 = arith.constant 0 : index
    %616 = vector.load %arg20[%c0_302, %c0_303] : memref<8x128xf32, #tpu.memory_space<vmem>>, vector<8x128xf32>
    %c0_304 = arith.constant 0 : index
    %c0_305 = arith.constant 0 : index
    %617 = vector.load %arg8[%c0_304, %c0_305] : memref<128x512xf32, #tpu.memory_space<vmem>>, vector<128x512xf32>
    %cst_306 = arith.constant dense<0.000000e+00> : vector<8x512xf32>
    %618 = tpu.matmul %616, %617, %cst_306 {dimension_numbers = #tpu.dot_dimension_numbers<[1], [0], [0], [1], [0, 0, 1, 1], [], []>} : vector<8x128xf32>, vector<128x512xf32>, vector<8x512xf32> -> vector<8x512xf32>
    %619 = arith.addf %615, %618 : vector<8x512xf32>
    %620 = vector.extract_strided_slice %619 {offsets = [0, 0], sizes = [8, 128], strides = [1, 1]} : vector<8x512xf32> to vector<8x128xf32>
    %621 = arith.negf %620 : vector<8x128xf32>
    %622 = math.exp %621 : vector<8x128xf32>
    %cst_307 = arith.constant 1.000000e+00 : f32
    %623 = vector.broadcast %cst_307 : f32 to vector<8x128xf32>
    %624 = arith.addf %623, %622 : vector<8x128xf32>
    %625 = arith.divf %623, %624 : vector<8x128xf32>
    %626 = vector.extract_strided_slice %619 {offsets = [0, 128], sizes = [8, 128], strides = [1, 1]} : vector<8x512xf32> to vector<8x128xf32>
    %627 = arith.negf %626 : vector<8x128xf32>
    %628 = math.exp %627 : vector<8x128xf32>
    %cst_308 = arith.constant 1.000000e+00 : f32
    %629 = vector.broadcast %cst_308 : f32 to vector<8x128xf32>
    %630 = arith.addf %629, %628 : vector<8x128xf32>
    %631 = arith.divf %629, %630 : vector<8x128xf32>
    %632 = vector.extract_strided_slice %619 {offsets = [0, 256], sizes = [8, 128], strides = [1, 1]} : vector<8x512xf32> to vector<8x128xf32>
    %633 = math.tanh %632 : vector<8x128xf32>
    %634 = vector.extract_strided_slice %619 {offsets = [0, 384], sizes = [8, 128], strides = [1, 1]} : vector<8x512xf32> to vector<8x128xf32>
    %635 = arith.negf %634 : vector<8x128xf32>
    %636 = math.exp %635 : vector<8x128xf32>
    %cst_309 = arith.constant 1.000000e+00 : f32
    %637 = vector.broadcast %cst_309 : f32 to vector<8x128xf32>
    %638 = arith.addf %637, %636 : vector<8x128xf32>
    %639 = arith.divf %637, %638 : vector<8x128xf32>
    %c0_310 = arith.constant 0 : index
    %c0_311 = arith.constant 0 : index
    %640 = vector.load %arg21[%c0_310, %c0_311] : memref<8x128xf32, #tpu.memory_space<vmem>>, vector<8x128xf32>
    %641 = arith.mulf %631, %640 : vector<8x128xf32>
    %642 = arith.mulf %625, %633 : vector<8x128xf32>
    %643 = arith.addf %641, %642 : vector<8x128xf32>
    %644 = math.tanh %643 : vector<8x128xf32>
    %645 = arith.mulf %639, %644 : vector<8x128xf32>
    %c0_312 = arith.constant 0 : index
    %c0_313 = arith.constant 0 : index
    %646 = vector.load %arg21[%c0_312, %c0_313] : memref<8x128xf32, #tpu.memory_space<vmem>>, vector<8x128xf32>
    tpu.vector_store %arg21[%c0_312, %c0_313], %643 {strides = array<i32>} : memref<8x128xf32, #tpu.memory_space<vmem>>, vector<8x128xf32>,
    %c0_314 = arith.constant 0 : index
    %c0_315 = arith.constant 0 : index
    %647 = vector.load %arg20[%c0_314, %c0_315] : memref<8x128xf32, #tpu.memory_space<vmem>>, vector<8x128xf32>
    tpu.vector_store %arg20[%c0_314, %c0_315], %645 {strides = array<i32>} : memref<8x128xf32, #tpu.memory_space<vmem>>, vector<8x128xf32>,
    %648 = arith.index_cast %613 : i32 to index
    %c0_316 = arith.constant 0 : index
    %649 = vector.load %arg17[%648, %c0_316] : memref<64x128xf32, #tpu.memory_space<vmem>>, vector<8x128xf32>
    tpu.vector_store %arg17[%648, %c0_316], %645 {strides = array<i32>} : memref<64x128xf32, #tpu.memory_space<vmem>>, vector<8x128xf32>,
    %c8_i32_317 = arith.constant 8 : i32
    %c0_318 = arith.constant 0 : index
    %c0_319 = arith.constant 0 : index
    %650 = vector.load %arg16[%c0_318, %c0_319] : memref<64x128xf32, #tpu.memory_space<vmem>>, vector<64x128xf32>
    %c0_320 = arith.constant 0 : index
    %c0_321 = arith.constant 0 : index
    %651 = vector.load %arg10[%c0_320, %c0_321] : memref<128x16xf32, #tpu.memory_space<vmem>>, vector<128x16xf32>
    %cst_322 = arith.constant dense<0.000000e+00> : vector<64x16xf32>
    %652 = tpu.matmul %650, %651, %cst_322 {dimension_numbers = #tpu.dot_dimension_numbers<[1], [0], [0], [1], [0, 0, 1, 1], [], []>} : vector<64x128xf32>, vector<128x16xf32>, vector<64x16xf32> -> vector<64x16xf32>
    %c0_323 = arith.constant 0 : index
    %c0_324 = arith.constant 0 : index
    %653 = vector.load %arg17[%c0_323, %c0_324] : memref<64x128xf32, #tpu.memory_space<vmem>>, vector<64x128xf32>
    %c0_325 = arith.constant 0 : index
    %c0_326 = arith.constant 0 : index
    %654 = vector.load %arg11[%c0_325, %c0_326] : memref<128x16xf32, #tpu.memory_space<vmem>>, vector<128x16xf32>
    %cst_327 = arith.constant dense<0.000000e+00> : vector<64x16xf32>
    %655 = tpu.matmul %653, %654, %cst_327 {dimension_numbers = #tpu.dot_dimension_numbers<[1], [0], [0], [1], [0, 0, 1, 1], [], []>} : vector<64x128xf32>, vector<128x16xf32>, vector<64x16xf32> -> vector<64x16xf32>
    %656 = arith.addf %652, %655 : vector<64x16xf32>
    %c0_328 = arith.constant 0 : index
    %c0_329 = arith.constant 0 : index
    %657 = vector.load %arg12[%c0_328, %c0_329] : memref<1x16xf32, #tpu.memory_space<vmem>>, vector<1x16xf32>
    %658 = vector.broadcast %657 : vector<1x16xf32> to vector<64x16xf32>
    %659 = arith.addf %656, %658 : vector<64x16xf32>
    %660 = vector.shape_cast %659 : vector<64x16xf32> to vector<8x8x16xf32>
    %c0_330 = arith.constant 0 : index
    %c0_331 = arith.constant 0 : index
    %c0_332 = arith.constant 0 : index
    %661 = vector.load %arg13[%c0_330, %c0_331, %c0_332] : memref<8x8x16xf32, #tpu.memory_space<vmem>>, vector<8x8x16xf32>
    tpu.vector_store %arg13[%c0_330, %c0_331, %c0_332], %660 {strides = array<i32>} : memref<8x8x16xf32, #tpu.memory_space<vmem>>, vector<8x8x16xf32>,
    return
  }
  func.func @transform_0(%arg0: i32) -> (i32, i32, i32) {
    %c0_i32 = arith.constant 0 : i32
    %c0_i32_0 = arith.constant 0 : i32
    %c0_i32_1 = arith.constant 0 : i32
    return %c0_i32, %arg0, %c0_i32_0 : i32, i32, i32
  }
  func.func @transform_1(%arg0: i32) -> (i32, i32) {
    %c0_i32 = arith.constant 0 : i32
    %c0_i32_0 = arith.constant 0 : i32
    %c0_i32_1 = arith.constant 0 : i32
    return %c0_i32, %c0_i32_0 : i32, i32
  }
  func.func @transform_2(%arg0: i32) -> (i32, i32) {
    %c0_i32 = arith.constant 0 : i32
    %c0_i32_0 = arith.constant 0 : i32
    %c0_i32_1 = arith.constant 0 : i32
    return %c0_i32, %c0_i32_0 : i32, i32
  }
  func.func @transform_3(%arg0: i32) -> (i32, i32) {
    %c0_i32 = arith.constant 0 : i32
    %c0_i32_0 = arith.constant 0 : i32
    %c0_i32_1 = arith.constant 0 : i32
    return %c0_i32, %c0_i32_0 : i32, i32
  }
  func.func @transform_4(%arg0: i32) -> (i32, i32) {
    %c0_i32 = arith.constant 0 : i32
    %c0_i32_0 = arith.constant 0 : i32
    %c0_i32_1 = arith.constant 0 : i32
    return %c0_i32, %c0_i32_0 : i32, i32
  }
  func.func @transform_5(%arg0: i32) -> (i32, i32) {
    %c0_i32 = arith.constant 0 : i32
    %c0_i32_0 = arith.constant 0 : i32
    %c0_i32_1 = arith.constant 0 : i32
    return %c0_i32, %c0_i32_0 : i32, i32
  }
  func.func @transform_6(%arg0: i32) -> (i32, i32) {
    %c0_i32 = arith.constant 0 : i32
    %c0_i32_0 = arith.constant 0 : i32
    %c0_i32_1 = arith.constant 0 : i32
    return %c0_i32, %c0_i32_0 : i32, i32
  }
  func.func @transform_7(%arg0: i32) -> (i32, i32) {
    %c0_i32 = arith.constant 0 : i32
    %c0_i32_0 = arith.constant 0 : i32
    %c0_i32_1 = arith.constant 0 : i32
    return %c0_i32, %c0_i32_0 : i32, i32
  }
  func.func @transform_8(%arg0: i32) -> (i32, i32) {
    %c0_i32 = arith.constant 0 : i32
    %c0_i32_0 = arith.constant 0 : i32
    %c0_i32_1 = arith.constant 0 : i32
    return %c0_i32, %c0_i32_0 : i32, i32
  }
  func.func @transform_9(%arg0: i32) -> (i32, i32) {
    %c0_i32 = arith.constant 0 : i32
    %c0_i32_0 = arith.constant 0 : i32
    %c0_i32_1 = arith.constant 0 : i32
    return %c0_i32, %c0_i32_0 : i32, i32
  }
  func.func @transform_10(%arg0: i32) -> (i32, i32) {
    %c0_i32 = arith.constant 0 : i32
    %c0_i32_0 = arith.constant 0 : i32
    %c0_i32_1 = arith.constant 0 : i32
    return %c0_i32, %c0_i32_0 : i32, i32
  }
  func.func @transform_11(%arg0: i32) -> (i32, i32) {
    %c0_i32 = arith.constant 0 : i32
    %c0_i32_0 = arith.constant 0 : i32
    %c0_i32_1 = arith.constant 0 : i32
    return %c0_i32, %c0_i32_0 : i32, i32
  }
  func.func @transform_12(%arg0: i32) -> (i32, i32, i32) {
    %c0_i32 = arith.constant 0 : i32
    %c0_i32_0 = arith.constant 0 : i32
    %c0_i32_1 = arith.constant 0 : i32
    return %c0_i32, %arg0, %c0_i32_0 : i32, i32, i32
  }
}

</mosaic_0001>

<bundles_post_ra>
// kernel: tpu_custom_call.1
= control target key start
LH: loop header
LB: loop body
LE: loop exit
PB: predicated region body
PF: predicated region fallthrough
CT: control target
= control target key end

     0   :  { %17 = vsyncpa [#allocation11], 0  ;;  %s8566_s0 = inlined_call_operand.vmem [shape: f32[8,8,16], index: 0, kind: input, shape index: {}]   ;;  %s8567_s1 = inlined_call_operand.vmem [shape: f32[1,16], index: 1, kind: input, shape index: {}]   ;;  %s8568_s2 = inlined_call_operand.vmem [shape: f32[1,16], index: 2, kind: input, shape index: {}]   ;;  %s8569_s3 = inlined_call_operand.vmem [shape: f32[16,512], index: 3, kind: input, shape index: {}]   ;;  %s8570_s4 = inlined_call_operand.hbm [shape: f32[128,512], index: 4, kind: input, shape index: {}]   ;;  %s8571_s5 = inlined_call_operand.vmem [shape: f32[1,512], index: 5, kind: input, shape index: {}]   ;;  %s8572_s6 = inlined_call_operand.vmem [shape: f32[16,512], index: 6, kind: input, shape index: {}]   ;;  %s8573_s7 = inlined_call_operand.hbm [shape: f32[128,512], index: 7, kind: input, shape index: {}]   ;;  %s8574_s8 = inlined_call_operand.vmem [shape: f32[1,512], index: 8, kind: input, shape index: {}]   ;;  %s8575_s9 = inlined_call_operand.vmem [shape: f32[128,16], index: 9, kind: input, shape index: {}]   ;;  %s8576_s10 = inlined_call_operand.vmem [shape: f32[128,16], index: 10, kind: input, shape index: {}]   ;;  %s8577_s11 = inlined_call_operand.vmem [shape: f32[1,16], index: 11, kind: input, shape index: {}]   ;;  %s8578_s12 = inlined_call_operand.hbm [shape: f32[8,8,16], index: 12, kind: output, shape index: {}]  }
   0x1   :  { %18 = vsyncpa [#allocation14], 0 }
   0x2   :  { %19 = vsyncpa [#allocation12], 0  ;;  %s6761_s21 = smov [#allocation10]   ;;  %s6689_s25 = scalar_lea.hbm %s8570_s4, 8192 }
   0x3   :  { %s33_s22 = sshll.u32 %s6761_s21, 4  ;;  %p6690_p0 = scmp.ne.s32.totalorder %s8570_s4, %s6689_s25  ;;  %s34_s22 = int_to_ptr.vmem [resolvable:$true] %s33_s22 }
   0x4   :  { %p6693_p1 = scmp.lt.u32.totalorder %s6689_s25, %s8570_s4 }
   0x6   :  { %p6695_p2 = pnand %p6693_p1, %p6690_p0 }
   0x8   :  { %6698 = shalt.err (!%p6695_p2)
}
   0x9   :  { %s6699_s30 = scalar_lea.vmem %s34_s22, 8192  ;;  %p6704_p4 = scmp.lt.s32.totalorder %s34_s22, %s34_s22 }
   0xa   :  { %p6700_p3 = scmp.ne.s32.totalorder %s34_s22, %s6699_s30  ;;  %p6705_p5 = scmp.lt.s32.totalorder %s6699_s30, %s6699_s30 }
   0xc   :  { %p6706_p6 = por %p6705_p5, %p6704_p4 }
   0xe   :  { %p6707_p7 = pnand %p6706_p6, %p6700_p3 }
  0x10   :  { %6710 = shalt.err (!%p6707_p7)
}
  0x11   :  { %s6762_s13 = smov 512   ;;  %s6763_s14 = smov 32  }
  0x12   :  { %39 = dma.hbm_to_vmem [thread:$0]  %s8570_s4, 8192, %s34_s22, [#allocation11], %s6762_s13, %s6762_s13, %s6763_s14  }
  0x13   :  { %s6764_s17 = smov [#allocation13]   ;;  %s6711_s21 = scalar_lea.hbm %s8573_s7, 8192 }
  0x14   :  { %s49_s18 = sshll.u32 %s6764_s17, 4  ;;  %p6712_p8 = scmp.ne.s32.totalorder %s8573_s7, %s6711_s21  ;;  %s50_s18 = int_to_ptr.vmem [resolvable:$true] %s49_s18 }
  0x15   :  { %p6715_p9 = scmp.lt.u32.totalorder %s6711_s21, %s8573_s7 }
  0x17   :  { %p6717_p10 = pnand %p6715_p9, %p6712_p8 }
  0x19   :  { %6720 = shalt.err (!%p6717_p10)
}
  0x1a   :  { %s6721_s27 = scalar_lea.vmem %s50_s18, 8192  ;;  %p6726_p12 = scmp.lt.s32.totalorder %s50_s18, %s50_s18 }
  0x1b   :  { %p6722_p11 = scmp.ne.s32.totalorder %s50_s18, %s6721_s27  ;;  %p6727_p13 = scmp.lt.s32.totalorder %s6721_s27, %s6721_s27 }
  0x1d   :  { %p6728_p0 = por %p6727_p13, %p6726_p12 }
  0x1f   :  { %p6729_p1 = pnand %p6728_p0, %p6722_p11 }
  0x21   :  { %6732 = shalt.err (!%p6729_p1)
}
  0x22   :  { %55 = dma.hbm_to_vmem [thread:$0]  %s8573_s7, 8192, %s50_s18, [#allocation14], %s6762_s13, %s6762_s13, %s6763_s14  }
  0x23   :  { %6755 = dma.done.wait [#allocation11], 8192  }
  0x24   :  { %6756 = vsyncadd [#allocation11], 4294959104 }
  0x25   :  { %6757 = dma.done.wait [#allocation14], 8192  }
  0x26   :  { %6758 = vsyncadd [#allocation14], 4294959104  ;;  %vm78_vm0 = vcmask 130048   ;;  %v70_v0 = vld [vmem:[%s8566_s0] sm:$0xff]  ;;  %v71_v1 = vld [vmem:[%s8566_s0 + $0x8] sm:$0xff] }
  0x27   :  { %v72_v2 = vld [vmem:[%s8566_s0 + $0x10] sm:$0xff]  ;;  %v73_v3 = vld [vmem:[%s8566_s0 + $0x18] sm:$0xff]  ;;  %v79_v4 = vsel %vm78_vm0, %v70_v0, 0.0  ;;  %v80_v5 = vsel %vm78_vm0, %v71_v1, 0.0  ;;  %v74_v7 = vld [vmem:[%s8566_s0 + $0x20] sm:$0xff] }
  0x28   :  { %v82_v6 = vsel %vm78_vm0, %v72_v2, 0.0  ;;  %v81_v8 = vadd.f32 %v80_v5, %v79_v4  ;;  %v84_v9 = vsel %vm78_vm0, %v73_v3, 0.0  ;;  %v75_v10 = vld [vmem:[%s8566_s0 + $0x28] sm:$0xff]  ;;  %v86_v12 = vsel %vm78_vm0, %v74_v7, 0.0  ;;  %v76_v13 = vld [vmem:[%s8566_s0 + $0x30] sm:$0xff]  ;;  %v77_v16 = vld [vmem:[%s8566_s0 + $0x38] sm:$0xff] }
  0x29   :  { %v88_v15 = vsel %vm78_vm0, %v75_v10, 0.0  ;;  %v90_v18 = vsel %vm78_vm0, %v76_v13, 0.0  ;;  %v92_v20 = vsel %vm78_vm0, %v77_v16, 0.0  ;;  %v174_v58 = vld [vmem:[%s8569_s3 + $0x8] sm:$0xff]  ;;  %v173_v63 = vld [vmem:[%s8569_s3] sm:$0xff] }
  0x2a   :  { %v83_v11 = vadd.f32 %v82_v6, %v81_v8  ;;  %v178_v59 = vld [vmem:[%s8569_s3 + $0x28] sm:$0xff]  ;;  %v485_v4 = vld [vmem:[%s8572_s6] sm:$0xff]  ;;  %v176_v6 = vld [vmem:[%s8569_s3 + $0x18] sm:$0xff] }
  0x2b   :  { %v486_v60 = vld [vmem:[%s8572_s6 + $0x8] sm:$0xff]  ;;  %v5183_v61 = vpack.c.bf16 %v178_v59, %v174_v58  ;;  %v489_v5 = vld [vmem:[%s8572_s6 + $0x20] sm:$0xff]  ;;  %v180_v8 = vld [vmem:[%s8569_s3 + $0x38] sm:$0xff] }
  0x2c   :  { %v85_v14 = vadd.f32 %v84_v9, %v83_v11  ;;  %v490_v62 = vld [vmem:[%s8572_s6 + $0x28] sm:$0xff]  ;;  %v5187_v11 = vpack.c.bf16 %v180_v8, %v176_v6  ;;  %v810_v59 = vld [vmem:[#allocation10 + $0xe0] sm:$0xff] }
  0x2d   :  { %5184 = vmatprep.subr.bf16.mxu1 %v5183_v61  ;;  %v783_v9 = vld [vmem:[#allocation10 + $0x8] sm:$0xff] }
  0x2e   :  { %v87_v17 = vadd.f32 %v86_v12, %v85_v14  ;;  %v819_v61 = vld [vmem:[#allocation10 + $0x128] sm:$0xff] }
  0x2f   :  { %v827_v6 = vld [vmem:[#allocation10 + $0x168] sm:$0xff] }
  0x30   :  { %v89_v19 = vadd.f32 %v88_v15, %v87_v17  ;;  %v6972_v17 = vld [vmem:[%s8567_s1] ss:$0 sm:$0xff] }
  0x32   :  { %v91_v21 = vadd.f32 %v90_v18, %v89_v19  ;;  %v782_v18 = vld [vmem:[#allocation10] sm:$0xff] }
  0x34   :  { %v93_v22 = vadd.f32 %v92_v20, %v91_v21  ;;  %v175_v20 = vld [vmem:[%s8569_s3 + $0x10] sm:$0xff] }
  0x35   :  { %v179_v21 = vld [vmem:[%s8569_s3 + $0x30] sm:$0xff] }
  0x36   :  { %v94_v23 = vsel %vm78_vm0, %v93_v22, 0.0  ;;  %v786_v22 = vld [vmem:[#allocation10 + $0x20] sm:$0xff] }
  0x37   :  { %95 = vadd.xlane.f32.xlu0 %v94_v23 }
  0xc4   :  { %v96_v24 = vpop.xlane.xlu0 %95 }
  0xc5   :  { %v97_v25 = vmul.f32 0.0078125, %v96_v24  ;;  %v6987_v24 = vld [vmem:[%s8568_s2] ss:$0 sm:$0xff] }
  0xc7   :  { %v6891_v26 = vsub.f32 %v70_v0, %v97_v25  ;;  %v6893_v27 = vsub.f32 %v71_v1, %v97_v25  ;;  %v6895_v28 = vsub.f32 %v72_v2, %v97_v25  ;;  %v6897_v29 = vsub.f32 %v73_v3, %v97_v25  ;;  %v177_v0 = vld [vmem:[%s8569_s3 + $0x20] sm:$0xff] }
  0xc8   :  { %v6899_v30 = vsub.f32 %v74_v7, %v97_v25  ;;  %v6907_v34 = vsub.f32 %v75_v10, %v97_v25  ;;  %v6913_v39 = vsub.f32 %v76_v13, %v97_v25  ;;  %v6918_v43 = vsub.f32 %v77_v16, %v97_v25  ;;  %v787_v10 = vld [vmem:[#allocation10 + $0x28] sm:$0xff] }
  0xc9   :  { %v106_v31 = vmul.f32 %v6891_v26, %v6891_v26  ;;  %v107_v32 = vmul.f32 %v6893_v27, %v6893_v27  ;;  %v108_v33 = vmul.f32 %v6895_v28, %v6895_v28  ;;  %v109_v35 = vmul.f32 %v6897_v29, %v6897_v29  ;;  %v791_v25 = vld [vmem:[#allocation10 + $0x48] sm:$0xff] }
  0xca   :  { %v110_v40 = vmul.f32 %v6899_v30, %v6899_v30  ;;  %v111_v44 = vmul.f32 %v6907_v34, %v6907_v34  ;;  %v112_v47 = vmul.f32 %v6913_v39, %v6913_v39  ;;  %v113_v50 = vmul.f32 %v6918_v43, %v6918_v43 }
  0xcb   :  { %v114_v36 = vsel %vm78_vm0, %v106_v31, 0.0  ;;  %v115_v37 = vsel %vm78_vm0, %v107_v32, 0.0  ;;  %v117_v41 = vsel %vm78_vm0, %v108_v33, 0.0  ;;  %v119_v45 = vsel %vm78_vm0, %v109_v35, 0.0  ;;  %v795_v31 = vld [vmem:[#allocation10 + $0x68] sm:$0xff]  ;;  %v488_v32 = vld [vmem:[%s8572_s6 + $0x18] sm:$0xff] }
  0xcc   :  { %v116_v38 = vadd.f32 %v115_v37, %v114_v36  ;;  %v121_v48 = vsel %vm78_vm0, %v110_v40, 0.0  ;;  %v123_v51 = vsel %vm78_vm0, %v111_v44, 0.0  ;;  %v125_v53 = vsel %vm78_vm0, %v112_v47, 0.0  ;;  %v492_v33 = vld [vmem:[%s8572_s6 + $0x38] sm:$0xff]  ;;  %v794_v40 = vld [vmem:[#allocation10 + $0x60] sm:$0xff] }
  0xcd   :  { %v127_v55 = vsel %vm78_vm0, %v113_v50, 0.0  ;;  %v8579_v1 = vmov 0.0   ;;  %v5191_v2 = vpack.c.bf16 %v490_v62, %v486_v60  ;;  %v5185_v3 = vpack.c.bf16 %v177_v0, %v173_v63  ;;  %v815_v60 = vld [vmem:[#allocation10 + $0x108] sm:$0xff] }
  0xce   :  { %v118_v42 = vadd.f32 %v117_v41, %v116_v38  ;;  %291 = vmatprep.mubr.f32.mxu1 %v8579_v1  ;;  %579 = vmatprep.mubr.f32.mxu0 %v8579_v1  ;;  %v5193_v7 = vpack.c.bf16 %v489_v5, %v485_v4  ;;  %v6964_v12 = vpack.c.bf16 %v787_v10, %v783_v9  ;;  %v799_v41 = vld [vmem:[#allocation10 + $0x88] sm:$0xff]  ;;  %v818_v4 = vld [vmem:[#allocation10 + $0x120] sm:$0xff] }
  0xcf   :  { %5192 = vmatprep.subr.bf16.mxu0 %v5191_v2  ;;  %5186 = vmatpush1.bf16.msra.mxu1 %v5185_v3  ;;  %v5189_v35 = vpack.c.bf16 %v179_v21, %v175_v20  ;;  %v6996_v36 = vpack.c.bf16 %v786_v22, %v782_v18  ;;  %v7050_v0 = vpack.c.bf16 %v819_v61, %v815_v60  ;;  %v814_v2 = vld [vmem:[#allocation10 + $0x100] sm:$0xff]  ;;  %v823_v5 = vld [vmem:[#allocation10 + $0x148] sm:$0xff] }
  0xd0   :  { %v120_v46 = vadd.f32 %v119_v45, %v118_v42  ;;  %5194 = vmatpush1.bf16.msra.mxu0 %v5193_v7  ;;  %5188 = vmatprep.subr.bf16.mxu1 %v5187_v11  ;;  %v803_v42 = vld [vmem:[#allocation10 + $0xa8] sm:$0xff]  ;;  %v7004_v45 = vpack.c.bf16 %v795_v31, %v791_v25  ;;  %v7066_v8 = vpack.c.bf16 %v818_v4, %v814_v2  ;;  %v822_v10 = vld [vmem:[#allocation10 + $0x140] sm:$0xff] }
  0xd1   :  { %5200 = vmatprep.subr.bf16.mxu0 %v6964_v12  ;;  %v7068_v9 = vpack.c.bf16 %v827_v6, %v823_v5  ;;  %v830_v22 = vld [vmem:[#allocation10 + $0x180] sm:$0xff]  ;;  %v843_v31 = vld [vmem:[#allocation10 + $0x1e8] sm:$0xff] }
  0xd2   :  { %v122_v49 = vadd.f32 %v121_v48, %v120_v46  ;;  %v5195_v46 = vpack.c.bf16 %v492_v33, %v488_v32  ;;  %v7013_v48 = vpack.c.bf16 %v803_v42, %v799_v41  ;;  %v1025_v42 = vld [vmem:[#allocation13] sm:$0xff]  ;;  %v1042_v61 = vld [vmem:[#allocation13 + $0x88] sm:$0xff] }
  0xd3   :  { %v1037_v60 = vld [vmem:[#allocation13 + $0x60] sm:$0xff] }
  0xd4   :  { %v124_v52 = vadd.f32 %v123_v51, %v122_v49  ;;  %v798_v49 = vld [vmem:[#allocation10 + $0x80] sm:$0xff] }
  0xd5   :  { %v802_v51 = vld [vmem:[#allocation10 + $0xa0] sm:$0xff] }
  0xd6   :  { %v126_v54 = vadd.f32 %v125_v53, %v124_v52  ;;  %v807_v52 = vld [vmem:[#allocation10 + $0xc8] sm:$0xff]  ;;  %v1041_v5 = vld [vmem:[#allocation13 + $0x80] sm:$0xff] }
  0xd7   :  { %v811_v53 = vld [vmem:[#allocation10 + $0xe8] sm:$0xff]  ;;  %v1045_v6 = vld [vmem:[#allocation13 + $0xa0] sm:$0xff] }
  0xd8   :  { %v128_v56 = vadd.f32 %v127_v55, %v126_v54  ;;  %v7030_v55 = vpack.c.bf16 %v802_v51, %v798_v49  ;;  %v491_v49 = vld [vmem:[%s8572_s6 + $0x30] sm:$0xff]  ;;  %v1034_v51 = vld [vmem:[#allocation13 + $0x48] sm:$0xff] }
  0xda   :  { %v129_v57 = vsel %vm78_vm0, %v128_v56, 0.0  ;;  %v7032_v56 = vpack.c.bf16 %v811_v53, %v807_v52  ;;  %v1038_v52 = vld [vmem:[#allocation13 + $0x68] sm:$0xff]  ;;  %v789_v53 = vld [vmem:[#allocation10 + $0x38] sm:$0xff] }
  0xdb   :  { %130 = vadd.xlane.f32.xlu0 %v129_v57  ;;  %v806_v57 = vld [vmem:[#allocation10 + $0xc0] sm:$0xff] }
  0xdc   :  { %v7048_v63 = vpack.c.bf16 %v810_v59, %v806_v57  ;;  %v1033_v59 = vld [vmem:[#allocation13 + $0x40] sm:$0xff] }
 0x168   :  { %v131_v13 = vpop.xlane.xlu0 %130 }
 0x169   :  { %v132_v14 = vmul.f32 0.0078125, %v131_v13  ;;  %v826_v13 = vld [vmem:[#allocation10 + $0x160] sm:$0xff] }
 0x16b   :  { %v133_v15 = vadd.f32 1e-05, %v132_v14  ;;  %v831_v14 = vld [vmem:[#allocation10 + $0x188] sm:$0xff] }
 0x16d   :  { %6431 = vrsqrt.f32 %v133_v15  ;;  %v835_v15 = vld [vmem:[#allocation10 + $0x1a8] sm:$0xff] }
 0x16e   :  { %v7086_v20 = vpack.c.bf16 %v835_v15, %v831_v14  ;;  %v1049_v14 = vld [vmem:[#allocation13 + $0xc0] sm:$0xff] }
 0x16f   :  { %v1053_v15 = vld [vmem:[#allocation13 + $0xe0] sm:$0xff] }
 0x177   :  { %v6967_v16 = vpop.eup %6431 }
 0x178   :  { %v135_v19 = vmul.f32 %v6967_v16, %v6891_v26  ;;  %v136_v23 = vmul.f32 %v6967_v16, %v6893_v27  ;;  %v790_v27 = vld [vmem:[#allocation10 + $0x40] sm:$0xff]  ;;  %v137_v44 = vmul.f32 %v6967_v16, %v6895_v28  ;;  %v138_v54 = vmul.f32 %v6967_v16, %v6897_v29 }
 0x179   :  { %v7011_v47 = vpack.c.bf16 %v794_v40, %v790_v27  ;;  %v139_v62 = vmul.f32 %v6967_v16, %v6899_v30  ;;  %v140_v7 = vmul.f32 %v6967_v16, %v6907_v34  ;;  %v141_v18 = vmul.f32 %v6967_v16, %v6913_v39  ;;  %v842_v27 = vld [vmem:[#allocation10 + $0x1e0] sm:$0xff]  ;;  %v1030_v40 = vld [vmem:[#allocation13 + $0x28] sm:$0xff] }
 0x17a   :  { %v150_v26 = vmul.f32 %v6972_v17, %v135_v19  ;;  %v151_v38 = vmul.f32 %v6972_v17, %v136_v23  ;;  %v152_v50 = vmul.f32 %v6972_v17, %v137_v44  ;;  %v153_v58 = vmul.f32 %v6972_v17, %v138_v54  ;;  %v834_v23 = vld [vmem:[#allocation10 + $0x1a0] sm:$0xff] }
 0x17b   :  { %v154_v3 = vmul.f32 %v6972_v17, %v139_v62  ;;  %v155_v11 = vmul.f32 %v6972_v17, %v140_v7  ;;  %v7084_v19 = vpack.c.bf16 %v826_v13, %v822_v10  ;;  %v156_v21 = vmul.f32 %v6972_v17, %v141_v18  ;;  %v1046_v62 = vld [vmem:[#allocation13 + $0xa8] sm:$0xff] }
 0x17c   :  { %v6999_v37 = vadd.f32 %v6987_v24, %v150_v26  ;;  %v7018_v28 = vadd.f32 %v6987_v24, %v151_v38  ;;  %v7037_v29 = vadd.f32 %v6987_v24, %v152_v50  ;;  %v7055_v30 = vadd.f32 %v6987_v24, %v153_v58  ;;  %v839_v26 = vld [vmem:[#allocation10 + $0x1c8] sm:$0xff]  ;;  %v1029_v50 = vld [vmem:[#allocation13 + $0x20] sm:$0xff] }
 0x17d   :  { %v7073_v34 = vadd.f32 %v6987_v24, %v154_v3  ;;  %v7091_v39 = vadd.f32 %v6987_v24, %v155_v11  ;;  %v142_v25 = vmul.f32 %v6967_v16, %v6918_v43  ;;  %v7102_v32 = vpack.c.bf16 %v834_v23, %v830_v22  ;;  %v1026_v38 = vld [vmem:[#allocation13 + $0x8] sm:$0xff] }
 0x17e   :  { %4966 = vmatmul.mubr.msk.f32.vlgmr.msra.gmra.mrb[0].mxu1 %vm78_vm0, %v6999_v37  ;;  %4982 = vmatmul.mubr.msk.f32.vlgmr.msra.gmra.mrb[0].mxu0 %vm78_vm0, %v6999_v37  ;;  %v7107_v43 = vadd.f32 %v6987_v24, %v156_v21  ;;  %v7109_v16 = vpack.c.bf16 %v843_v31, %v839_v26  ;;  %v7125_v44 = vpack.c.bf16 %v1030_v40, %v1026_v38  ;;  %v1050_v7 = vld [vmem:[#allocation13 + $0xc8] sm:$0xff]  ;;  %v1061_v26 = vld [vmem:[#allocation13 + $0x120] sm:$0xff] }
 0x17f   :  { %5190 = vmatpush1.bf16.msra.mxu1 %v5189_v35  ;;  %5202 = vmatpush1.bf16.msra.mxu0 %v6996_v36  ;;  %v157_v33 = vmul.f32 %v6972_v17, %v142_v25  ;;  %v838_v35 = vld [vmem:[#allocation10 + $0x1c0] sm:$0xff]  ;;  %v7139_v57 = vpack.c.bf16 %v1029_v50, %v1025_v42  ;;  %v7143_v58 = vpack.c.bf16 %v1038_v52, %v1034_v51  ;;  %v1054_v10 = vld [vmem:[#allocation13 + $0xe8] sm:$0xff] }
 0x180   :  { %297 = vmatprep.mubr.f32.mxu1 %v8579_v1  ;;  %585 = vmatprep.mubr.f32.mxu0 %v8579_v1  ;;  %v7118_v41 = vpack.c.bf16 %v842_v27, %v838_v35  ;;  %v7151_v3 = vpack.c.bf16 %v1037_v60, %v1033_v59  ;;  %v7155_v4 = vpack.c.bf16 %v1046_v62, %v1042_v61  ;;  %v1058_v18 = vld [vmem:[#allocation13 + $0x108] sm:$0xff]  ;;  %v1057_v25 = vld [vmem:[#allocation13 + $0x100] sm:$0xff] }
 0x181   :  { %5204 = vmatprep.subr.bf16.mxu0 %v7004_v45  ;;  %5196 = vmatprep.subr.bf16.mxu1 %v5195_v46  ;;  %v7123_v17 = vadd.f32 %v6987_v24, %v157_v33  ;;  %v487_v46 = vld [vmem:[%s8572_s6 + $0x10] sm:$0xff]  ;;  %v785_v24 = vld [vmem:[#allocation10 + $0x18] sm:$0xff]  ;;  %v7163_v11 = vpack.c.bf16 %v1045_v6, %v1041_v5  ;;  %v7166_v13 = vpack.c.bf16 %v1054_v10, %v1050_v7  ;;  %v1062_v21 = vld [vmem:[#allocation13 + $0x128] sm:$0xff] }
 0x182   :  { %4967 = vmatmul.mubr.msk.f32.gmra.mrb[2].mxu1 %vm78_vm0, %v7018_v28  ;;  %4983 = vmatmul.mubr.msk.f32.gmra.mrb[2].mxu0 %vm78_vm0, %v7018_v28  ;;  %v5197_v54 = vpack.c.bf16 %v491_v49, %v487_v46  ;;  %v7145_v2 = vpack.c.bf16 %v789_v53, %v785_v24  ;;  %v7172_v22 = vpack.c.bf16 %v1053_v15, %v1049_v14  ;;  %v1066_v31 = vld [vmem:[#allocation13 + $0x148] sm:$0xff]  ;;  %v1065_v38 = vld [vmem:[#allocation13 + $0x140] sm:$0xff]  ;;  %v784_v5 = vld [vmem:[#allocation10 + $0x10] sm:$0xff] }
 0x183   :  { %5206 = vmatpush1.bf16.msra.mxu0 %v7011_v47  ;;  %303 = vmatprep.mubr.f32.mxu1 %v8579_v1  ;;  %v7175_v23 = vpack.c.bf16 %v1062_v21, %v1058_v18  ;;  %v1070_v33 = vld [vmem:[#allocation13 + $0x168] sm:$0xff]  ;;  %v7181_v35 = vpack.c.bf16 %v1061_v26, %v1057_v25  ;;  %v1069_v40 = vld [vmem:[#allocation13 + $0x160] sm:$0xff]  ;;  %v788_v6 = vld [vmem:[#allocation10 + $0x30] sm:$0xff] }
 0x184   :  { %591 = vmatprep.mubr.f32.mxu0 %v8579_v1  ;;  %5208 = vmatprep.subr.bf16.mxu0 %v7013_v48  ;;  %v7184_v27 = vpack.c.bf16 %v1070_v33, %v1066_v31  ;;  %v1074_v42 = vld [vmem:[#allocation13 + $0x188] sm:$0xff]  ;;  %v7190_v49 = vpack.c.bf16 %v1069_v40, %v1065_v38  ;;  %v1073_v51 = vld [vmem:[#allocation13 + $0x180] sm:$0xff]  ;;  %v793_v7 = vld [vmem:[#allocation10 + $0x58] sm:$0xff]  ;;  %v7215_v14 = vpack.c.bf16 %v788_v6, %v784_v5 }
 0x185   :  { %v1078_v46 = vld [vmem:[#allocation13 + $0x1a8] sm:$0xff]  ;;  %v1077_v52 = vld [vmem:[#allocation13 + $0x1a0] sm:$0xff]  ;;  %v797_v10 = vld [vmem:[#allocation10 + $0x78] sm:$0xff] }
 0x186   :  { %4968 = vmatmul.mubr.msk.f32.gmra.mrb[4].mxu1 %vm78_vm0, %v7037_v29  ;;  %4984 = vmatmul.mubr.msk.f32.gmra.mrb[4].mxu0 %vm78_vm0, %v7037_v29  ;;  %v7193_v50 = vpack.c.bf16 %v1078_v46, %v1074_v42  ;;  %v1082_v24 = vld [vmem:[#allocation13 + $0x1c8] sm:$0xff]  ;;  %v1081_v60 = vld [vmem:[#allocation13 + $0x1c0] sm:$0xff]  ;;  %v7217_v15 = vpack.c.bf16 %v797_v10, %v793_v7  ;;  %v792_v18 = vld [vmem:[#allocation10 + $0x50] sm:$0xff] }
 0x187   :  { %5210 = vmatpush1.bf16.msra.mxu0 %v7030_v55  ;;  %309 = vmatprep.mubr.f32.mxu1 %v8579_v1  ;;  %v1086_v53 = vld [vmem:[#allocation13 + $0x1e8] sm:$0xff]  ;;  %v1085_v61 = vld [vmem:[#allocation13 + $0x1e0] sm:$0xff]  ;;  %v796_v21 = vld [vmem:[#allocation10 + $0x70] sm:$0xff] }
 0x188   :  { %597 = vmatprep.mubr.f32.mxu0 %v8579_v1  ;;  %5212 = vmatprep.subr.bf16.mxu0 %v7032_v56  ;;  %v7202_v59 = vpack.c.bf16 %v1086_v53, %v1082_v24  ;;  %v7208_v62 = vpack.c.bf16 %v1085_v61, %v1081_v60  ;;  %v801_v25 = vld [vmem:[#allocation10 + $0x98] sm:$0xff]  ;;  %v7225_v31 = vpack.c.bf16 %v796_v21, %v792_v18  ;;  %v800_v38 = vld [vmem:[#allocation10 + $0x90] sm:$0xff] }
 0x189   :  { %v805_v26 = vld [vmem:[#allocation10 + $0xb8] sm:$0xff]  ;;  %v804_v40 = vld [vmem:[#allocation10 + $0xb0] sm:$0xff] }
 0x18a   :  { %4969 = vmatmul.mubr.msk.f32.gmra.mrb[6].mxu1 %vm78_vm0, %v7055_v30  ;;  %4985 = vmatmul.mubr.msk.f32.gmra.mrb[6].mxu0 %vm78_vm0, %v7055_v30  ;;  %v7228_v33 = vpack.c.bf16 %v805_v26, %v801_v25  ;;  %v813_v42 = vld [vmem:[#allocation10 + $0xf8] sm:$0xff]  ;;  %v816_v53 = vld [vmem:[#allocation10 + $0x110] sm:$0xff] }
 0x18b   :  { %5214 = vmatpush1.bf16.msra.mxu0 %v7048_v63  ;;  %315 = vmatprep.mubr.f32.mxu1 %v8579_v1  ;;  %v820_v60 = vld [vmem:[#allocation10 + $0x130] sm:$0xff]  ;;  %v829_v61 = vld [vmem:[#allocation10 + $0x178] sm:$0xff] }
 0x18c   :  { %603 = vmatprep.mubr.f32.mxu0 %v8579_v1  ;;  %5216 = vmatprep.subr.bf16.mxu0 %v7050_v0  ;;  %v824_v5 = vld [vmem:[#allocation10 + $0x150] sm:$0xff]  ;;  %v837_v7 = vld [vmem:[#allocation10 + $0x1b8] sm:$0xff] }
 0x18d   :  { %v828_v6 = vld [vmem:[#allocation10 + $0x170] sm:$0xff]  ;;  %v845_v21 = vld [vmem:[#allocation10 + $0x1f8] sm:$0xff] }
 0x18e   :  { %4970 = vmatmul.mubr.msk.f32.gmra.mrb[8].mxu1 %vm78_vm0, %v7073_v34  ;;  %4986 = vmatmul.mubr.msk.f32.gmra.mrb[8].mxu0 %vm78_vm0, %v7073_v34  ;;  %v832_v10 = vld [vmem:[#allocation10 + $0x190] sm:$0xff] }
 0x18f   :  { %5218 = vmatpush1.bf16.msra.mxu0 %v7066_v8  ;;  %321 = vmatprep.mubr.f32.mxu1 %v8579_v1  ;;  %v836_v18 = vld [vmem:[#allocation10 + $0x1b0] sm:$0xff] }
 0x190   :  { %609 = vmatprep.mubr.f32.mxu0 %v8579_v1  ;;  %5220 = vmatprep.subr.bf16.mxu0 %v7068_v9  ;;  %v840_v25 = vld [vmem:[#allocation10 + $0x1d0] sm:$0xff] }
 0x191   :  { %v844_v26 = vld [vmem:[#allocation10 + $0x1f0] sm:$0xff] }
 0x192   :  { %4971 = vmatmul.mubr.msk.f32.gmra.mrb[10].mxu1 %vm78_vm0, %v7091_v39  ;;  %4987 = vmatmul.mubr.msk.f32.gmra.mrb[10].mxu0 %vm78_vm0, %v7091_v39 }
 0x193   :  { %5222 = vmatpush1.bf16.msra.mxu0 %v7084_v19  ;;  %327 = vmatprep.mubr.f32.mxu1 %v8579_v1 }
 0x194   :  { %615 = vmatprep.mubr.f32.mxu0 %v8579_v1  ;;  %5224 = vmatprep.subr.bf16.mxu0 %v7086_v20 }
 0x196   :  { %4972 = vmatmul.mubr.msk.f32.gmra.mrb[12].mxu1 %vm78_vm0, %v7107_v43  ;;  %4988 = vmatmul.mubr.msk.f32.gmra.mrb[12].mxu0 %vm78_vm0, %v7107_v43 }
 0x197   :  { %5226 = vmatpush1.bf16.msra.mxu0 %v7102_v32  ;;  %333 = vmatprep.mubr.f32.mxu1 %v8579_v1 }
 0x198   :  { %621 = vmatprep.mubr.f32.mxu0 %v8579_v1  ;;  %5228 = vmatprep.subr.bf16.mxu0 %v7109_v16 }
 0x19a   :  { %4973 = vmatmul.mubr.msk.f32.gmra.mrb[14].mxu1 %vm78_vm0, %v7123_v17  ;;  %4989 = vmatmul.mubr.msk.f32.gmra.mrb[14].mxu0 %vm78_vm0, %v7123_v17 }
 0x19b   :  { %5230 = vmatpush1.bf16.msra.mxu0 %v7118_v41  ;;  %404 = vmatprep.mubr.f32.mxu1 %v8579_v1 }
 0x19c   :  { %910 = vmatprep.mubr.f32.mxu0 %v8579_v1  ;;  %5264 = vmatprep.subr.bf16.mxu0 %v7125_v44 }
 0x19e   :  { %4974 = vmatmul.mubr.msk.f32.vlgmr.msra.gmra.mrb[16].mxu1 %vm78_vm0, %v6999_v37  ;;  %911 = vmatmul.mubr.f32.vlgmr.msra.gmra.mrb[16].mxu0 %v8579_v1 }
 0x19f   :  { %5198 = vmatpush1.bf16.msra.mxu1 %v5197_v54  ;;  %5266 = vmatpush1.bf16.msra.mxu0 %v7139_v57  ;;  %v7199_v54 = vpack.c.bf16 %v1077_v52, %v1073_v51  ;;  %v812_v51 = vld [vmem:[#allocation10 + $0xf0] sm:$0xff]  ;;  %v821_v52 = vld [vmem:[#allocation10 + $0x138] sm:$0xff] }
 0x1a0   :  { %410 = vmatprep.mubr.f32.mxu1 %v8579_v1  ;;  %5268 = vmatprep.subr.bf16.mxu0 %v7143_v58 }
 0x1a1   :  { %1153 = vmatprep.mubr.f32.mxu0 %v8579_v1  ;;  %5232 = vmatprep.subr.bf16.mxu1 %v7145_v2 }
 0x1a2   :  { %4975 = vmatmul.mubr.msk.f32.gmra.mrb[18].mxu1 %vm78_vm0, %v7018_v28 }
 0x1a3   :  { %5270 = vmatpush1.bf16.msra.mxu0 %v7151_v3  ;;  %416 = vmatprep.mubr.f32.mxu1 %v8579_v1 }
 0x1a4   :  { %5272 = vmatprep.subr.bf16.mxu0 %v7155_v4 }
 0x1a6   :  { %4976 = vmatmul.mubr.msk.f32.gmra.mrb[20].mxu1 %vm78_vm0, %v7037_v29 }
 0x1a7   :  { %5274 = vmatpush1.bf16.msra.mxu0 %v7163_v11  ;;  %422 = vmatprep.mubr.f32.mxu1 %v8579_v1 }
 0x1a8   :  { %5276 = vmatprep.subr.bf16.mxu0 %v7166_v13 }
 0x1aa   :  { %4977 = vmatmul.mubr.msk.f32.gmra.mrb[22].mxu1 %vm78_vm0, %v7055_v30 }
 0x1ab   :  { %5278 = vmatpush1.bf16.msra.mxu0 %v7172_v22  ;;  %428 = vmatprep.mubr.f32.mxu1 %v8579_v1 }
 0x1ac   :  { %5280 = vmatprep.subr.bf16.mxu0 %v7175_v23 }
 0x1ae   :  { %4978 = vmatmul.mubr.msk.f32.gmra.mrb[24].mxu1 %vm78_vm0, %v7073_v34 }
 0x1af   :  { %5282 = vmatpush1.bf16.msra.mxu0 %v7181_v35  ;;  %434 = vmatprep.mubr.f32.mxu1 %v8579_v1 }
 0x1b0   :  { %5284 = vmatprep.subr.bf16.mxu0 %v7184_v27 }
 0x1b2   :  { %4979 = vmatmul.mubr.msk.f32.gmra.mrb[26].mxu1 %vm78_vm0, %v7091_v39 }
 0x1b3   :  { %5286 = vmatpush1.bf16.msra.mxu0 %v7190_v49  ;;  %440 = vmatprep.mubr.f32.mxu1 %v8579_v1 }
 0x1b4   :  { %5288 = vmatprep.subr.bf16.mxu0 %v7193_v50 }
 0x1b6   :  { %4980 = vmatmul.mubr.msk.f32.gmra.mrb[28].mxu1 %vm78_vm0, %v7107_v43 }
 0x1b7   :  { %5290 = vmatpush1.bf16.msra.mxu0 %v7199_v54  ;;  %446 = vmatprep.mubr.f32.mxu1 %v8579_v1 }
 0x1b8   :  { %5292 = vmatprep.subr.bf16.mxu0 %v7202_v59 }
 0x1ba   :  { %4981 = vmatmul.mubr.msk.f32.gmra.mrb[30].mxu1 %vm78_vm0, %v7123_v17 }
 0x1bb   :  { %5294 = vmatpush1.bf16.msra.mxu0 %v7208_v62  ;;  %692 = vmatprep.mubr.f32.mxu1 %v8579_v1 }
 0x1bc   :  { %5328 = vmatprep.subr.bf16.mxu0 %v6964_v12  ;;  %v809_v12 = vld [vmem:[#allocation10 + $0xd8] sm:$0xff] }
 0x1bd   :  { %v7240_v46 = vpack.c.bf16 %v813_v42, %v809_v12  ;;  %v1031_v12 = vld [vmem:[#allocation13 + $0x30] sm:$0xff]  ;;  %v1040_v42 = vld [vmem:[#allocation13 + $0x78] sm:$0xff] }
 0x1be   :  { %1154 = vmatmul.mubr.f32.vlgmr.msra.gmra.mrb[14].mxu0 %v8579_v1  ;;  %4990 = vmatmul.mubr.msk.f32.vlgmr.msra.gmra.mrb[32].mxu1 %vm78_vm0, %v6999_v37  ;;  %v7237_v37 = vpack.c.bf16 %v804_v40, %v800_v38  ;;  %v1032_v38 = vld [vmem:[#allocation13 + $0x38] sm:$0xff]  ;;  %v1027_v40 = vld [vmem:[#allocation13 + $0x10] sm:$0xff] }
 0x1bf   :  { %5234 = vmatpush1.bf16.msra.mxu1 %v7215_v14  ;;  %698 = vmatprep.mubr.f32.mxu1 %v8579_v1 }
 0x1c0   :  { %5236 = vmatprep.subr.bf16.mxu1 %v7217_v15  ;;  %5330 = vmatpush1.bf16.msra.mxu0 %v6996_v36  ;;  %v808_v36 = vld [vmem:[#allocation10 + $0xd0] sm:$0xff] }
 0x1c1   :  { %5332 = vmatprep.subr.bf16.mxu0 %v7004_v45  ;;  %1396 = vmatprep.mubr.f32.mxu0 %v8579_v1  ;;  %v817_v45 = vld [vmem:[#allocation10 + $0x118] sm:$0xff] }
 0x1c2   :  { %4991 = vmatmul.mubr.msk.f32.gmra.mrb[34].mxu1 %vm78_vm0, %v7018_v28  ;;  %v7248_v28 = vpack.c.bf16 %v812_v51, %v808_v36  ;;  %v7251_v24 = vpack.c.bf16 %v821_v52, %v817_v45  ;;  %v1035_v36 = vld [vmem:[#allocation13 + $0x50] sm:$0xff]  ;;  %v1048_v45 = vld [vmem:[#allocation13 + $0xb8] sm:$0xff] }
 0x1c3   :  { %5238 = vmatpush1.bf16.msra.mxu1 %v7225_v31  ;;  %704 = vmatprep.mubr.f32.mxu1 %v8579_v1  ;;  %v1039_v51 = vld [vmem:[#allocation13 + $0x70] sm:$0xff] }
 0x1c4   :  { %5240 = vmatprep.subr.bf16.mxu1 %v7228_v33  ;;  %5334 = vmatpush1.bf16.msra.mxu0 %v7011_v47  ;;  %v825_v47 = vld [vmem:[#allocation10 + $0x158] sm:$0xff]  ;;  %v1043_v52 = vld [vmem:[#allocation13 + $0x90] sm:$0xff] }
 0x1c5   :  { %5336 = vmatprep.subr.bf16.mxu0 %v7013_v48  ;;  %v7259_v48 = vpack.c.bf16 %v820_v60, %v816_v53  ;;  %v1047_v53 = vld [vmem:[#allocation13 + $0xb0] sm:$0xff]  ;;  %v1052_v60 = vld [vmem:[#allocation13 + $0xd8] sm:$0xff] }
 0x1c6   :  { %4992 = vmatmul.mubr.msk.f32.gmra.mrb[36].mxu1 %vm78_vm0, %v7037_v29  ;;  %v7262_v29 = vpack.c.bf16 %v829_v61, %v825_v47  ;;  %v7319_v47 = vpack.c.bf16 %v1047_v53, %v1043_v52  ;;  %v1051_v61 = vld [vmem:[#allocation13 + $0xd0] sm:$0xff]  ;;  %v1088_v52 = vld [vmem:[#allocation13 + $0x1f8] sm:$0xff] }
 0x1c7   :  { %5242 = vmatpush1.bf16.msra.mxu1 %v7237_v37  ;;  %710 = vmatprep.mubr.f32.mxu1 %v8579_v1 }
 0x1c8   :  { %5244 = vmatprep.subr.bf16.mxu1 %v7240_v46  ;;  %5338 = vmatpush1.bf16.msra.mxu0 %v7030_v55  ;;  %v833_v55 = vld [vmem:[#allocation10 + $0x198] sm:$0xff] }
 0x1c9   :  { %5340 = vmatprep.subr.bf16.mxu0 %v7032_v56  ;;  %v7270_v56 = vpack.c.bf16 %v828_v6, %v824_v5  ;;  %v1055_v5 = vld [vmem:[#allocation13 + $0xf0] sm:$0xff]  ;;  %v1060_v6 = vld [vmem:[#allocation13 + $0x118] sm:$0xff] }
 0x1ca   :  { %4993 = vmatmul.mubr.msk.f32.gmra.mrb[38].mxu1 %vm78_vm0, %v7055_v30  ;;  %v7273_v30 = vpack.c.bf16 %v837_v7, %v833_v55  ;;  %v1064_v55 = vld [vmem:[#allocation13 + $0x138] sm:$0xff]  ;;  %v7325_v7 = vpack.c.bf16 %v1055_v5, %v1051_v61  ;;  %v1087_v61 = vld [vmem:[#allocation13 + $0x1f0] sm:$0xff] }
 0x1cb   :  { %5246 = vmatpush1.bf16.msra.mxu1 %v7248_v28  ;;  %716 = vmatprep.mubr.f32.mxu1 %v8579_v1 }
 0x1cc   :  { %5248 = vmatprep.subr.bf16.mxu1 %v7251_v24  ;;  %5342 = vmatpush1.bf16.msra.mxu0 %v7048_v63  ;;  %v841_v63 = vld [vmem:[#allocation10 + $0x1d8] sm:$0xff] }
 0x1cd   :  { %5344 = vmatprep.subr.bf16.mxu0 %v7050_v0  ;;  %v7281_v0 = vpack.c.bf16 %v836_v18, %v832_v10  ;;  %v7328_v10 = vpack.c.bf16 %v1064_v55, %v1060_v6  ;;  %v1059_v18 = vld [vmem:[#allocation13 + $0x110] sm:$0xff] }
 0x1ce   :  { %4994 = vmatmul.mubr.msk.f32.gmra.mrb[40].mxu1 %vm78_vm0, %v7073_v34  ;;  %v7284_v34 = vpack.c.bf16 %v845_v21, %v841_v63  ;;  %v1063_v63 = vld [vmem:[#allocation13 + $0x130] sm:$0xff]  ;;  %v1068_v21 = vld [vmem:[#allocation13 + $0x158] sm:$0xff] }
 0x1cf   :  { %5250 = vmatpush1.bf16.msra.mxu1 %v7259_v48  ;;  %722 = vmatprep.mubr.f32.mxu1 %v8579_v1 }
 0x1d0   :  { %5252 = vmatprep.subr.bf16.mxu1 %v7262_v29  ;;  %5346 = vmatpush1.bf16.msra.mxu0 %v7066_v8  ;;  %v1028_v8 = vld [vmem:[#allocation13 + $0x18] sm:$0xff] }
 0x1d1   :  { %5348 = vmatprep.subr.bf16.mxu0 %v7068_v9  ;;  %v7292_v9 = vpack.c.bf16 %v844_v26, %v840_v25  ;;  %v1072_v25 = vld [vmem:[#allocation13 + $0x178] sm:$0xff]  ;;  %v7331_v26 = vpack.c.bf16 %v1063_v63, %v1059_v18 }
 0x1d2   :  { %4995 = vmatmul.mubr.msk.f32.gmra.mrb[42].mxu1 %vm78_vm0, %v7091_v39  ;;  %v7295_v39 = vpack.c.bf16 %v1032_v38, %v1028_v8  ;;  %v7334_v8 = vpack.c.bf16 %v1072_v25, %v1068_v21  ;;  %v1067_v38 = vld [vmem:[#allocation13 + $0x150] sm:$0xff] }
 0x1d3   :  { %5254 = vmatpush1.bf16.msra.mxu1 %v7270_v56  ;;  %728 = vmatprep.mubr.f32.mxu1 %v8579_v1 }
 0x1d4   :  { %5256 = vmatprep.subr.bf16.mxu1 %v7273_v30  ;;  %5350 = vmatpush1.bf16.msra.mxu0 %v7084_v19  ;;  %v1036_v19 = vld [vmem:[#allocation13 + $0x58] sm:$0xff] }
 0x1d5   :  { %5352 = vmatprep.subr.bf16.mxu0 %v7086_v20  ;;  %v7303_v20 = vpack.c.bf16 %v1031_v12, %v1027_v40  ;;  %v1071_v40 = vld [vmem:[#allocation13 + $0x170] sm:$0xff]  ;;  %v1076_v12 = vld [vmem:[#allocation13 + $0x198] sm:$0xff] }
 0x1d6   :  { %4996 = vmatmul.mubr.msk.f32.gmra.mrb[44].mxu1 %vm78_vm0, %v7107_v43  ;;  %v7306_v43 = vpack.c.bf16 %v1040_v42, %v1036_v19  ;;  %v1080_v19 = vld [vmem:[#allocation13 + $0x1b8] sm:$0xff]  ;;  %v7337_v42 = vpack.c.bf16 %v1071_v40, %v1067_v38 }
 0x1d7   :  { %5258 = vmatpush1.bf16.msra.mxu1 %v7281_v0  ;;  %734 = vmatprep.mubr.f32.mxu1 %v8579_v1 }
 0x1d8   :  { %5260 = vmatprep.subr.bf16.mxu1 %v7284_v34  ;;  %5354 = vmatpush1.bf16.msra.mxu0 %v7102_v32  ;;  %v1044_v32 = vld [vmem:[#allocation13 + $0x98] sm:$0xff] }
 0x1d9   :  { %5356 = vmatprep.subr.bf16.mxu0 %v7109_v16  ;;  %v7312_v16 = vpack.c.bf16 %v1039_v51, %v1035_v36  ;;  %v7340_v36 = vpack.c.bf16 %v1080_v19, %v1076_v12  ;;  %v1075_v51 = vld [vmem:[#allocation13 + $0x190] sm:$0xff] }
 0x1da   :  { %4997 = vmatmul.mubr.msk.f32.gmra.mrb[46].mxu1 %vm78_vm0, %v7123_v17  ;;  %v7316_v17 = vpack.c.bf16 %v1048_v45, %v1044_v32  ;;  %v1079_v32 = vld [vmem:[#allocation13 + $0x1b0] sm:$0xff]  ;;  %v1084_v45 = vld [vmem:[#allocation13 + $0x1d8] sm:$0xff] }
 0x1db   :  { %5262 = vmatpush1.bf16.msra.mxu1 %v7292_v9  ;;  %981 = vmatprep.mubr.f32.mxu1 %v8579_v1  ;;  %v7343_v53 = vpack.c.bf16 %v1079_v32, %v1075_v51 }
 0x1dc   :  { %5296 = vmatprep.subr.bf16.mxu1 %v7295_v39  ;;  %5358 = vmatpush1.bf16.msra.mxu0 %v7118_v41  ;;  %v1056_v41 = vld [vmem:[#allocation13 + $0xf8] sm:$0xff] }
 0x1dd   :  { %5392 = vmatprep.subr.bf16.mxu0 %v7125_v44  ;;  %v7322_v44 = vpack.c.bf16 %v1056_v41, %v1052_v60  ;;  %v7346_v60 = vpack.c.bf16 %v1088_v52, %v1084_v45  ;;  %v1083_v41 = vld [vmem:[#allocation13 + $0x1d0] sm:$0xff] }
 0x1de   :  { %982 = vmatmul.mubr.f32.vlgmr.msra.gmra.mrb[16].mxu1 %v8579_v1  ;;  %v7349_v5 = vpack.c.bf16 %v1087_v61, %v1083_v41 }
 0x1df   :  { %5298 = vmatpush1.bf16.msra.mxu1 %v7303_v20  ;;  %1224 = vmatprep.mubr.f32.mxu1 %v8579_v1 }
 0x1e0   :  { %5300 = vmatprep.subr.bf16.mxu1 %v7306_v43 }
 0x1e3   :  { %5302 = vmatpush1.bf16.msra.mxu1 %v7312_v16 }
 0x1e4   :  { %5304 = vmatprep.subr.bf16.mxu1 %v7316_v17 }
 0x1e7   :  { %5306 = vmatpush1.bf16.msra.mxu1 %v7319_v47 }
 0x1e8   :  { %5308 = vmatprep.subr.bf16.mxu1 %v7322_v44 }
 0x1eb   :  { %5310 = vmatpush1.bf16.msra.mxu1 %v7325_v7 }
 0x1ec   :  { %5312 = vmatprep.subr.bf16.mxu1 %v7328_v10 }
 0x1ef   :  { %5314 = vmatpush1.bf16.msra.mxu1 %v7331_v26 }
 0x1f0   :  { %5316 = vmatprep.subr.bf16.mxu1 %v7334_v8 }
 0x1f3   :  { %5318 = vmatpush1.bf16.msra.mxu1 %v7337_v42 }
 0x1f4   :  { %5320 = vmatprep.subr.bf16.mxu1 %v7340_v36 }
 0x1f7   :  { %5322 = vmatpush1.bf16.msra.mxu1 %v7343_v53 }
 0x1f8   :  { %5324 = vmatprep.subr.bf16.mxu1 %v7346_v60 }
 0x1fb   :  { %5326 = vmatpush1.bf16.msra.mxu1 %v7349_v5 }
 0x1fc   :  { %5360 = vmatprep.subr.bf16.mxu1 %v7145_v2  ;;  %v183_v2 = vlaneseq }
 0x1fe   :  { %1225 = vmatmul.mubr.f32.vlgmr.msra.gmra.mrb[46].mxu1 %v8579_v1 }
 0x1ff   :  { %5362 = vmatpush1.bf16.msra.mxu1 %v7215_v14  ;;  %1467 = vmatprep.mubr.f32.mxu1 %v8579_v1  ;;  %v7372_v14 = vshrl.u32 %v183_v2, 7 }
 0x200   :  { %5364 = vmatprep.subr.bf16.mxu1 %v7217_v15 }
 0x201   :  { %v8581_v15 = vsub.s32 0, %v7372_v14 }
 0x203   :  { %5366 = vmatpush1.bf16.msra.mxu1 %v7225_v31  ;;  %v181_v31 = vld [vmem:[%s8571_s5] sm:$0xf] }
 0x204   :  { %5368 = vmatprep.subr.bf16.mxu1 %v7228_v33 }
 0x207   :  { %5370 = vmatpush1.bf16.msra.mxu1 %v7237_v37  ;;  %v189_v37 = vsub.s32 1, %v7372_v14 }
 0x208   :  { %5372 = vmatprep.subr.bf16.mxu1 %v7240_v46 }
 0x20b   :  { %5374 = vmatpush1.bf16.msra.mxu1 %v7248_v28  ;;  %v186_v28 = vrot.slane %v181_v31, %v8581_v15 }
 0x20c   :  { %5376 = vmatprep.subr.bf16.mxu1 %v7251_v24  ;;  %v190_v24 = vrot.slane %v181_v31, %v189_v37 }
 0x20f   :  { %5378 = vmatpush1.bf16.msra.mxu1 %v7259_v48 }
 0x210   :  { %5380 = vmatprep.subr.bf16.mxu1 %v7262_v29 }
 0x213   :  { %5382 = vmatpush1.bf16.msra.mxu1 %v7270_v56 }
 0x214   :  { %5384 = vmatprep.subr.bf16.mxu1 %v7273_v30 }
 0x217   :  { %5386 = vmatpush1.bf16.msra.mxu1 %v7281_v0 }
 0x218   :  { %5388 = vmatprep.subr.bf16.mxu1 %v7284_v34 }
 0x21b   :  { %5390 = vmatpush1.bf16.msra.mxu1 %v7292_v9 }
 0x21c   :  { %5424 = vmatprep.subr.bf16.mxu1 %v7295_v39 }
 0x251   :  { %v293_v33 = vpop.f32.mrb[0].mxu1 }
 0x252   :  { %v295_v46 = vpop.f32.mrb[1].mxu1 }
 0x255   :  { %v299_v48 = vpop.f32.mrb[2].mxu1 }
 0x256   :  { %v7381_v29 = vadd.f32 %v299_v48, %v186_v28  ;;  %v301_v56 = vpop.f32.mrb[3].mxu1 }
 0x257   :  { %v7383_v30 = vadd.f32 %v301_v56, %v190_v24 }
 0x259   :  { %v305_v0 = vpop.f32.mrb[4].mxu1 }
 0x25a   :  { %v7385_v34 = vadd.f32 %v305_v0, %v186_v28  ;;  %v307_v9 = vpop.f32.mrb[5].mxu1 }
 0x25b   :  { %v7387_v39 = vadd.f32 %v307_v9, %v190_v24  ;;  %v294_v9 = vadd.f32 %v293_v33, %v186_v28 }
 0x25d   :  { %8656 = vst [vmem:[#allocation19_spill] sm:$0xff] %v7387_v39  ;;  %v311_v6 = vpop.f32.mrb[6].mxu1  ;;  %v2016_v39 = vld [vmem:[#allocation13 + $0x98] sm:$0xff] }
 0x25e   :  { %v7389_v55 = vadd.f32 %v311_v6, %v186_v28  ;;  %v313_v18 = vpop.f32.mrb[7].mxu1  ;;  %v296_v6 = vadd.f32 %v295_v46, %v190_v24 }
 0x25f   :  { %v7391_v63 = vadd.f32 %v313_v18, %v190_v24 }
 0x260   :  { %8657 = vst [vmem:[#allocation20_spill] sm:$0xff] %v7389_v55 }
 0x261   :  { %8658 = vst [vmem:[#allocation21_spill] sm:$0xff] %v7391_v63  ;;  %v317_v21 = vpop.f32.mrb[8].mxu1 }
 0x262   :  { %v7393_v25 = vadd.f32 %v317_v21, %v186_v28  ;;  %v319_v38 = vpop.f32.mrb[9].mxu1 }
 0x263   :  { %v7395_v40 = vadd.f32 %v319_v38, %v190_v24 }
 0x264   :  { %8659 = vst [vmem:[#allocation22_spill] sm:$0xff] %v7393_v25 }
 0x265   :  { %8660 = vst [vmem:[#allocation23_spill] sm:$0xff] %v7395_v40  ;;  %v323_v12 = vpop.f32.mrb[10].mxu1 }
 0x266   :  { %v7397_v19 = vadd.f32 %v323_v12, %v186_v28  ;;  %v325_v51 = vpop.f32.mrb[11].mxu1 }
 0x267   :  { %v7399_v32 = vadd.f32 %v325_v51, %v190_v24 }
 0x268   :  { %8661 = vst [vmem:[#allocation24_spill] sm:$0xff] %v7397_v19 }
 0x269   :  { %8662 = vst [vmem:[#allocation25_spill] sm:$0xff] %v7399_v32  ;;  %v329_v45 = vpop.f32.mrb[12].mxu1 }
 0x26a   :  { %v7401_v52 = vadd.f32 %v329_v45, %v186_v28  ;;  %v331_v41 = vpop.f32.mrb[13].mxu1 }
 0x26b   :  { %v7403_v61 = vadd.f32 %v331_v41, %v190_v24  ;;  %v193_v41 = vsub.s32 2, %v7372_v14 }
 0x26c   :  { %8663 = vst [vmem:[#allocation26_spill] sm:$0xff] %v7401_v52 }
 0x26d   :  { %8664 = vst [vmem:[#allocation27_spill] sm:$0xff] %v7403_v61  ;;  %v335_v2 = vpop.f32.mrb[14].mxu1 }
 0x26e   :  { %v7405_v48 = vadd.f32 %v335_v2, %v186_v28  ;;  %v337_v56 = vpop.f32.mrb[15].mxu1  ;;  %v197_v2 = vsub.s32 3, %v7372_v14 }
 0x26f   :  { %v7407_v0 = vadd.f32 %v337_v56, %v190_v24  ;;  %v493_v24 = vld [vmem:[%s8574_s8] sm:$0xf] }
 0x270   :  { %8665 = vst [vmem:[#allocation28_spill] sm:$0xff] %v7405_v48  ;;  %v7413_v46 = vrot.slane %v181_v31, %v197_v2  ;;  %v7431_v32 = vrot.slane %v493_v24, %v193_v41 }
 0x271   :  { %8666 = vst [vmem:[#allocation29_spill] sm:$0xff] %v7407_v0  ;;  %v912_v18 = vpop.f32.mrb[16].mxu0  ;;  %v7411_v0 = vrot.slane %v181_v31, %v193_v41 }
 0x272   :  { %v988_v21 = vadd.f32 %v912_v18, %v294_v9  ;;  %v914_v38 = vpop.f32.mrb[17].mxu0  ;;  %8668 = vst [vmem:[#allocation31_spill] sm:$0xff] %v7413_v46  ;;  %v7420_v18 = vrot.slane %v493_v24, %v189_v37 }
 0x273   :  { %v989_v12 = vadd.f32 %v914_v38, %v296_v6  ;;  %8667 = vst [vmem:[#allocation30_spill] sm:$0xff] %v7411_v0 }
 0x274   :  { %v4998_v45 = vmul.f32 -1.442695, %v988_v21  ;;  %8669 = vst [vmem:[#allocation32_spill] sm:$0xff] %v7420_v18 }
 0x275   :  { %v4999_v15 = vmul.f32 -1.442695, %v989_v12 }
 0x277   :  { %6433 = vpow2.f32 %v4999_v15 }
 0x278   :  { %6435 = vpow2.f32 %v4998_v45 }
 0x281   :  { %v6434_v61 = vpop.eup %6433 }
 0x282   :  { %v6436_v48 = vpop.eup %6435  ;;  %v1001_v56 = vadd.f32 1.0, %v6434_v61 }
 0x283   :  { %v995_v33 = vadd.f32 1.0, %v6436_v48  ;;  %v8670_v48 = vsub.s32 0, %v7372_v14 }
 0x284   :  { %6437 = vrcp.f32 %v1001_v56 }
 0x285   :  { %6439 = vrcp.f32 %v995_v33  ;;  %v7424_v31 = vrot.slane %v493_v24, %v8670_v48 }
 0x287   :  { %8671 = vst [vmem:[#allocation33_spill] sm:$0xff] %v7424_v31 }
 0x28e   :  { %v6438_v12 = vpop.eup %6437 }
 0x28f   :  { %v6440_v45 = vpop.eup %6439  ;;  %v1012_v52 = vmul.f32 0.0, %v6438_v12 }
 0x291   :  { %v1155_v51 = vpop.f32.mrb[14].mxu0 }
 0x292   :  { %v1157_v1 = vpop.f32.mrb[15].mxu0  ;;  %v6349_v38 = vadd.f32 %v1155_v51, %v7424_v31 }
 0x293   :  { %v6350_v21 = vadd.f32 %v1157_v1, %v7420_v18 }
 0x294   :  { %v5001_v33 = vmul.f32 -1.442695, %v6349_v38  ;;  %v7433_v38 = vrot.slane %v493_v24, %v197_v2  ;;  %v8674_v2 = vmov 0.0  }
 0x295   :  { %v5002_v56 = vmul.f32 -1.442695, %v6350_v21 }
 0x296   :  { %8672 = vst [vmem:[#allocation34_spill] sm:$0xff] %v7433_v38 }
 0x2b1   :  { %v983_v28 = vpop.f32.mrb[16].mxu1 }
 0x2b2   :  { %v6319_v15 = vadd.f32 %v983_v28, %v7411_v0  ;;  %v985_v9 = vpop.f32.mrb[17].mxu1 }
 0x2b3   :  { %v6320_v6 = vadd.f32 %v985_v9, %v7413_v46 }
 0x2b4   :  { %6441 = vtanh.f32 %v6319_v15 }
 0x2b5   :  { %v5000_v61 = vmul.f32 -1.442695, %v6320_v6 }
 0x2b7   :  { %6443 = vpow2.f32 %v5000_v61 }
 0x2b8   :  { %6445 = vpow2.f32 %v5002_v56 }
 0x2b9   :  { %6447 = vpow2.f32 %v5001_v33 }
 0x2be   :  { %v6442_v28 = vpop.eup %6441 }
 0x2bf   :  { %v1013_v9 = vmul.f32 %v6442_v28, %v6440_v45 }
 0x2c1   :  { %v6444_v15 = vpop.eup %6443  ;;  %v7428_v37 = vadd.f32 %v1013_v9, %v1012_v52  ;;  %v1764_v9 = vld [vmem:[#allocation10 + $0x50] sm:$0xff] }
 0x2c2   :  { %v1008_v14 = vadd.f32 1.0, %v6444_v15  ;;  %v6446_v6 = vpop.eup %6445  ;;  %v1768_v15 = vld [vmem:[#allocation10 + $0x70] sm:$0xff] }
 0x2c3   :  { %6449 = vtanh.f32 %v7428_v37  ;;  %v6448_v1 = vpop.eup %6447  ;;  %v1244_v48 = vadd.f32 1.0, %v6446_v6  ;;  %v1771_v6 = vld [vmem:[#allocation10 + $0x88] sm:$0xff] }
 0x2c4   :  { %6451 = vrcp.f32 %v1008_v14  ;;  %v1238_v21 = vadd.f32 1.0, %v6448_v1  ;;  %v7501_v14 = vpack.c.bf16 %v1768_v15, %v1764_v9  ;;  %v1775_v1 = vld [vmem:[#allocation10 + $0xa8] sm:$0xff]  ;;  %v1792_v9 = vld [vmem:[#allocation10 + $0x130] sm:$0xff] }
 0x2c5   :  { %6453 = vrcp.f32 %v1244_v48  ;;  %v1777_v48 = vld [vmem:[#allocation10 + $0xb8] sm:$0xff] }
 0x2c6   :  { %6455 = vrcp.f32 %v1238_v21  ;;  %v1770_v21 = vld [vmem:[#allocation10 + $0x80] sm:$0xff] }
 0x2cd   :  { %v6450_v61 = vpop.eup %6449 }
 0x2ce   :  { %v6452_v51 = vpop.eup %6451 }
 0x2cf   :  { %v7435_v12 = vmul.f32 %v6452_v51, %v6450_v61  ;;  %v1773_v61 = vld [vmem:[#allocation10 + $0x98] sm:$0xff]  ;;  %v7506_v51 = vpack.c.bf16 %v1775_v1, %v1771_v6  ;;  %v1795_v6 = vld [vmem:[#allocation10 + $0x148] sm:$0xff] }
 0x2d0   :  { %v1799_v1 = vld [vmem:[#allocation10 + $0x168] sm:$0xff] }
 0x2d1   :  { %8673 = vst [vmem:[#allocation35_spill] sm:$0xff] %v7435_v12  ;;  %v1226_v45 = vpop.f32.mrb[46].mxu1  ;;  %1397 = vmatmul.mubr.f32.vlgmr.msra.gmra.mrb[18].mxu0 %v7435_v12  ;;  %1468 = vmatmul.mubr.f32.vlgmr.msra.gmra.mrb[18].mxu1 %v7435_v12 }
 0x2d2   :  { %v6365_v52 = vadd.f32 %v1226_v45, %v7431_v32  ;;  %v1228_v56 = vpop.f32.mrb[47].mxu1  ;;  %5394 = vmatpush1.bf16.msra.mxu0 %v7139_v57  ;;  %5426 = vmatpush1.bf16.msra.mxu1 %v7303_v20  ;;  %v6454_v57 = vpop.eup %6453  ;;  %v1774_v45 = vld [vmem:[#allocation10 + $0xa0] sm:$0xff] }
 0x2d3   :  { %v6366_v41 = vadd.f32 %v1228_v56, %v7433_v38  ;;  %5396 = vmatprep.subr.bf16.mxu0 %v7143_v58  ;;  %5428 = vmatprep.subr.bf16.mxu1 %v7306_v43  ;;  %v6456_v58 = vpop.eup %6455  ;;  %v7510_v56 = vpack.c.bf16 %v1774_v45, %v1770_v21  ;;  %v1801_v21 = vld [vmem:[#allocation10 + $0x178] sm:$0xff]  ;;  %v1794_v45 = vld [vmem:[#allocation10 + $0x140] sm:$0xff] }
 0x2d4   :  { %6457 = vtanh.f32 %v6365_v52  ;;  %1639 = vmatprep.mubr.f32.mxu0 %v8674_v2  ;;  %1710 = vmatprep.mubr.f32.mxu1 %v8674_v2  ;;  %v7508_v52 = vpack.c.bf16 %v1777_v48, %v1773_v61  ;;  %v1797_v61 = vld [vmem:[#allocation10 + $0x158] sm:$0xff]  ;;  %v7542_v48 = vpack.c.bf16 %v1799_v1, %v1795_v6  ;;  %v1811_v6 = vld [vmem:[#allocation10 + $0x1c8] sm:$0xff] }
 0x2d5   :  { %v5003_v24 = vmul.f32 -1.442695, %v6366_v41  ;;  %v1772_v41 = vld [vmem:[#allocation10 + $0x90] sm:$0xff]  ;;  %v1815_v1 = vld [vmem:[#allocation10 + $0x1e8] sm:$0xff] }
 0x2d6   :  { %5398 = vmatpush1.bf16.msra.mxu0 %v7151_v3  ;;  %5430 = vmatpush1.bf16.msra.mxu1 %v7312_v16  ;;  %v1255_v3 = vmul.f32 0.0, %v6454_v57 }
 0x2d7   :  { %6459 = vpow2.f32 %v5003_v24  ;;  %5400 = vmatprep.subr.bf16.mxu0 %v7155_v4  ;;  %5432 = vmatprep.subr.bf16.mxu1 %v7316_v17  ;;  %v1776_v24 = vld [vmem:[#allocation10 + $0xb0] sm:$0xff] }
 0x2d8   :  { %v7513_v57 = vpack.c.bf16 %v1776_v24, %v1772_v41  ;;  %v1798_v41 = vld [vmem:[#allocation10 + $0x160] sm:$0xff]  ;;  %v7544_v24 = vpack.c.bf16 %v1801_v21, %v1797_v61  ;;  %v1813_v61 = vld [vmem:[#allocation10 + $0x1d8] sm:$0xff]  ;;  %v7566_v21 = vpack.c.bf16 %v1815_v1, %v1811_v6 }
 0x2d9   :  { %v2004_v6 = vld [vmem:[#allocation13 + $0x38] sm:$0xff] }
 0x2da   :  { %5402 = vmatpush1.bf16.msra.mxu0 %v7163_v11  ;;  %5434 = vmatpush1.bf16.msra.mxu1 %v7319_v47 }
 0x2db   :  { %5404 = vmatprep.subr.bf16.mxu0 %v7166_v13  ;;  %5436 = vmatprep.subr.bf16.mxu1 %v7322_v44  ;;  %v1756_v44 = vld [vmem:[#allocation10 + $0x10] sm:$0xff] }
 0x2de   :  { %v6458_v20 = vpop.eup %6457  ;;  %5406 = vmatpush1.bf16.msra.mxu0 %v7172_v22  ;;  %5438 = vmatpush1.bf16.msra.mxu1 %v7325_v7  ;;  %v1760_v7 = vld [vmem:[#allocation10 + $0x30] sm:$0xff] }
 0x2df   :  { %v1256_v43 = vmul.f32 %v6458_v20, %v6456_v58  ;;  %5408 = vmatprep.subr.bf16.mxu0 %v7175_v23  ;;  %5440 = vmatprep.subr.bf16.mxu1 %v7328_v10  ;;  %v7489_v10 = vpack.c.bf16 %v1760_v7, %v1756_v44  ;;  %v1779_v58 = vld [vmem:[#allocation10 + $0xc8] sm:$0xff]  ;;  %v1789_v44 = vld [vmem:[#allocation10 + $0x118] sm:$0xff] }
 0x2e0   :  { %v1783_v20 = vld [vmem:[#allocation10 + $0xe8] sm:$0xff] }
 0x2e1   :  { %v6460_v4 = vpop.eup %6459  ;;  %v7459_v11 = vadd.f32 %v1256_v43, %v1255_v3  ;;  %v1781_v3 = vld [vmem:[#allocation10 + $0xd8] sm:$0xff]  ;;  %v7518_v43 = vpack.c.bf16 %v1783_v20, %v1779_v58  ;;  %v7546_v58 = vpack.c.bf16 %v1798_v41, %v1794_v45  ;;  %v1796_v20 = vld [vmem:[#allocation10 + $0x150] sm:$0xff]  ;;  %v1810_v41 = vld [vmem:[#allocation10 + $0x1c0] sm:$0xff] }
 0x2e2   :  { %v1251_v16 = vadd.f32 1.0, %v6460_v4  ;;  %5410 = vmatpush1.bf16.msra.mxu0 %v7181_v35  ;;  %5442 = vmatpush1.bf16.msra.mxu1 %v7331_v26  ;;  %v1755_v35 = vld [vmem:[#allocation10 + $0x8] sm:$0xff]  ;;  %v1785_v4 = vld [vmem:[#allocation10 + $0xf8] sm:$0xff] }
 0x2e3   :  { %6461 = vtanh.f32 %v7459_v11  ;;  %5412 = vmatprep.subr.bf16.mxu0 %v7184_v27  ;;  %5444 = vmatprep.subr.bf16.mxu1 %v7334_v8  ;;  %v1759_v27 = vld [vmem:[#allocation10 + $0x28] sm:$0xff]  ;;  %v1817_v45 = vld [vmem:[#allocation10 + $0x1f8] sm:$0xff] }
 0x2e4   :  { %6463 = vrcp.f32 %v1251_v16  ;;  %v1763_v26 = vld [vmem:[#allocation10 + $0x48] sm:$0xff]  ;;  %v1778_v16 = vld [vmem:[#allocation10 + $0xc0] sm:$0xff] }
 0x2e5   :  { %v1767_v8 = vld [vmem:[#allocation10 + $0x68] sm:$0xff] }
 0x2e6   :  { %5414 = vmatpush1.bf16.msra.mxu0 %v7190_v49  ;;  %5446 = vmatpush1.bf16.msra.mxu1 %v7337_v42  ;;  %v1757_v49 = vld [vmem:[#allocation10 + $0x18] sm:$0xff] }
 0x2e7   :  { %5416 = vmatprep.subr.bf16.mxu0 %v7193_v50  ;;  %5448 = vmatprep.subr.bf16.mxu1 %v7340_v36  ;;  %v7482_v50 = vpack.c.bf16 %v1759_v27, %v1755_v35  ;;  %v1765_v42 = vld [vmem:[#allocation10 + $0x58] sm:$0xff]  ;;  %v7494_v36 = vpack.c.bf16 %v1767_v8, %v1763_v26  ;;  %v1780_v27 = vld [vmem:[#allocation10 + $0xd0] sm:$0xff]  ;;  %v1786_v8 = vld [vmem:[#allocation10 + $0x100] sm:$0xff] }
 0x2e8   :  { %v1793_v26 = vld [vmem:[#allocation10 + $0x138] sm:$0xff] }
 0x2ea   :  { %5418 = vmatpush1.bf16.msra.mxu0 %v7199_v54  ;;  %5450 = vmatpush1.bf16.msra.mxu1 %v7343_v53  ;;  %v1761_v54 = vld [vmem:[#allocation10 + $0x38] sm:$0xff] }
 0x2eb   :  { %5420 = vmatprep.subr.bf16.mxu0 %v7202_v59  ;;  %5452 = vmatprep.subr.bf16.mxu1 %v7346_v60  ;;  %v1754_v59 = vld [vmem:[#allocation10] sm:$0xff]  ;;  %v7484_v17 = vpack.c.bf16 %v1761_v54, %v1757_v49  ;;  %v1769_v53 = vld [vmem:[#allocation10 + $0x78] sm:$0xff]  ;;  %v1784_v49 = vld [vmem:[#allocation10 + $0xf0] sm:$0xff] }
 0x2ec   :  { %v1762_v60 = vld [vmem:[#allocation10 + $0x40] sm:$0xff]  ;;  %v7496_v28 = vpack.c.bf16 %v1769_v53, %v1765_v42  ;;  %v7525_v54 = vpack.c.bf16 %v1784_v49, %v1780_v27  ;;  %v7532_v53 = vpack.c.bf16 %v1793_v26, %v1789_v44  ;;  %v1805_v27 = vld [vmem:[#allocation10 + $0x198] sm:$0xff] }
 0x2ed   :  { %v6462_v13 = vpop.eup %6461  ;;  %v1790_v42 = vld [vmem:[#allocation10 + $0x120] sm:$0xff] }
 0x2ee   :  { %v6464_v22 = vpop.eup %6463  ;;  %5422 = vmatpush1.bf16.msra.mxu0 %v7208_v62  ;;  %5454 = vmatpush1.bf16.msra.mxu1 %v7349_v5  ;;  %v1758_v62 = vld [vmem:[#allocation10 + $0x20] sm:$0xff] }
 0x2ef   :  { %v7476_v23 = vmul.f32 %v6464_v22, %v6462_v13  ;;  %v7486_v47 = vpack.c.bf16 %v1758_v62, %v1754_v59  ;;  %5456 = vmatprep.subr.bf16.mxu0 %v7482_v50  ;;  %5488 = vmatprep.subr.bf16.mxu1 %v7484_v17  ;;  %v1766_v5 = vld [vmem:[#allocation10 + $0x60] sm:$0xff]  ;;  %v7520_v22 = vpack.c.bf16 %v1785_v4, %v1781_v3  ;;  %v1787_v59 = vld [vmem:[#allocation10 + $0x108] sm:$0xff]  ;;  %v1800_v3 = vld [vmem:[#allocation10 + $0x170] sm:$0xff] }
 0x2f0   :  { %v7498_v33 = vpack.c.bf16 %v1766_v5, %v1762_v60  ;;  %v1782_v13 = vld [vmem:[#allocation10 + $0xe0] sm:$0xff]  ;;  %v1791_v62 = vld [vmem:[#allocation10 + $0x128] sm:$0xff]  ;;  %v7534_v60 = vpack.c.bf16 %v1790_v42, %v1786_v8  ;;  %v1788_v5 = vld [vmem:[#allocation10 + $0x110] sm:$0xff]  ;;  %v7549_v4 = vpack.c.bf16 %v1800_v3, %v1796_v20  ;;  %v7568_v3 = vpack.c.bf16 %v1817_v45, %v1813_v61 }
 0x2f1   :  { %8675 = vst [vmem:[#allocation36_spill] sm:$0xff] %v7476_v23  ;;  %1640 = vmatmul.mubr.f32.vlgmr.msra.gmra.mrb[12].mxu0 %v7476_v23  ;;  %1711 = vmatmul.mubr.f32.vlgmr.msra.gmra.mrb[44].mxu1 %v7476_v23  ;;  %v7522_v35 = vpack.c.bf16 %v1782_v13, %v1778_v16  ;;  %v7530_v7 = vpack.c.bf16 %v1791_v62, %v1787_v59  ;;  %v1803_v16 = vld [vmem:[#allocation10 + $0x188] sm:$0xff]  ;;  %v1809_v59 = vld [vmem:[#allocation10 + $0x1b8] sm:$0xff]  ;;  %v1802_v62 = vld [vmem:[#allocation10 + $0x180] sm:$0xff] }
 0x2f2   :  { %1882 = vmatprep.mubr.f32.mxu0 %v8674_v2  ;;  %1953 = vmatprep.mubr.f32.mxu1 %v8674_v2  ;;  %v7537_v15 = vpack.c.bf16 %v1792_v9, %v1788_v5  ;;  %v1807_v13 = vld [vmem:[#allocation10 + $0x1a8] sm:$0xff]  ;;  %v1806_v44 = vld [vmem:[#allocation10 + $0x1a0] sm:$0xff]  ;;  %v7556_v26 = vpack.c.bf16 %v1809_v59, %v1805_v27  ;;  %v1804_v42 = vld [vmem:[#allocation10 + $0x190] sm:$0xff] }
 0x2f3   :  { %5458 = vmatpush1.bf16.msra.mxu0 %v7486_v47  ;;  %5490 = vmatpush1.bf16.msra.mxu1 %v7489_v10  ;;  %v7554_v49 = vpack.c.bf16 %v1807_v13, %v1803_v16  ;;  %v7558_v8 = vpack.c.bf16 %v1806_v44, %v1802_v62  ;;  %v1808_v5 = vld [vmem:[#allocation10 + $0x1b0] sm:$0xff]  ;;  %v1814_v20 = vld [vmem:[#allocation10 + $0x1e0] sm:$0xff]  ;;  %v1998_v62 = vld [vmem:[#allocation13 + $0x8] sm:$0xff] }
 0x2f4   :  { %5460 = vmatprep.subr.bf16.mxu0 %v7494_v36  ;;  %5492 = vmatprep.subr.bf16.mxu1 %v7496_v28  ;;  %v7561_v9 = vpack.c.bf16 %v1808_v5, %v1804_v42  ;;  %v7570_v16 = vpack.c.bf16 %v1814_v20, %v1810_v41  ;;  %v1812_v13 = vld [vmem:[#allocation10 + $0x1d0] sm:$0xff]  ;;  %v2002_v44 = vld [vmem:[#allocation13 + $0x28] sm:$0xff]  ;;  %v2000_v42 = vld [vmem:[#allocation13 + $0x18] sm:$0xff] }
 0x2f5   :  { %v1816_v27 = vld [vmem:[#allocation10 + $0x1f0] sm:$0xff]  ;;  %v7578_v5 = vpack.c.bf16 %v2002_v44, %v1998_v62  ;;  %v7580_v1 = vpack.c.bf16 %v2004_v6, %v2000_v42 }
 0x2f6   :  { %v7573_v59 = vpack.c.bf16 %v1816_v27, %v1812_v13 }
 0x2f7   :  { %5462 = vmatpush1.bf16.msra.mxu0 %v7498_v33  ;;  %5494 = vmatpush1.bf16.msra.mxu1 %v7501_v14 }
 0x2f8   :  { %5464 = vmatprep.subr.bf16.mxu0 %v7506_v51  ;;  %5496 = vmatprep.subr.bf16.mxu1 %v7508_v52 }
 0x2fb   :  { %5466 = vmatpush1.bf16.msra.mxu0 %v7510_v56  ;;  %5498 = vmatpush1.bf16.msra.mxu1 %v7513_v57 }
 0x2fc   :  { %5468 = vmatprep.subr.bf16.mxu0 %v7518_v43  ;;  %5500 = vmatprep.subr.bf16.mxu1 %v7520_v22 }
 0x2ff   :  { %5470 = vmatpush1.bf16.msra.mxu0 %v7522_v35  ;;  %5502 = vmatpush1.bf16.msra.mxu1 %v7525_v54 }
 0x300   :  { %5472 = vmatprep.subr.bf16.mxu0 %v7530_v7  ;;  %5504 = vmatprep.subr.bf16.mxu1 %v7532_v53 }
 0x303   :  { %5474 = vmatpush1.bf16.msra.mxu0 %v7534_v60  ;;  %5506 = vmatpush1.bf16.msra.mxu1 %v7537_v15 }
 0x304   :  { %5476 = vmatprep.subr.bf16.mxu0 %v7542_v48  ;;  %5508 = vmatprep.subr.bf16.mxu1 %v7544_v24 }
 0x307   :  { %5478 = vmatpush1.bf16.msra.mxu0 %v7546_v58  ;;  %5510 = vmatpush1.bf16.msra.mxu1 %v7549_v4 }
 0x308   :  { %5480 = vmatprep.subr.bf16.mxu0 %v7554_v49  ;;  %5512 = vmatprep.subr.bf16.mxu1 %v7556_v26 }
 0x30b   :  { %5482 = vmatpush1.bf16.msra.mxu0 %v7558_v8  ;;  %5514 = vmatpush1.bf16.msra.mxu1 %v7561_v9 }
 0x30c   :  { %5484 = vmatprep.subr.bf16.mxu0 %v7566_v21  ;;  %5516 = vmatprep.subr.bf16.mxu1 %v7568_v3 }
 0x30f   :  { %5486 = vmatpush1.bf16.msra.mxu0 %v7570_v16  ;;  %5518 = vmatpush1.bf16.msra.mxu1 %v7573_v59 }
 0x310   :  { %5520 = vmatprep.subr.bf16.mxu0 %v7578_v5  ;;  %5552 = vmatprep.subr.bf16.mxu1 %v7580_v1 }
 0x3a4   :  { %v1398_v61 = vpop.f32.mrb[18].mxu0  ;;  %v1469_v45 = vpop.f32.mrb[18].mxu1 }
 0x3a5   :  { %v1474_v41 = vadd.f32 %v1398_v61, %v7381_v29  ;;  %v1400_v20 = vpop.f32.mrb[19].mxu0  ;;  %v1471_v13 = vpop.f32.mrb[19].mxu1  ;;  %v6321_v42 = vadd.f32 %v1469_v45, %v7411_v0  ;;  %v2014_v0 = vld [vmem:[#allocation13 + $0x88] sm:$0xff] }
 0x3a6   :  { %v1475_v27 = vadd.f32 %v1400_v20, %v7383_v30  ;;  %v6322_v62 = vadd.f32 %v1471_v13, %v7413_v46  ;;  %v2018_v46 = vld [vmem:[#allocation13 + $0xa8] sm:$0xff] }
 0x3a7   :  { %v5004_v12 = vmul.f32 -1.442695, %v1474_v41 }
 0x3a8   :  { %v5005_v23 = vmul.f32 -1.442695, %v1475_v27  ;;  %v5006_v44 = vmul.f32 -1.442695, %v6322_v62 }
 0x3a9   :  { %6465 = vpow2.f32 %v5004_v12 }
 0x3aa   :  { %6467 = vpow2.f32 %v5005_v23 }
 0x3ab   :  { %6469 = vpow2.f32 %v5006_v44 }
 0x3ac   :  { %6471 = vtanh.f32 %v6321_v42 }
 0x3b3   :  { %v6466_v6 = vpop.eup %6465 }
 0x3b4   :  { %v6468_v19 = vpop.eup %6467  ;;  %v1481_v40 = vadd.f32 1.0, %v6466_v6 }
 0x3b5   :  { %v1487_v25 = vadd.f32 1.0, %v6468_v19  ;;  %v6470_v29 = vpop.eup %6469 }
 0x3b6   :  { %6473 = vrcp.f32 %v1481_v40  ;;  %v6472_v61 = vpop.eup %6471  ;;  %v1494_v12 = vadd.f32 1.0, %v6470_v29  ;;  %v2001_v29 = vld [vmem:[#allocation13 + $0x20] sm:$0xff] }
 0x3b7   :  { %6475 = vrcp.f32 %v1487_v25 }
 0x3b8   :  { %6477 = vrcp.f32 %v1494_v12  ;;  %v2008_v12 = vld [vmem:[#allocation13 + $0x58] sm:$0xff] }
 0x3c0   :  { %v6474_v30 = vpop.eup %6473 }
 0x3c1   :  { %v6476_v41 = vpop.eup %6475  ;;  %v1499_v20 = vmul.f32 %v6474_v30, %v6472_v61  ;;  %v1999_v61 = vld [vmem:[#allocation13 + $0x10] sm:$0xff] }
 0x3c2   :  { %v1498_v23 = vmul.f32 %v6476_v41, %v7428_v37  ;;  %v1997_v37 = vld [vmem:[#allocation13] sm:$0xff]  ;;  %v2003_v30 = vld [vmem:[#allocation13 + $0x30] sm:$0xff]  ;;  %v2006_v41 = vld [vmem:[#allocation13 + $0x48] sm:$0xff] }
 0x3c4   :  { %v7589_v13 = vadd.f32 %v1499_v20, %v1498_v23  ;;  %v1641_v27 = vpop.f32.mrb[12].mxu0  ;;  %v1712_v45 = vpop.f32.mrb[44].mxu1  ;;  %v2010_v20 = vld [vmem:[#allocation13 + $0x68] sm:$0xff]  ;;  %v2012_v23 = vld [vmem:[#allocation13 + $0x78] sm:$0xff] }
 0x3c5   :  { %v6347_v62 = vadd.f32 %v1641_v27, %v7424_v31  ;;  %v1643_v44 = vpop.f32.mrb[13].mxu0  ;;  %v1714_v42 = vpop.f32.mrb[45].mxu1  ;;  %v2007_v31 = vld [vmem:[#allocation13 + $0x50] sm:$0xff] }
 0x3c6   :  { %8676 = vst [vmem:[#allocation37_spill] sm:$0xff] %v7589_v13  ;;  %v6348_v40 = vadd.f32 %v1643_v44, %v7420_v18  ;;  %6479 = vtanh.f32 %v7589_v13  ;;  %v6364_v6 = vadd.f32 %v1714_v42, %v7433_v38  ;;  %v6478_v27 = vpop.eup %6477  ;;  %v7595_v44 = vpack.c.bf16 %v2001_v29, %v1997_v37  ;;  %v2011_v13 = vld [vmem:[#allocation13 + $0x70] sm:$0xff] }
 0x3c7   :  { %v5007_v25 = vmul.f32 -1.442695, %v6347_v62  ;;  %v7597_v18 = vpack.c.bf16 %v2003_v30, %v1999_v61  ;;  %v2005_v62 = vld [vmem:[#allocation13 + $0x40] sm:$0xff]  ;;  %v7604_v38 = vpack.c.bf16 %v2012_v23, %v2008_v12  ;;  %v7616_v12 = vpack.c.bf16 %v2018_v46, %v2014_v0 }
 0x3c8   :  { %v5008_v19 = vmul.f32 -1.442695, %v6348_v40  ;;  %v5009_v55 = vmul.f32 -1.442695, %v6364_v6  ;;  %8677 = vst [vmem:[#allocation38_spill] sm:$0xff] %v7595_v44  ;;  %v2009_v40 = vld [vmem:[#allocation13 + $0x60] sm:$0xff] }
 0x3c9   :  { %6481 = vpow2.f32 %v5007_v25  ;;  %8678 = vst [vmem:[#allocation39_spill] sm:$0xff] %v7597_v18  ;;  %v6363_v25 = vadd.f32 %v1712_v45, %v7431_v32  ;;  %8681 = vst [vmem:[#allocation42_spill] sm:$0xff] %v7604_v38  ;;  %v2020_v6 = vld [vmem:[#allocation13 + $0xb8] sm:$0xff]  ;;  %v7612_v45 = vpack.c.bf16 %v2011_v13, %v2007_v31  ;;  %v2013_v30 = vld [vmem:[#allocation13 + $0x80] sm:$0xff] }
 0x3ca   :  { %6483 = vpow2.f32 %v5008_v19  ;;  %v7602_v19 = vpack.c.bf16 %v2010_v20, %v2006_v41  ;;  %v2017_v41 = vld [vmem:[#allocation13 + $0xa0] sm:$0xff]  ;;  %8684 = vst [vmem:[#allocation45_spill] sm:$0xff] %v7616_v12  ;;  %v7618_v23 = vpack.c.bf16 %v2020_v6, %v2016_v39  ;;  %v2028_v31 = vld [vmem:[#allocation13 + $0xf8] sm:$0xff] }
 0x3cb   :  { %6485 = vpow2.f32 %v5009_v55  ;;  %8683 = vst [vmem:[#allocation44_spill] sm:$0xff] %v7612_v45  ;;  %v2015_v55 = vld [vmem:[#allocation13 + $0x90] sm:$0xff]  ;;  %v7624_v0 = vpack.c.bf16 %v2017_v41, %v2013_v30  ;;  %v2021_v46 = vld [vmem:[#allocation13 + $0xc0] sm:$0xff] }
 0x3cc   :  { %8680 = vst [vmem:[#allocation41_spill] sm:$0xff] %v7602_v19  ;;  %6487 = vtanh.f32 %v6363_v25  ;;  %8685 = vst [vmem:[#allocation46_spill] sm:$0xff] %v7618_v23  ;;  %v2025_v13 = vld [vmem:[#allocation13 + $0xe0] sm:$0xff] }
 0x3cd   :  { %8686 = vst [vmem:[#allocation47_spill] sm:$0xff] %v7624_v0  ;;  %v7636_v30 = vpack.c.bf16 %v2025_v13, %v2021_v46  ;;  %v2044_v46 = vld [vmem:[#allocation13 + $0x178] sm:$0xff] }
 0x3cf   :  { %8690 = vst [vmem:[#allocation51_spill] sm:$0xff] %v7636_v30 }
 0x3d0   :  { %v6480_v63 = vpop.eup %6479 }
 0x3d1   :  { %v7600_v42 = vmul.f32 %v6480_v63, %v6478_v27  ;;  %v7610_v63 = vpack.c.bf16 %v2009_v40, %v2005_v62  ;;  %v2019_v27 = vld [vmem:[#allocation13 + $0xb0] sm:$0xff]  ;;  %v2026_v62 = vld [vmem:[#allocation13 + $0xe8] sm:$0xff]  ;;  %v2024_v40 = vld [vmem:[#allocation13 + $0xd8] sm:$0xff] }
 0x3d2   :  { %v7626_v39 = vpack.c.bf16 %v2019_v27, %v2015_v55  ;;  %v7632_v6 = vpack.c.bf16 %v2028_v31, %v2024_v40  ;;  %v2029_v55 = vld [vmem:[#allocation13 + $0x100] sm:$0xff]  ;;  %v2031_v40 = vld [vmem:[#allocation13 + $0x110] sm:$0xff] }
 0x3d3   :  { %8679 = vst [vmem:[#allocation40_spill] sm:$0xff] %v7600_v42  ;;  %v6482_v37 = vpop.eup %6481  ;;  %1883 = vmatmul.mubr.f32.vlgmr.msra.gmra.mrb[20].mxu0 %v7600_v42  ;;  %1954 = vmatmul.mubr.f32.vlgmr.msra.gmra.mrb[20].mxu1 %v7600_v42  ;;  %8682 = vst [vmem:[#allocation43_spill] sm:$0xff] %v7610_v63  ;;  %v2034_v42 = vld [vmem:[#allocation13 + $0x128] sm:$0xff]  ;;  %v2033_v27 = vld [vmem:[#allocation13 + $0x120] sm:$0xff] }
 0x3d4   :  { %v6484_v29 = vpop.eup %6483  ;;  %v1724_v61 = vadd.f32 1.0, %v6482_v37  ;;  %5522 = vmatpush1.bf16.msra.mxu0 %v7595_v44  ;;  %5554 = vmatpush1.bf16.msra.mxu1 %v7597_v18  ;;  %v2022_v37 = vld [vmem:[#allocation13 + $0xc8] sm:$0xff]  ;;  %8687 = vst [vmem:[#allocation48_spill] sm:$0xff] %v7626_v39  ;;  %8689 = vst [vmem:[#allocation50_spill] sm:$0xff] %v7632_v6  ;;  %v2035_v31 = vld [vmem:[#allocation13 + $0x130] sm:$0xff] }
 0x3d5   :  { %v1730_v20 = vadd.f32 1.0, %v6484_v29  ;;  %5524 = vmatprep.subr.bf16.mxu0 %v7602_v19  ;;  %5556 = vmatprep.subr.bf16.mxu1 %v7604_v38  ;;  %v7630_v25 = vpack.c.bf16 %v2026_v62, %v2022_v37  ;;  %v2023_v29 = vld [vmem:[#allocation13 + $0xd0] sm:$0xff] }
 0x3d6   :  { %6489 = vrcp.f32 %v1724_v61  ;;  %2125 = vmatprep.mubr.f32.mxu0 %v8674_v2  ;;  %2196 = vmatprep.mubr.f32.mxu1 %v8674_v2  ;;  %v2027_v61 = vld [vmem:[#allocation13 + $0xf0] sm:$0xff] }
 0x3d7   :  { %6491 = vrcp.f32 %v1730_v20  ;;  %8688 = vst [vmem:[#allocation49_spill] sm:$0xff] %v7630_v25  ;;  %v2030_v20 = vld [vmem:[#allocation13 + $0x108] sm:$0xff]  ;;  %v7638_v41 = vpack.c.bf16 %v2027_v61, %v2023_v29  ;;  %v7648_v61 = vpack.c.bf16 %v2033_v27, %v2029_v55  ;;  %v2043_v18 = vld [vmem:[#allocation13 + $0x170] sm:$0xff] }
 0x3d8   :  { %5526 = vmatpush1.bf16.msra.mxu0 %v7610_v63  ;;  %5558 = vmatpush1.bf16.msra.mxu1 %v7612_v45  ;;  %v2032_v63 = vld [vmem:[#allocation13 + $0x118] sm:$0xff]  ;;  %v7642_v37 = vpack.c.bf16 %v2034_v42, %v2030_v20  ;;  %v2037_v42 = vld [vmem:[#allocation13 + $0x140] sm:$0xff]  ;;  %v2050_v27 = vld [vmem:[#allocation13 + $0x1a8] sm:$0xff] }
 0x3d9   :  { %5528 = vmatprep.subr.bf16.mxu0 %v7616_v12  ;;  %5560 = vmatprep.subr.bf16.mxu1 %v7618_v23  ;;  %v2036_v45 = vld [vmem:[#allocation13 + $0x138] sm:$0xff]  ;;  %8691 = vst [vmem:[#allocation52_spill] sm:$0xff] %v7638_v41  ;;  %v2038_v23 = vld [vmem:[#allocation13 + $0x148] sm:$0xff] }
 0x3da   :  { %v7644_v62 = vpack.c.bf16 %v2036_v45, %v2032_v63  ;;  %v2042_v12 = vld [vmem:[#allocation13 + $0x168] sm:$0xff]  ;;  %v2041_v63 = vld [vmem:[#allocation13 + $0x160] sm:$0xff] }
 0x3db   :  { %v7654_v38 = vpack.c.bf16 %v2042_v12, %v2038_v23  ;;  %v2045_v23 = vld [vmem:[#allocation13 + $0x180] sm:$0xff] }
 0x3dc   :  { %5530 = vmatpush1.bf16.msra.mxu0 %v7624_v0  ;;  %5562 = vmatpush1.bf16.msra.mxu1 %v7626_v39  ;;  %v6486_v0 = vpop.eup %6485  ;;  %v2040_v39 = vld [vmem:[#allocation13 + $0x158] sm:$0xff] }
 0x3dd   :  { %5532 = vmatprep.subr.bf16.mxu0 %v7630_v25  ;;  %5564 = vmatprep.subr.bf16.mxu1 %v7632_v6  ;;  %v6488_v13 = vpop.eup %6487  ;;  %v7650_v6 = vpack.c.bf16 %v2035_v31, %v2031_v40  ;;  %v1737_v25 = vadd.f32 1.0, %v6486_v0  ;;  %v7656_v19 = vpack.c.bf16 %v2044_v46, %v2040_v39  ;;  %v2048_v40 = vld [vmem:[#allocation13 + $0x198] sm:$0xff]  ;;  %v7663_v0 = vpack.c.bf16 %v2041_v63, %v2037_v42  ;;  %v2049_v39 = vld [vmem:[#allocation13 + $0x1a0] sm:$0xff] }
 0x3de   :  { %v2052_v31 = vld [vmem:[#allocation13 + $0x1b8] sm:$0xff] }
 0x3df   :  { %6493 = vrcp.f32 %v1737_v25  ;;  %v7671_v46 = vpack.c.bf16 %v2052_v31, %v2048_v40  ;;  %v2060_v42 = vld [vmem:[#allocation13 + $0x1f8] sm:$0xff]  ;;  %v2055_v40 = vld [vmem:[#allocation13 + $0x1d0] sm:$0xff] }
 0x3e0   :  { %v6490_v29 = vpop.eup %6489  ;;  %5534 = vmatpush1.bf16.msra.mxu0 %v7636_v30  ;;  %5566 = vmatpush1.bf16.msra.mxu1 %v7638_v41  ;;  %v2039_v30 = vld [vmem:[#allocation13 + $0x150] sm:$0xff]  ;;  %v2046_v41 = vld [vmem:[#allocation13 + $0x188] sm:$0xff] }
 0x3e1   :  { %v6492_v45 = vpop.eup %6491  ;;  %v1742_v20 = vmul.f32 %v6490_v29, %v6488_v13  ;;  %5536 = vmatprep.subr.bf16.mxu0 %v7642_v37  ;;  %5568 = vmatprep.subr.bf16.mxu1 %v7644_v62  ;;  %v7665_v12 = vpack.c.bf16 %v2043_v18, %v2039_v30  ;;  %v2047_v13 = vld [vmem:[#allocation13 + $0x190] sm:$0xff]  ;;  %v7676_v18 = vpack.c.bf16 %v2049_v39, %v2045_v23  ;;  %v2053_v30 = vld [vmem:[#allocation13 + $0x1c0] sm:$0xff] }
 0x3e2   :  { %v1741_v55 = vmul.f32 %v6492_v45, %v7459_v11  ;;  %v7669_v11 = vpack.c.bf16 %v2050_v27, %v2046_v41  ;;  %v2051_v29 = vld [vmem:[#allocation13 + $0x1b0] sm:$0xff]  ;;  %v2054_v45 = vld [vmem:[#allocation13 + $0x1c8] sm:$0xff]  ;;  %v2057_v27 = vld [vmem:[#allocation13 + $0x1e0] sm:$0xff] }
 0x3e3   :  { %v7678_v25 = vpack.c.bf16 %v2051_v29, %v2047_v13  ;;  %v2059_v31 = vld [vmem:[#allocation13 + $0x1f0] sm:$0xff]  ;;  %v7688_v23 = vpack.c.bf16 %v2057_v27, %v2053_v30 }
 0x3e4   :  { %v7659_v44 = vadd.f32 %v1742_v20, %v1741_v55  ;;  %5538 = vmatpush1.bf16.msra.mxu0 %v7648_v61  ;;  %5570 = vmatpush1.bf16.msra.mxu1 %v7650_v6  ;;  %v2058_v20 = vld [vmem:[#allocation13 + $0x1e8] sm:$0xff]  ;;  %v2056_v55 = vld [vmem:[#allocation13 + $0x1d8] sm:$0xff]  ;;  %v7690_v39 = vpack.c.bf16 %v2059_v31, %v2055_v40 }
 0x3e5   :  { %5540 = vmatprep.subr.bf16.mxu0 %v7654_v38  ;;  %5572 = vmatprep.subr.bf16.mxu1 %v7656_v19  ;;  %v7682_v41 = vpack.c.bf16 %v2058_v20, %v2054_v45  ;;  %v7684_v63 = vpack.c.bf16 %v2060_v42, %v2056_v55  ;;  %v8699_v42 = vld [vmem:[#allocation34_spill] sm:$0xff] }
 0x3e6   :  { %6495 = vtanh.f32 %v7659_v44 }
 0x3e8   :  { %5542 = vmatpush1.bf16.msra.mxu0 %v7663_v0  ;;  %5574 = vmatpush1.bf16.msra.mxu1 %v7665_v12 }
 0x3e9   :  { %5544 = vmatprep.subr.bf16.mxu0 %v7669_v11  ;;  %5576 = vmatprep.subr.bf16.mxu1 %v7671_v46  ;;  %v6494_v13 = vpop.eup %6493 }
 0x3ec   :  { %5546 = vmatpush1.bf16.msra.mxu0 %v7676_v18  ;;  %5578 = vmatpush1.bf16.msra.mxu1 %v7678_v25 }
 0x3ed   :  { %5548 = vmatprep.subr.bf16.mxu0 %v7682_v41  ;;  %5580 = vmatprep.subr.bf16.mxu1 %v7684_v63 }
 0x3f0   :  { %v6496_v29 = vpop.eup %6495  ;;  %5550 = vmatpush1.bf16.msra.mxu0 %v7688_v23  ;;  %5582 = vmatpush1.bf16.msra.mxu1 %v7690_v39 }
 0x3f1   :  { %v7696_v45 = vmul.f32 %v6496_v29, %v6494_v13  ;;  %5584 = vmatprep.subr.bf16.mxu0 %v7482_v50  ;;  %5616 = vmatprep.subr.bf16.mxu1 %v7484_v17 }
 0x3f3   :  { %8692 = vst [vmem:[#allocation53_spill] sm:$0xff] %v7696_v45  ;;  %2126 = vmatmul.mubr.f32.vlgmr.msra.gmra.mrb[10].mxu0 %v7696_v45  ;;  %2197 = vmatmul.mubr.f32.vlgmr.msra.gmra.mrb[42].mxu1 %v7696_v45 }
 0x3f4   :  { %5586 = vmatpush1.bf16.msra.mxu0 %v7486_v47  ;;  %5618 = vmatpush1.bf16.msra.mxu1 %v7489_v10 }
 0x3f5   :  { %5588 = vmatprep.subr.bf16.mxu0 %v7494_v36  ;;  %5620 = vmatprep.subr.bf16.mxu1 %v7496_v28  ;;  %v8693_v28 = vld [vmem:[#allocation19_spill] sm:$0xff] }
 0x3f6   :  { %2368 = vmatprep.mubr.f32.mxu0 %v8674_v2  ;;  %2439 = vmatprep.mubr.f32.mxu1 %v8674_v2 }
 0x3f8   :  { %5590 = vmatpush1.bf16.msra.mxu0 %v7498_v33  ;;  %5622 = vmatpush1.bf16.msra.mxu1 %v7501_v14 }
 0x3f9   :  { %5592 = vmatprep.subr.bf16.mxu0 %v7506_v51  ;;  %5624 = vmatprep.subr.bf16.mxu1 %v7508_v52  ;;  %v8694_v52 = vld [vmem:[#allocation31_spill] sm:$0xff] }
 0x3fc   :  { %5594 = vmatpush1.bf16.msra.mxu0 %v7510_v56  ;;  %5626 = vmatpush1.bf16.msra.mxu1 %v7513_v57 }
 0x3fd   :  { %5596 = vmatprep.subr.bf16.mxu0 %v7518_v43  ;;  %5628 = vmatprep.subr.bf16.mxu1 %v7520_v22  ;;  %v8695_v43 = vld [vmem:[#allocation30_spill] sm:$0xff] }
 0x400   :  { %5598 = vmatpush1.bf16.msra.mxu0 %v7522_v35  ;;  %5630 = vmatpush1.bf16.msra.mxu1 %v7525_v54 }
 0x401   :  { %5600 = vmatprep.subr.bf16.mxu0 %v7530_v7  ;;  %5632 = vmatprep.subr.bf16.mxu1 %v7532_v53 }
 0x404   :  { %5602 = vmatpush1.bf16.msra.mxu0 %v7534_v60  ;;  %5634 = vmatpush1.bf16.msra.mxu1 %v7537_v15 }
 0x405   :  { %5604 = vmatprep.subr.bf16.mxu0 %v7542_v48  ;;  %5636 = vmatprep.subr.bf16.mxu1 %v7544_v24 }
 0x408   :  { %5606 = vmatpush1.bf16.msra.mxu0 %v7546_v58  ;;  %5638 = vmatpush1.bf16.msra.mxu1 %v7549_v4  ;;  %v8696_v4 = vld [vmem:[#allocation37_spill] sm:$0xff] }
 0x409   :  { %5608 = vmatprep.subr.bf16.mxu0 %v7554_v49  ;;  %5640 = vmatprep.subr.bf16.mxu1 %v7556_v26 }
 0x40c   :  { %5610 = vmatpush1.bf16.msra.mxu0 %v7558_v8  ;;  %5642 = vmatpush1.bf16.msra.mxu1 %v7561_v9 }
 0x40d   :  { %5612 = vmatprep.subr.bf16.mxu0 %v7566_v21  ;;  %5644 = vmatprep.subr.bf16.mxu1 %v7568_v3  ;;  %v8697_v21 = vld [vmem:[#allocation33_spill] sm:$0xff] }
 0x410   :  { %5614 = vmatpush1.bf16.msra.mxu0 %v7570_v16  ;;  %5646 = vmatpush1.bf16.msra.mxu1 %v7573_v59 }
 0x411   :  { %5648 = vmatprep.subr.bf16.mxu0 %v7578_v5  ;;  %5680 = vmatprep.subr.bf16.mxu1 %v7580_v1  ;;  %v8698_v5 = vld [vmem:[#allocation32_spill] sm:$0xff] }
 0x4a6   :  { %v1884_v50 = vpop.f32.mrb[20].mxu0  ;;  %v1955_v17 = vpop.f32.mrb[20].mxu1 }
 0x4a7   :  { %v1960_v47 = vadd.f32 %v1884_v50, %v7385_v34  ;;  %v1886_v10 = vpop.f32.mrb[21].mxu0  ;;  %v1957_v36 = vpop.f32.mrb[21].mxu1  ;;  %v6323_v22 = vadd.f32 %v1955_v17, %v8695_v43 }
 0x4a8   :  { %v1961_v33 = vadd.f32 %v1886_v10, %v8693_v28  ;;  %v6324_v56 = vadd.f32 %v1957_v36, %v8694_v52  ;;  %v8701_v10 = vld [vmem:[#allocation38_spill] sm:$0xff]  ;;  %v8702_v36 = vld [vmem:[#allocation39_spill] sm:$0xff] }
 0x4a9   :  { %v5010_v14 = vmul.f32 -1.442695, %v1960_v47 }
 0x4aa   :  { %v5011_v51 = vmul.f32 -1.442695, %v1961_v33  ;;  %v5012_v57 = vmul.f32 -1.442695, %v6324_v56  ;;  %v8703_v33 = vld [vmem:[#allocation41_spill] sm:$0xff]  ;;  %v8706_v56 = vld [vmem:[#allocation44_spill] sm:$0xff] }
 0x4ab   :  { %6497 = vpow2.f32 %v5010_v14  ;;  %v8704_v14 = vld [vmem:[#allocation42_spill] sm:$0xff] }
 0x4ac   :  { %6499 = vpow2.f32 %v5011_v51  ;;  %v8705_v51 = vld [vmem:[#allocation43_spill] sm:$0xff] }
 0x4ad   :  { %6501 = vpow2.f32 %v5012_v57  ;;  %v8707_v57 = vld [vmem:[#allocation45_spill] sm:$0xff] }
 0x4ae   :  { %6503 = vtanh.f32 %v6323_v22  ;;  %v8708_v22 = vld [vmem:[#allocation46_spill] sm:$0xff] }
 0x4b5   :  { %v6498_v35 = vpop.eup %6497 }
 0x4b6   :  { %v6500_v54 = vpop.eup %6499  ;;  %v1967_v7 = vadd.f32 1.0, %v6498_v35  ;;  %v8709_v35 = vld [vmem:[#allocation47_spill] sm:$0xff] }
 0x4b7   :  { %v1973_v53 = vadd.f32 1.0, %v6500_v54  ;;  %v6502_v34 = vpop.eup %6501  ;;  %v8710_v54 = vld [vmem:[#allocation48_spill] sm:$0xff] }
 0x4b8   :  { %6505 = vrcp.f32 %v1967_v7  ;;  %v6504_v60 = vpop.eup %6503  ;;  %v1980_v58 = vadd.f32 1.0, %v6502_v34  ;;  %v8711_v7 = vld [vmem:[#allocation49_spill] sm:$0xff] }
 0x4b9   :  { %6507 = vrcp.f32 %v1973_v53  ;;  %v8712_v53 = vld [vmem:[#allocation50_spill] sm:$0xff] }
 0x4ba   :  { %6509 = vrcp.f32 %v1980_v58 }
 0x4c2   :  { %v6506_v15 = vpop.eup %6505 }
 0x4c3   :  { %v6508_v48 = vpop.eup %6507  ;;  %v1985_v24 = vmul.f32 %v6506_v15, %v6504_v60 }
 0x4c4   :  { %v1984_v49 = vmul.f32 %v6508_v48, %v8696_v4  ;;  %v6510_v27 = vpop.eup %6509  ;;  %v8713_v48 = vld [vmem:[#allocation51_spill] sm:$0xff] }
 0x4c6   :  { %v7741_v26 = vadd.f32 %v1985_v24, %v1984_v49  ;;  %v2127_v8 = vpop.f32.mrb[10].mxu0  ;;  %v2198_v9 = vpop.f32.mrb[42].mxu1  ;;  %v8714_v24 = vld [vmem:[#allocation52_spill] sm:$0xff] }
 0x4c7   :  { %v6345_v3 = vadd.f32 %v2127_v8, %v8697_v21  ;;  %v2129_v16 = vpop.f32.mrb[11].mxu0  ;;  %v2200_v59 = vpop.f32.mrb[43].mxu1  ;;  %v6361_v13 = vadd.f32 %v2198_v9, %v7431_v32 }
 0x4c8   :  { %v6346_v1 = vadd.f32 %v2129_v16, %v8698_v5  ;;  %6511 = vtanh.f32 %v7741_v26  ;;  %v6362_v30 = vadd.f32 %v2200_v59, %v8699_v42  ;;  %v2741_v59 = vld [vmem:[#allocation10 + $0x78] sm:$0xff] }
 0x4c9   :  { %v5013_v20 = vmul.f32 -1.442695, %v6345_v3  ;;  %v2737_v3 = vld [vmem:[#allocation10 + $0x58] sm:$0xff] }
 0x4ca   :  { %v5014_v55 = vmul.f32 -1.442695, %v6346_v1  ;;  %v5015_v31 = vmul.f32 -1.442695, %v6362_v30  ;;  %v2734_v1 = vld [vmem:[#allocation10 + $0x40] sm:$0xff] }
 0x4cb   :  { %6513 = vpow2.f32 %v5013_v20  ;;  %v2738_v20 = vld [vmem:[#allocation10 + $0x60] sm:$0xff] }
 0x4cc   :  { %6515 = vpow2.f32 %v5014_v55  ;;  %v7808_v55 = vpack.c.bf16 %v2741_v59, %v2737_v3  ;;  %v7810_v30 = vpack.c.bf16 %v2738_v20, %v2734_v1  ;;  %v2769_v3 = vld [vmem:[#allocation10 + $0x158] sm:$0xff]  ;;  %v2766_v20 = vld [vmem:[#allocation10 + $0x140] sm:$0xff] }
 0x4cd   :  { %6517 = vpow2.f32 %v5015_v31  ;;  %v2773_v1 = vld [vmem:[#allocation10 + $0x178] sm:$0xff] }
 0x4ce   :  { %6519 = vtanh.f32 %v6361_v13  ;;  %v2743_v13 = vld [vmem:[#allocation10 + $0x88] sm:$0xff] }
 0x4d2   :  { %v6512_v40 = vpop.eup %6511 }
 0x4d3   :  { %v7748_v29 = vmul.f32 %v6512_v40, %v6510_v27  ;;  %v2736_v27 = vld [vmem:[#allocation10 + $0x50] sm:$0xff] }
 0x4d4   :  { %v2740_v40 = vld [vmem:[#allocation10 + $0x70] sm:$0xff] }
 0x4d5   :  { %8700 = vst [vmem:[#allocation19_spill] sm:$0xff] %v7748_v29  ;;  %v6514_v50 = vpop.eup %6513  ;;  %2369 = vmatmul.mubr.f32.vlgmr.msra.gmra.mrb[22].mxu0 %v7748_v29  ;;  %2440 = vmatmul.mubr.f32.vlgmr.msra.gmra.mrb[22].mxu1 %v7748_v29  ;;  %v7813_v31 = vpack.c.bf16 %v2740_v40, %v2736_v27  ;;  %v2770_v27 = vld [vmem:[#allocation10 + $0x160] sm:$0xff]  ;;  %v7856_v40 = vpack.c.bf16 %v2773_v1, %v2769_v3  ;;  %v2788_v3 = vld [vmem:[#allocation10 + $0x1f0] sm:$0xff] }
 0x4d6   :  { %v6516_v17 = vpop.eup %6515  ;;  %v2210_v47 = vadd.f32 1.0, %v6514_v50  ;;  %5650 = vmatpush1.bf16.msra.mxu0 %v8701_v10  ;;  %5682 = vmatpush1.bf16.msra.mxu1 %v8702_v36  ;;  %v2747_v50 = vld [vmem:[#allocation10 + $0xa8] sm:$0xff]  ;;  %v2749_v10 = vld [vmem:[#allocation10 + $0xb8] sm:$0xff]  ;;  %v2742_v36 = vld [vmem:[#allocation10 + $0x80] sm:$0xff] }
 0x4d7   :  { %v2216_v28 = vadd.f32 1.0, %v6516_v17  ;;  %5652 = vmatprep.subr.bf16.mxu0 %v8703_v33  ;;  %5684 = vmatprep.subr.bf16.mxu1 %v8704_v14  ;;  %v6518_v34 = vpop.eup %6517  ;;  %v2745_v17 = vld [vmem:[#allocation10 + $0x98] sm:$0xff] }
 0x4d8   :  { %6521 = vrcp.f32 %v2210_v47  ;;  %2611 = vmatprep.mubr.f32.mxu0 %v8674_v2  ;;  %2682 = vmatprep.mubr.f32.mxu1 %v8674_v2  ;;  %v6520_v60 = vpop.eup %6519  ;;  %v2223_v49 = vadd.f32 1.0, %v6518_v34  ;;  %v7818_v47 = vpack.c.bf16 %v2747_v50, %v2743_v13  ;;  %v7820_v33 = vpack.c.bf16 %v2749_v10, %v2745_v17  ;;  %v2750_v34 = vld [vmem:[#allocation10 + $0xc0] sm:$0xff]  ;;  %v2768_v50 = vld [vmem:[#allocation10 + $0x150] sm:$0xff] }
 0x4d9   :  { %6523 = vrcp.f32 %v2216_v28  ;;  %v2746_v28 = vld [vmem:[#allocation10 + $0xa0] sm:$0xff]  ;;  %v7858_v13 = vpack.c.bf16 %v2770_v27, %v2766_v20  ;;  %v2772_v17 = vld [vmem:[#allocation10 + $0x170] sm:$0xff]  ;;  %v2970_v20 = vld [vmem:[#allocation13 + $0x8] sm:$0xff] }
 0x4da   :  { %5654 = vmatpush1.bf16.msra.mxu0 %v8705_v51  ;;  %5686 = vmatpush1.bf16.msra.mxu1 %v8706_v56  ;;  %6525 = vrcp.f32 %v2223_v49  ;;  %v7822_v14 = vpack.c.bf16 %v2746_v28, %v2742_v36  ;;  %v2744_v51 = vld [vmem:[#allocation10 + $0x90] sm:$0xff]  ;;  %v2759_v49 = vld [vmem:[#allocation10 + $0x108] sm:$0xff]  ;;  %v7861_v10 = vpack.c.bf16 %v2772_v17, %v2768_v50  ;;  %v2972_v50 = vld [vmem:[#allocation13 + $0x18] sm:$0xff] }
 0x4db   :  { %5656 = vmatprep.subr.bf16.mxu0 %v8707_v57  ;;  %5688 = vmatprep.subr.bf16.mxu1 %v8708_v22  ;;  %v2748_v56 = vld [vmem:[#allocation10 + $0xb0] sm:$0xff]  ;;  %v2751_v22 = vld [vmem:[#allocation10 + $0xc8] sm:$0xff] }
 0x4dc   :  { %v7825_v57 = vpack.c.bf16 %v2748_v56, %v2744_v51  ;;  %v2775_v36 = vld [vmem:[#allocation10 + $0x188] sm:$0xff]  ;;  %v2777_v51 = vld [vmem:[#allocation10 + $0x198] sm:$0xff] }
 0x4dd   :  { %v2779_v28 = vld [vmem:[#allocation10 + $0x1a8] sm:$0xff] }
 0x4de   :  { %5658 = vmatpush1.bf16.msra.mxu0 %v8709_v35  ;;  %5690 = vmatpush1.bf16.msra.mxu1 %v8710_v54  ;;  %v2755_v35 = vld [vmem:[#allocation10 + $0xe8] sm:$0xff]  ;;  %v2753_v54 = vld [vmem:[#allocation10 + $0xd8] sm:$0xff]  ;;  %v7866_v56 = vpack.c.bf16 %v2779_v28, %v2775_v36 }
 0x4df   :  { %5660 = vmatprep.subr.bf16.mxu0 %v8711_v7  ;;  %5692 = vmatprep.subr.bf16.mxu1 %v8712_v53  ;;  %v7830_v7 = vpack.c.bf16 %v2755_v35, %v2751_v22  ;;  %v2757_v53 = vld [vmem:[#allocation10 + $0xf8] sm:$0xff]  ;;  %v2774_v35 = vld [vmem:[#allocation10 + $0x180] sm:$0xff]  ;;  %v2974_v27 = vld [vmem:[#allocation13 + $0x28] sm:$0xff] }
 0x4e0   :  { %v2781_v22 = vld [vmem:[#allocation10 + $0x1b8] sm:$0xff]  ;;  %v7890_v17 = vpack.c.bf16 %v2974_v27, %v2970_v20 }
 0x4e1   :  { %v2976_v36 = vld [vmem:[#allocation13 + $0x38] sm:$0xff] }
 0x4e2   :  { %v6522_v15 = vpop.eup %6521  ;;  %5662 = vmatpush1.bf16.msra.mxu0 %v8713_v48  ;;  %5694 = vmatpush1.bf16.msra.mxu1 %v8714_v24  ;;  %v2752_v24 = vld [vmem:[#allocation10 + $0xd0] sm:$0xff]  ;;  %v7892_v28 = vpack.c.bf16 %v2976_v36, %v2972_v50 }
 0x4e3   :  { %v6524_v58 = vpop.eup %6523  ;;  %v2228_v4 = vmul.f32 %v6522_v15, %v6520_v60  ;;  %5664 = vmatprep.subr.bf16.mxu0 %v7642_v37  ;;  %5696 = vmatprep.subr.bf16.mxu1 %v7644_v62  ;;  %v2731_v37 = vld [vmem:[#allocation10 + $0x28] sm:$0xff]  ;;  %v2729_v62 = vld [vmem:[#allocation10 + $0x18] sm:$0xff]  ;;  %v2754_v60 = vld [vmem:[#allocation10 + $0xe0] sm:$0xff]  ;;  %v7832_v15 = vpack.c.bf16 %v2757_v53, %v2753_v54  ;;  %v7868_v53 = vpack.c.bf16 %v2781_v22, %v2777_v51 }
 0x4e4   :  { %v2227_v8 = vmul.f32 %v6524_v58, %v7659_v44  ;;  %v7834_v48 = vpack.c.bf16 %v2754_v60, %v2750_v34  ;;  %v2756_v58 = vld [vmem:[#allocation10 + $0xf0] sm:$0xff]  ;;  %v2778_v54 = vld [vmem:[#allocation10 + $0x1a0] sm:$0xff] }
 0x4e5   :  { %v7870_v34 = vpack.c.bf16 %v2778_v54, %v2774_v35  ;;  %v2776_v60 = vld [vmem:[#allocation10 + $0x190] sm:$0xff]  ;;  %v8716_v35 = vld [vmem:[#allocation20_spill] sm:$0xff] }
 0x4e6   :  { %v7771_v9 = vadd.f32 %v2228_v4, %v2227_v8  ;;  %5666 = vmatpush1.bf16.msra.mxu0 %v7648_v61  ;;  %5698 = vmatpush1.bf16.msra.mxu1 %v7650_v6  ;;  %v2727_v6 = vld [vmem:[#allocation10 + $0x8] sm:$0xff]  ;;  %v7837_v4 = vpack.c.bf16 %v2756_v58, %v2752_v24  ;;  %v2780_v24 = vld [vmem:[#allocation10 + $0x1b0] sm:$0xff] }
 0x4e7   :  { %5668 = vmatprep.subr.bf16.mxu0 %v7654_v38  ;;  %5700 = vmatprep.subr.bf16.mxu1 %v7656_v19  ;;  %v6526_v38 = vpop.eup %6525  ;;  %v7794_v61 = vpack.c.bf16 %v2731_v37, %v2727_v6  ;;  %v2763_v8 = vld [vmem:[#allocation10 + $0x128] sm:$0xff]  ;;  %v2765_v6 = vld [vmem:[#allocation10 + $0x138] sm:$0xff]  ;;  %v2758_v37 = vld [vmem:[#allocation10 + $0x100] sm:$0xff]  ;;  %v7873_v58 = vpack.c.bf16 %v2780_v24, %v2776_v60 }
 0x4e8   :  { %6527 = vtanh.f32 %v7771_v9 }
 0x4ea   :  { %5670 = vmatpush1.bf16.msra.mxu0 %v7663_v0  ;;  %5702 = vmatpush1.bf16.msra.mxu1 %v7665_v12  ;;  %v2733_v0 = vld [vmem:[#allocation10 + $0x38] sm:$0xff]  ;;  %v2726_v12 = vld [vmem:[#allocation10] sm:$0xff] }
 0x4eb   :  { %5672 = vmatprep.subr.bf16.mxu0 %v7669_v11  ;;  %5704 = vmatprep.subr.bf16.mxu1 %v7671_v46  ;;  %v2730_v11 = vld [vmem:[#allocation10 + $0x20] sm:$0xff]  ;;  %v7796_v46 = vpack.c.bf16 %v2733_v0, %v2729_v62 }
 0x4ec   :  { %v2762_v62 = vld [vmem:[#allocation10 + $0x120] sm:$0xff] }
 0x4ee   :  { %5674 = vmatpush1.bf16.msra.mxu0 %v7676_v18  ;;  %5706 = vmatpush1.bf16.msra.mxu1 %v7678_v25  ;;  %v7798_v18 = vpack.c.bf16 %v2730_v11, %v2726_v12  ;;  %v2728_v25 = vld [vmem:[#allocation10 + $0x10] sm:$0xff]  ;;  %v7846_v12 = vpack.c.bf16 %v2762_v62, %v2758_v37  ;;  %v2789_v37 = vld [vmem:[#allocation10 + $0x1f8] sm:$0xff]  ;;  %v2782_v62 = vld [vmem:[#allocation10 + $0x1c0] sm:$0xff] }
 0x4ef   :  { %5676 = vmatprep.subr.bf16.mxu0 %v7682_v41  ;;  %5708 = vmatprep.subr.bf16.mxu1 %v7684_v63  ;;  %v2732_v41 = vld [vmem:[#allocation10 + $0x30] sm:$0xff] }
 0x4f0   :  { %v7801_v63 = vpack.c.bf16 %v2732_v41, %v2728_v25  ;;  %v2760_v11 = vld [vmem:[#allocation10 + $0x110] sm:$0xff] }
 0x4f1   :  { %v2764_v25 = vld [vmem:[#allocation10 + $0x130] sm:$0xff] }
 0x4f2   :  { %v6528_v44 = vpop.eup %6527  ;;  %5678 = vmatpush1.bf16.msra.mxu0 %v7688_v23  ;;  %5710 = vmatpush1.bf16.msra.mxu1 %v7690_v39  ;;  %v2735_v23 = vld [vmem:[#allocation10 + $0x48] sm:$0xff]  ;;  %v7849_v41 = vpack.c.bf16 %v2764_v25, %v2760_v11  ;;  %v2786_v11 = vld [vmem:[#allocation10 + $0x1e0] sm:$0xff] }
 0x4f3   :  { %v7788_v19 = vmul.f32 %v6528_v44, %v6526_v38  ;;  %5712 = vmatprep.subr.bf16.mxu0 %v7794_v61  ;;  %5744 = vmatprep.subr.bf16.mxu1 %v7796_v46  ;;  %v2739_v39 = vld [vmem:[#allocation10 + $0x68] sm:$0xff]  ;;  %v2761_v38 = vld [vmem:[#allocation10 + $0x118] sm:$0xff]  ;;  %v7842_v44 = vpack.c.bf16 %v2763_v8, %v2759_v49 }
 0x4f4   :  { %v7806_v16 = vpack.c.bf16 %v2739_v39, %v2735_v23  ;;  %v7844_v0 = vpack.c.bf16 %v2765_v6, %v2761_v38  ;;  %v2767_v23 = vld [vmem:[#allocation10 + $0x148] sm:$0xff]  ;;  %v2785_v38 = vld [vmem:[#allocation10 + $0x1d8] sm:$0xff] }
 0x4f5   :  { %8715 = vst [vmem:[#allocation31_spill] sm:$0xff] %v7788_v19  ;;  %2612 = vmatmul.mubr.f32.vlgmr.msra.gmra.mrb[8].mxu0 %v7788_v19  ;;  %2683 = vmatmul.mubr.f32.vlgmr.msra.gmra.mrb[40].mxu1 %v7788_v19  ;;  %v2771_v39 = vld [vmem:[#allocation10 + $0x168] sm:$0xff]  ;;  %v7880_v25 = vpack.c.bf16 %v2789_v37, %v2785_v38 }
 0x4f6   :  { %2854 = vmatprep.mubr.f32.mxu0 %v8674_v2  ;;  %2925 = vmatprep.mubr.f32.mxu1 %v8674_v2  ;;  %v7854_v59 = vpack.c.bf16 %v2771_v39, %v2767_v23  ;;  %v2783_v49 = vld [vmem:[#allocation10 + $0x1c8] sm:$0xff]  ;;  %v7882_v23 = vpack.c.bf16 %v2786_v11, %v2782_v62  ;;  %v2784_v39 = vld [vmem:[#allocation10 + $0x1d0] sm:$0xff] }
 0x4f7   :  { %5714 = vmatpush1.bf16.msra.mxu0 %v7798_v18  ;;  %5746 = vmatpush1.bf16.msra.mxu1 %v7801_v63  ;;  %v2787_v8 = vld [vmem:[#allocation10 + $0x1e8] sm:$0xff]  ;;  %v7885_v1 = vpack.c.bf16 %v2788_v3, %v2784_v39 }
 0x4f8   :  { %5716 = vmatprep.subr.bf16.mxu0 %v7806_v16  ;;  %5748 = vmatprep.subr.bf16.mxu1 %v7808_v55  ;;  %v7878_v6 = vpack.c.bf16 %v2787_v8, %v2783_v49  ;;  %v8717_v49 = vld [vmem:[#allocation21_spill] sm:$0xff] }
 0x4fb   :  { %5718 = vmatpush1.bf16.msra.mxu0 %v7810_v30  ;;  %5750 = vmatpush1.bf16.msra.mxu1 %v7813_v31 }
 0x4fc   :  { %5720 = vmatprep.subr.bf16.mxu0 %v7818_v47  ;;  %5752 = vmatprep.subr.bf16.mxu1 %v7820_v33 }
 0x4ff   :  { %5722 = vmatpush1.bf16.msra.mxu0 %v7822_v14  ;;  %5754 = vmatpush1.bf16.msra.mxu1 %v7825_v57 }
 0x500   :  { %5724 = vmatprep.subr.bf16.mxu0 %v7830_v7  ;;  %5756 = vmatprep.subr.bf16.mxu1 %v7832_v15 }
 0x503   :  { %5726 = vmatpush1.bf16.msra.mxu0 %v7834_v48  ;;  %5758 = vmatpush1.bf16.msra.mxu1 %v7837_v4 }
 0x504   :  { %5728 = vmatprep.subr.bf16.mxu0 %v7842_v44  ;;  %5760 = vmatprep.subr.bf16.mxu1 %v7844_v0 }
 0x507   :  { %5730 = vmatpush1.bf16.msra.mxu0 %v7846_v12  ;;  %5762 = vmatpush1.bf16.msra.mxu1 %v7849_v41 }
 0x508   :  { %5732 = vmatprep.subr.bf16.mxu0 %v7854_v59  ;;  %5764 = vmatprep.subr.bf16.mxu1 %v7856_v40 }
 0x50b   :  { %5734 = vmatpush1.bf16.msra.mxu0 %v7858_v13  ;;  %5766 = vmatpush1.bf16.msra.mxu1 %v7861_v10 }
 0x50c   :  { %5736 = vmatprep.subr.bf16.mxu0 %v7866_v56  ;;  %5768 = vmatprep.subr.bf16.mxu1 %v7868_v53 }
 0x50f   :  { %5738 = vmatpush1.bf16.msra.mxu0 %v7870_v34  ;;  %5770 = vmatpush1.bf16.msra.mxu1 %v7873_v58 }
 0x510   :  { %5740 = vmatprep.subr.bf16.mxu0 %v7878_v6  ;;  %5772 = vmatprep.subr.bf16.mxu1 %v7880_v25 }
 0x513   :  { %5742 = vmatpush1.bf16.msra.mxu0 %v7882_v23  ;;  %5774 = vmatpush1.bf16.msra.mxu1 %v7885_v1 }
 0x514   :  { %5776 = vmatprep.subr.bf16.mxu0 %v7890_v17  ;;  %5808 = vmatprep.subr.bf16.mxu1 %v7892_v28 }
 0x5a8   :  { %v2370_v51 = vpop.f32.mrb[22].mxu0  ;;  %v2441_v22 = vpop.f32.mrb[22].mxu1 }
 0x5a9   :  { %v2446_v54 = vadd.f32 %v2370_v51, %v8716_v35  ;;  %v2372_v60 = vpop.f32.mrb[23].mxu0  ;;  %v2443_v24 = vpop.f32.mrb[23].mxu1  ;;  %v6325_v39 = vadd.f32 %v2441_v22, %v8695_v43  ;;  %v2988_v43 = vld [vmem:[#allocation13 + $0x98] sm:$0xff] }
 0x5aa   :  { %v2447_v8 = vadd.f32 %v2372_v60, %v8717_v49  ;;  %v6326_v62 = vadd.f32 %v2443_v24, %v8694_v52 }
 0x5ab   :  { %v5016_v38 = vmul.f32 -1.442695, %v2446_v54 }
 0x5ac   :  { %v5017_v37 = vmul.f32 -1.442695, %v2447_v8  ;;  %v5018_v11 = vmul.f32 -1.442695, %v6326_v62 }
 0x5ad   :  { %6529 = vpow2.f32 %v5016_v38 }
 0x5ae   :  { %6531 = vpow2.f32 %v5017_v37 }
 0x5af   :  { %6533 = vpow2.f32 %v5018_v11 }
 0x5b0   :  { %6535 = vtanh.f32 %v6325_v39 }
 0x5b7   :  { %v6530_v3 = vpop.eup %6529 }
 0x5b8   :  { %v6532_v20 = vpop.eup %6531  ;;  %v2453_v27 = vadd.f32 1.0, %v6530_v3 }
 0x5b9   :  { %v2459_v50 = vadd.f32 1.0, %v6532_v20  ;;  %v6534_v36 = vpop.eup %6533 }
 0x5ba   :  { %6537 = vrcp.f32 %v2453_v27  ;;  %v6536_v51 = vpop.eup %6535  ;;  %v2466_v49 = vadd.f32 1.0, %v6534_v36  ;;  %v2971_v36 = vld [vmem:[#allocation13 + $0x10] sm:$0xff] }
 0x5bb   :  { %6539 = vrcp.f32 %v2459_v50  ;;  %v2973_v50 = vld [vmem:[#allocation13 + $0x20] sm:$0xff] }
 0x5bc   :  { %6541 = vrcp.f32 %v2466_v49  ;;  %v2984_v49 = vld [vmem:[#allocation13 + $0x78] sm:$0xff] }
 0x5c4   :  { %v6538_v35 = vpop.eup %6537 }
 0x5c5   :  { %v6540_v54 = vpop.eup %6539  ;;  %v2471_v60 = vmul.f32 %v6538_v35, %v6536_v51  ;;  %v2975_v51 = vld [vmem:[#allocation13 + $0x30] sm:$0xff]  ;;  %v2978_v35 = vld [vmem:[#allocation13 + $0x48] sm:$0xff] }
 0x5c6   :  { %v2470_v8 = vmul.f32 %v6540_v54, %v7741_v26  ;;  %v2969_v26 = vld [vmem:[#allocation13] sm:$0xff]  ;;  %v2982_v54 = vld [vmem:[#allocation13 + $0x68] sm:$0xff]  ;;  %v7909_v45 = vpack.c.bf16 %v2975_v51, %v2971_v36 }
 0x5c8   :  { %v7901_v24 = vadd.f32 %v2471_v60, %v2470_v8  ;;  %v2613_v38 = vpop.f32.mrb[8].mxu0  ;;  %v2684_v22 = vpop.f32.mrb[40].mxu1  ;;  %v2980_v60 = vld [vmem:[#allocation13 + $0x58] sm:$0xff]  ;;  %8720 = vst [vmem:[#allocation39_spill] sm:$0xff] %v7909_v45 }
 0x5c9   :  { %v6343_v37 = vadd.f32 %v2613_v38, %v8697_v21  ;;  %v2615_v62 = vpop.f32.mrb[9].mxu0  ;;  %v2686_v11 = vpop.f32.mrb[41].mxu1  ;;  %v7916_v19 = vpack.c.bf16 %v2984_v49, %v2980_v60  ;;  %v2986_v21 = vld [vmem:[#allocation13 + $0x88] sm:$0xff] }
 0x5ca   :  { %8718 = vst [vmem:[#allocation37_spill] sm:$0xff] %v7901_v24  ;;  %v6344_v39 = vadd.f32 %v2615_v62, %v8698_v5  ;;  %6543 = vtanh.f32 %v7901_v24  ;;  %v6360_v27 = vadd.f32 %v2686_v11, %v8699_v42  ;;  %v6542_v8 = vpop.eup %6541  ;;  %v7907_v62 = vpack.c.bf16 %v2973_v50, %v2969_v26  ;;  %v2979_v42 = vld [vmem:[#allocation13 + $0x50] sm:$0xff]  ;;  %v2990_v24 = vld [vmem:[#allocation13 + $0xa8] sm:$0xff] }
 0x5cb   :  { %v5019_v3 = vmul.f32 -1.442695, %v6343_v37  ;;  %v2977_v37 = vld [vmem:[#allocation13 + $0x40] sm:$0xff]  ;;  %8723 = vst [vmem:[#allocation43_spill] sm:$0xff] %v7916_v19  ;;  %v2983_v5 = vld [vmem:[#allocation13 + $0x70] sm:$0xff]  ;;  %v7928_v49 = vpack.c.bf16 %v2990_v24, %v2986_v21 }
 0x5cc   :  { %v5020_v20 = vmul.f32 -1.442695, %v6344_v39  ;;  %v5021_v29 = vmul.f32 -1.442695, %v6360_v27  ;;  %8719 = vst [vmem:[#allocation38_spill] sm:$0xff] %v7907_v62  ;;  %v2981_v39 = vld [vmem:[#allocation13 + $0x60] sm:$0xff]  ;;  %v7924_v51 = vpack.c.bf16 %v2983_v5, %v2979_v42 }
 0x5cd   :  { %6545 = vpow2.f32 %v5019_v3  ;;  %v6359_v3 = vadd.f32 %v2684_v22, %v7431_v32  ;;  %v2992_v27 = vld [vmem:[#allocation13 + $0xb8] sm:$0xff]  ;;  %v7922_v22 = vpack.c.bf16 %v2981_v39, %v2977_v37  ;;  %8726 = vst [vmem:[#allocation46_spill] sm:$0xff] %v7928_v49  ;;  %v2998_v37 = vld [vmem:[#allocation13 + $0xe8] sm:$0xff]  ;;  %v2993_v42 = vld [vmem:[#allocation13 + $0xc0] sm:$0xff] }
 0x5ce   :  { %6547 = vpow2.f32 %v5020_v20  ;;  %v7914_v20 = vpack.c.bf16 %v2982_v54, %v2978_v35  ;;  %8725 = vst [vmem:[#allocation45_spill] sm:$0xff] %v7924_v51  ;;  %v2985_v35 = vld [vmem:[#allocation13 + $0x80] sm:$0xff]  ;;  %v2996_v39 = vld [vmem:[#allocation13 + $0xd8] sm:$0xff] }
 0x5cf   :  { %6549 = vpow2.f32 %v5021_v29  ;;  %8724 = vst [vmem:[#allocation44_spill] sm:$0xff] %v7922_v22  ;;  %v2989_v54 = vld [vmem:[#allocation13 + $0xa0] sm:$0xff]  ;;  %v2987_v29 = vld [vmem:[#allocation13 + $0x90] sm:$0xff]  ;;  %v3000_v5 = vld [vmem:[#allocation13 + $0xf8] sm:$0xff] }
 0x5d0   :  { %8722 = vst [vmem:[#allocation42_spill] sm:$0xff] %v7914_v20  ;;  %6551 = vtanh.f32 %v6359_v3  ;;  %v7936_v21 = vpack.c.bf16 %v2989_v54, %v2985_v35  ;;  %v2997_v24 = vld [vmem:[#allocation13 + $0xe0] sm:$0xff] }
 0x5d1   :  { %v7948_v35 = vpack.c.bf16 %v2997_v24, %v2993_v42  ;;  %v3016_v42 = vld [vmem:[#allocation13 + $0x178] sm:$0xff] }
 0x5d2   :  { %8728 = vst [vmem:[#allocation48_spill] sm:$0xff] %v7936_v21 }
 0x5d3   :  { %8732 = vst [vmem:[#allocation52_spill] sm:$0xff] %v7948_v35 }
 0x5d4   :  { %v6544_v38 = vpop.eup %6543 }
 0x5d5   :  { %v7912_v11 = vmul.f32 %v6544_v38, %v6542_v8  ;;  %v7930_v8 = vpack.c.bf16 %v2992_v27, %v2988_v43  ;;  %v2991_v38 = vld [vmem:[#allocation13 + $0xb0] sm:$0xff]  ;;  %v7944_v27 = vpack.c.bf16 %v3000_v5, %v2996_v39 }
 0x5d6   :  { %v7938_v43 = vpack.c.bf16 %v2991_v38, %v2987_v29  ;;  %v3001_v29 = vld [vmem:[#allocation13 + $0x100] sm:$0xff]  ;;  %v3003_v39 = vld [vmem:[#allocation13 + $0x110] sm:$0xff] }
 0x5d7   :  { %8721 = vst [vmem:[#allocation41_spill] sm:$0xff] %v7912_v11  ;;  %v6546_v26 = vpop.eup %6545  ;;  %2855 = vmatmul.mubr.f32.vlgmr.msra.gmra.mrb[24].mxu0 %v7912_v11  ;;  %2926 = vmatmul.mubr.f32.vlgmr.msra.gmra.mrb[24].mxu1 %v7912_v11  ;;  %8727 = vst [vmem:[#allocation47_spill] sm:$0xff] %v7930_v8  ;;  %v3006_v11 = vld [vmem:[#allocation13 + $0x128] sm:$0xff]  ;;  %v3005_v38 = vld [vmem:[#allocation13 + $0x120] sm:$0xff] }
 0x5d8   :  { %v6548_v50 = vpop.eup %6547  ;;  %v2696_v36 = vadd.f32 1.0, %v6546_v26  ;;  %5778 = vmatpush1.bf16.msra.mxu0 %v7907_v62  ;;  %5810 = vmatpush1.bf16.msra.mxu1 %v7909_v45  ;;  %v2994_v26 = vld [vmem:[#allocation13 + $0xc8] sm:$0xff]  ;;  %8729 = vst [vmem:[#allocation49_spill] sm:$0xff] %v7938_v43  ;;  %8731 = vst [vmem:[#allocation51_spill] sm:$0xff] %v7944_v27  ;;  %v3007_v5 = vld [vmem:[#allocation13 + $0x130] sm:$0xff] }
 0x5d9   :  { %v2702_v60 = vadd.f32 1.0, %v6548_v50  ;;  %5780 = vmatprep.subr.bf16.mxu0 %v7914_v20  ;;  %5812 = vmatprep.subr.bf16.mxu1 %v7916_v19  ;;  %v7942_v3 = vpack.c.bf16 %v2998_v37, %v2994_v26  ;;  %v2995_v50 = vld [vmem:[#allocation13 + $0xd0] sm:$0xff] }
 0x5da   :  { %6553 = vrcp.f32 %v2696_v36  ;;  %3097 = vmatprep.mubr.f32.mxu0 %v8674_v2  ;;  %3168 = vmatprep.mubr.f32.mxu1 %v8674_v2  ;;  %v2999_v36 = vld [vmem:[#allocation13 + $0xf0] sm:$0xff] }
 0x5db   :  { %6555 = vrcp.f32 %v2702_v60  ;;  %8730 = vst [vmem:[#allocation50_spill] sm:$0xff] %v7942_v3  ;;  %v3002_v60 = vld [vmem:[#allocation13 + $0x108] sm:$0xff]  ;;  %v7950_v54 = vpack.c.bf16 %v2999_v36, %v2995_v50  ;;  %v7960_v36 = vpack.c.bf16 %v3005_v38, %v3001_v29  ;;  %v3015_v45 = vld [vmem:[#allocation13 + $0x170] sm:$0xff] }
 0x5dc   :  { %5782 = vmatpush1.bf16.msra.mxu0 %v7922_v22  ;;  %5814 = vmatpush1.bf16.msra.mxu1 %v7924_v51  ;;  %v3004_v22 = vld [vmem:[#allocation13 + $0x118] sm:$0xff]  ;;  %v7954_v26 = vpack.c.bf16 %v3006_v11, %v3002_v60  ;;  %v3009_v11 = vld [vmem:[#allocation13 + $0x140] sm:$0xff]  ;;  %v3022_v38 = vld [vmem:[#allocation13 + $0x1a8] sm:$0xff] }
 0x5dd   :  { %5784 = vmatprep.subr.bf16.mxu0 %v7928_v49  ;;  %5816 = vmatprep.subr.bf16.mxu1 %v7930_v8  ;;  %v3008_v51 = vld [vmem:[#allocation13 + $0x138] sm:$0xff]  ;;  %8733 = vst [vmem:[#allocation20_spill] sm:$0xff] %v7950_v54  ;;  %v3010_v8 = vld [vmem:[#allocation13 + $0x148] sm:$0xff] }
 0x5de   :  { %v7956_v37 = vpack.c.bf16 %v3008_v51, %v3004_v22  ;;  %v3014_v49 = vld [vmem:[#allocation13 + $0x168] sm:$0xff]  ;;  %v3013_v22 = vld [vmem:[#allocation13 + $0x160] sm:$0xff] }
 0x5df   :  { %v7966_v19 = vpack.c.bf16 %v3014_v49, %v3010_v8  ;;  %v3017_v8 = vld [vmem:[#allocation13 + $0x180] sm:$0xff] }
 0x5e0   :  { %5786 = vmatpush1.bf16.msra.mxu0 %v7936_v21  ;;  %5818 = vmatpush1.bf16.msra.mxu1 %v7938_v43  ;;  %v6550_v21 = vpop.eup %6549  ;;  %v3012_v43 = vld [vmem:[#allocation13 + $0x158] sm:$0xff] }
 0x5e1   :  { %5788 = vmatprep.subr.bf16.mxu0 %v7942_v3  ;;  %5820 = vmatprep.subr.bf16.mxu1 %v7944_v27  ;;  %v6552_v24 = vpop.eup %6551  ;;  %v7962_v27 = vpack.c.bf16 %v3007_v5, %v3003_v39  ;;  %v2709_v3 = vadd.f32 1.0, %v6550_v21  ;;  %v7968_v20 = vpack.c.bf16 %v3016_v42, %v3012_v43  ;;  %v3020_v39 = vld [vmem:[#allocation13 + $0x198] sm:$0xff]  ;;  %v7975_v21 = vpack.c.bf16 %v3013_v22, %v3009_v11  ;;  %v3021_v43 = vld [vmem:[#allocation13 + $0x1a0] sm:$0xff] }
 0x5e2   :  { %v3024_v5 = vld [vmem:[#allocation13 + $0x1b8] sm:$0xff] }
 0x5e3   :  { %6557 = vrcp.f32 %v2709_v3  ;;  %v7983_v42 = vpack.c.bf16 %v3024_v5, %v3020_v39  ;;  %v3032_v11 = vld [vmem:[#allocation13 + $0x1f8] sm:$0xff]  ;;  %v3027_v39 = vld [vmem:[#allocation13 + $0x1d0] sm:$0xff] }
 0x5e4   :  { %v6554_v50 = vpop.eup %6553  ;;  %5790 = vmatpush1.bf16.msra.mxu0 %v7948_v35  ;;  %5822 = vmatpush1.bf16.msra.mxu1 %v7950_v54  ;;  %v3011_v35 = vld [vmem:[#allocation13 + $0x150] sm:$0xff]  ;;  %v3018_v54 = vld [vmem:[#allocation13 + $0x188] sm:$0xff] }
 0x5e5   :  { %v6556_v51 = vpop.eup %6555  ;;  %v2714_v60 = vmul.f32 %v6554_v50, %v6552_v24  ;;  %5792 = vmatprep.subr.bf16.mxu0 %v7954_v26  ;;  %5824 = vmatprep.subr.bf16.mxu1 %v7956_v37  ;;  %v7977_v49 = vpack.c.bf16 %v3015_v45, %v3011_v35  ;;  %v3019_v24 = vld [vmem:[#allocation13 + $0x190] sm:$0xff]  ;;  %v7988_v45 = vpack.c.bf16 %v3021_v43, %v3017_v8  ;;  %v3025_v35 = vld [vmem:[#allocation13 + $0x1c0] sm:$0xff] }
 0x5e6   :  { %v2713_v29 = vmul.f32 %v6556_v51, %v7771_v9  ;;  %v7981_v9 = vpack.c.bf16 %v3022_v38, %v3018_v54  ;;  %v3023_v50 = vld [vmem:[#allocation13 + $0x1b0] sm:$0xff]  ;;  %v3026_v51 = vld [vmem:[#allocation13 + $0x1c8] sm:$0xff]  ;;  %v3029_v38 = vld [vmem:[#allocation13 + $0x1e0] sm:$0xff] }
 0x5e7   :  { %v7990_v3 = vpack.c.bf16 %v3023_v50, %v3019_v24  ;;  %v3031_v5 = vld [vmem:[#allocation13 + $0x1f0] sm:$0xff]  ;;  %v8000_v8 = vpack.c.bf16 %v3029_v38, %v3025_v35  ;;  %v8741_v35 = vld [vmem:[#allocation34_spill] sm:$0xff] }
 0x5e8   :  { %v7971_v62 = vadd.f32 %v2714_v60, %v2713_v29  ;;  %5794 = vmatpush1.bf16.msra.mxu0 %v7960_v36  ;;  %5826 = vmatpush1.bf16.msra.mxu1 %v7962_v27  ;;  %v3030_v60 = vld [vmem:[#allocation13 + $0x1e8] sm:$0xff]  ;;  %v3028_v29 = vld [vmem:[#allocation13 + $0x1d8] sm:$0xff]  ;;  %v8002_v43 = vpack.c.bf16 %v3031_v5, %v3027_v39 }
 0x5e9   :  { %5796 = vmatprep.subr.bf16.mxu0 %v7966_v19  ;;  %5828 = vmatprep.subr.bf16.mxu1 %v7968_v20  ;;  %v7994_v54 = vpack.c.bf16 %v3030_v60, %v3026_v51  ;;  %v7996_v22 = vpack.c.bf16 %v3032_v11, %v3028_v29 }
 0x5ea   :  { %6559 = vtanh.f32 %v7971_v62 }
 0x5ec   :  { %5798 = vmatpush1.bf16.msra.mxu0 %v7975_v21  ;;  %5830 = vmatpush1.bf16.msra.mxu1 %v7977_v49 }
 0x5ed   :  { %5800 = vmatprep.subr.bf16.mxu0 %v7981_v9  ;;  %5832 = vmatprep.subr.bf16.mxu1 %v7983_v42  ;;  %v6558_v24 = vpop.eup %6557 }
 0x5f0   :  { %5802 = vmatpush1.bf16.msra.mxu0 %v7988_v45  ;;  %5834 = vmatpush1.bf16.msra.mxu1 %v7990_v3 }
 0x5f1   :  { %5804 = vmatprep.subr.bf16.mxu0 %v7994_v54  ;;  %5836 = vmatprep.subr.bf16.mxu1 %v7996_v22 }
 0x5f4   :  { %v6560_v50 = vpop.eup %6559  ;;  %5806 = vmatpush1.bf16.msra.mxu0 %v8000_v8  ;;  %5838 = vmatpush1.bf16.msra.mxu1 %v8002_v43 }
 0x5f5   :  { %v8008_v51 = vmul.f32 %v6560_v50, %v6558_v24  ;;  %5840 = vmatprep.subr.bf16.mxu0 %v7794_v61  ;;  %5872 = vmatprep.subr.bf16.mxu1 %v7796_v46 }
 0x5f7   :  { %8734 = vst [vmem:[#allocation21_spill] sm:$0xff] %v8008_v51  ;;  %3098 = vmatmul.mubr.f32.vlgmr.msra.gmra.mrb[6].mxu0 %v8008_v51  ;;  %3169 = vmatmul.mubr.f32.vlgmr.msra.gmra.mrb[38].mxu1 %v8008_v51 }
 0x5f8   :  { %5842 = vmatpush1.bf16.msra.mxu0 %v7798_v18  ;;  %5874 = vmatpush1.bf16.msra.mxu1 %v7801_v63  ;;  %v8735_v18 = vld [vmem:[#allocation22_spill] sm:$0xff] }
 0x5f9   :  { %5844 = vmatprep.subr.bf16.mxu0 %v7806_v16  ;;  %5876 = vmatprep.subr.bf16.mxu1 %v7808_v55 }
 0x5fa   :  { %3340 = vmatprep.mubr.f32.mxu0 %v8674_v2  ;;  %3411 = vmatprep.mubr.f32.mxu1 %v8674_v2 }
 0x5fc   :  { %5846 = vmatpush1.bf16.msra.mxu0 %v7810_v30  ;;  %5878 = vmatpush1.bf16.msra.mxu1 %v7813_v31  ;;  %v8736_v30 = vld [vmem:[#allocation23_spill] sm:$0xff] }
 0x5fd   :  { %5848 = vmatprep.subr.bf16.mxu0 %v7818_v47  ;;  %5880 = vmatprep.subr.bf16.mxu1 %v7820_v33 }
 0x600   :  { %5850 = vmatpush1.bf16.msra.mxu0 %v7822_v14  ;;  %5882 = vmatpush1.bf16.msra.mxu1 %v7825_v57 }
 0x601   :  { %5852 = vmatprep.subr.bf16.mxu0 %v7830_v7  ;;  %5884 = vmatprep.subr.bf16.mxu1 %v7832_v15  ;;  %v8737_v7 = vld [vmem:[#allocation30_spill] sm:$0xff] }
 0x604   :  { %5854 = vmatpush1.bf16.msra.mxu0 %v7834_v48  ;;  %5886 = vmatpush1.bf16.msra.mxu1 %v7837_v4 }
 0x605   :  { %5856 = vmatprep.subr.bf16.mxu0 %v7842_v44  ;;  %5888 = vmatprep.subr.bf16.mxu1 %v7844_v0 }
 0x608   :  { %5858 = vmatpush1.bf16.msra.mxu0 %v7846_v12  ;;  %5890 = vmatpush1.bf16.msra.mxu1 %v7849_v41 }
 0x609   :  { %5860 = vmatprep.subr.bf16.mxu0 %v7854_v59  ;;  %5892 = vmatprep.subr.bf16.mxu1 %v7856_v40 }
 0x60c   :  { %5862 = vmatpush1.bf16.msra.mxu0 %v7858_v13  ;;  %5894 = vmatpush1.bf16.msra.mxu1 %v7861_v10 }
 0x60d   :  { %5864 = vmatprep.subr.bf16.mxu0 %v7866_v56  ;;  %5896 = vmatprep.subr.bf16.mxu1 %v7868_v53  ;;  %v8738_v56 = vld [vmem:[#allocation37_spill] sm:$0xff] }
 0x610   :  { %5866 = vmatpush1.bf16.msra.mxu0 %v7870_v34  ;;  %5898 = vmatpush1.bf16.msra.mxu1 %v7873_v58 }
 0x611   :  { %5868 = vmatprep.subr.bf16.mxu0 %v7878_v6  ;;  %5900 = vmatprep.subr.bf16.mxu1 %v7880_v25  ;;  %v8739_v25 = vld [vmem:[#allocation33_spill] sm:$0xff] }
 0x614   :  { %5870 = vmatpush1.bf16.msra.mxu0 %v7882_v23  ;;  %5902 = vmatpush1.bf16.msra.mxu1 %v7885_v1 }
 0x615   :  { %5904 = vmatprep.subr.bf16.mxu0 %v7890_v17  ;;  %5936 = vmatprep.subr.bf16.mxu1 %v7892_v28  ;;  %v8740_v28 = vld [vmem:[#allocation32_spill] sm:$0xff] }
 0x6aa   :  { %v2856_v61 = vpop.f32.mrb[24].mxu0  ;;  %v2927_v46 = vpop.f32.mrb[24].mxu1 }
 0x6ab   :  { %v2932_v63 = vadd.f32 %v2856_v61, %v8735_v18  ;;  %v2858_v16 = vpop.f32.mrb[25].mxu0  ;;  %v2929_v55 = vpop.f32.mrb[25].mxu1  ;;  %v6327_v15 = vadd.f32 %v2927_v46, %v8737_v7 }
 0x6ac   :  { %v2933_v31 = vadd.f32 %v2858_v16, %v8736_v30  ;;  %v6328_v14 = vadd.f32 %v2929_v55, %v8694_v52  ;;  %v8743_v16 = vld [vmem:[#allocation38_spill] sm:$0xff]  ;;  %v8744_v55 = vld [vmem:[#allocation39_spill] sm:$0xff] }
 0x6ad   :  { %v5022_v47 = vmul.f32 -1.442695, %v2932_v63 }
 0x6ae   :  { %v5023_v33 = vmul.f32 -1.442695, %v2933_v31  ;;  %v5024_v57 = vmul.f32 -1.442695, %v6328_v14  ;;  %v8745_v31 = vld [vmem:[#allocation42_spill] sm:$0xff]  ;;  %v8748_v14 = vld [vmem:[#allocation45_spill] sm:$0xff] }
 0x6af   :  { %6561 = vpow2.f32 %v5022_v47  ;;  %v8746_v47 = vld [vmem:[#allocation43_spill] sm:$0xff] }
 0x6b0   :  { %6563 = vpow2.f32 %v5023_v33  ;;  %v8747_v33 = vld [vmem:[#allocation44_spill] sm:$0xff] }
 0x6b1   :  { %6565 = vpow2.f32 %v5024_v57  ;;  %v8749_v57 = vld [vmem:[#allocation46_spill] sm:$0xff] }
 0x6b2   :  { %6567 = vtanh.f32 %v6327_v15  ;;  %v8750_v15 = vld [vmem:[#allocation47_spill] sm:$0xff] }
 0x6b9   :  { %v6562_v48 = vpop.eup %6561 }
 0x6ba   :  { %v6564_v4 = vpop.eup %6563  ;;  %v2939_v44 = vadd.f32 1.0, %v6562_v48  ;;  %v8751_v48 = vld [vmem:[#allocation48_spill] sm:$0xff] }
 0x6bb   :  { %v2945_v0 = vadd.f32 1.0, %v6564_v4  ;;  %v6566_v12 = vpop.eup %6565  ;;  %v8752_v4 = vld [vmem:[#allocation49_spill] sm:$0xff] }
 0x6bc   :  { %6569 = vrcp.f32 %v2939_v44  ;;  %v6568_v41 = vpop.eup %6567  ;;  %v2952_v10 = vadd.f32 1.0, %v6566_v12  ;;  %v8753_v44 = vld [vmem:[#allocation50_spill] sm:$0xff] }
 0x6bd   :  { %6571 = vrcp.f32 %v2945_v0  ;;  %v8754_v0 = vld [vmem:[#allocation51_spill] sm:$0xff] }
 0x6be   :  { %6573 = vrcp.f32 %v2952_v10 }
 0x6c6   :  { %v6570_v59 = vpop.eup %6569 }
 0x6c7   :  { %v6572_v40 = vpop.eup %6571  ;;  %v2957_v13 = vmul.f32 %v6570_v59, %v6568_v41 }
 0x6c8   :  { %v2956_v53 = vmul.f32 %v6572_v40, %v8738_v56  ;;  %v6574_v39 = vpop.eup %6573  ;;  %v8755_v40 = vld [vmem:[#allocation52_spill] sm:$0xff] }
 0x6ca   :  { %v8053_v34 = vadd.f32 %v2957_v13, %v2956_v53  ;;  %v3099_v58 = vpop.f32.mrb[6].mxu0  ;;  %v3170_v6 = vpop.f32.mrb[38].mxu1  ;;  %v8756_v13 = vld [vmem:[#allocation20_spill] sm:$0xff] }
 0x6cb   :  { %v6341_v23 = vadd.f32 %v3099_v58, %v8739_v25  ;;  %v3101_v1 = vpop.f32.mrb[7].mxu0  ;;  %v3172_v17 = vpop.f32.mrb[39].mxu1  ;;  %v6357_v50 = vadd.f32 %v3170_v6, %v7431_v32 }
 0x6cc   :  { %v6342_v60 = vadd.f32 %v3101_v1, %v8740_v28  ;;  %6575 = vtanh.f32 %v8053_v34  ;;  %v6358_v38 = vadd.f32 %v3172_v17, %v8741_v35  ;;  %v3713_v17 = vld [vmem:[#allocation10 + $0x78] sm:$0xff] }
 0x6cd   :  { %v5025_v29 = vmul.f32 -1.442695, %v6341_v23  ;;  %v3709_v23 = vld [vmem:[#allocation10 + $0x58] sm:$0xff] }
 0x6ce   :  { %v5026_v11 = vmul.f32 -1.442695, %v6342_v60  ;;  %v5027_v24 = vmul.f32 -1.442695, %v6358_v38  ;;  %v3706_v60 = vld [vmem:[#allocation10 + $0x40] sm:$0xff] }
 0x6cf   :  { %6577 = vpow2.f32 %v5025_v29  ;;  %v3710_v29 = vld [vmem:[#allocation10 + $0x60] sm:$0xff] }
 0x6d0   :  { %6579 = vpow2.f32 %v5026_v11  ;;  %v8120_v11 = vpack.c.bf16 %v3713_v17, %v3709_v23  ;;  %v8122_v38 = vpack.c.bf16 %v3710_v29, %v3706_v60  ;;  %v3741_v23 = vld [vmem:[#allocation10 + $0x158] sm:$0xff]  ;;  %v3738_v29 = vld [vmem:[#allocation10 + $0x140] sm:$0xff] }
 0x6d1   :  { %6581 = vpow2.f32 %v5027_v24  ;;  %v3745_v60 = vld [vmem:[#allocation10 + $0x178] sm:$0xff] }
 0x6d2   :  { %6583 = vtanh.f32 %v6357_v50  ;;  %v3715_v50 = vld [vmem:[#allocation10 + $0x88] sm:$0xff] }
 0x6d6   :  { %v6576_v5 = vpop.eup %6575 }
 0x6d7   :  { %v8060_v61 = vmul.f32 %v6576_v5, %v6574_v39  ;;  %v3708_v39 = vld [vmem:[#allocation10 + $0x50] sm:$0xff] }
 0x6d8   :  { %v3712_v5 = vld [vmem:[#allocation10 + $0x70] sm:$0xff] }
 0x6d9   :  { %8742 = vst [vmem:[#allocation22_spill] sm:$0xff] %v8060_v61  ;;  %v6578_v46 = vpop.eup %6577  ;;  %3341 = vmatmul.mubr.f32.vlgmr.msra.gmra.mrb[26].mxu0 %v8060_v61  ;;  %3412 = vmatmul.mubr.f32.vlgmr.msra.gmra.mrb[26].mxu1 %v8060_v61  ;;  %v8125_v24 = vpack.c.bf16 %v3712_v5, %v3708_v39  ;;  %v3742_v39 = vld [vmem:[#allocation10 + $0x160] sm:$0xff]  ;;  %v8168_v5 = vpack.c.bf16 %v3745_v60, %v3741_v23  ;;  %v3760_v23 = vld [vmem:[#allocation10 + $0x1f0] sm:$0xff] }
 0x6da   :  { %v6580_v18 = vpop.eup %6579  ;;  %v3182_v63 = vadd.f32 1.0, %v6578_v46  ;;  %5906 = vmatpush1.bf16.msra.mxu0 %v8743_v16  ;;  %5938 = vmatpush1.bf16.msra.mxu1 %v8744_v55  ;;  %v3719_v46 = vld [vmem:[#allocation10 + $0xa8] sm:$0xff]  ;;  %v3721_v16 = vld [vmem:[#allocation10 + $0xb8] sm:$0xff]  ;;  %v3714_v55 = vld [vmem:[#allocation10 + $0x80] sm:$0xff] }
 0x6db   :  { %v3188_v30 = vadd.f32 1.0, %v6580_v18  ;;  %5908 = vmatprep.subr.bf16.mxu0 %v8745_v31  ;;  %5940 = vmatprep.subr.bf16.mxu1 %v8746_v47  ;;  %v6582_v12 = vpop.eup %6581  ;;  %v3717_v18 = vld [vmem:[#allocation10 + $0x98] sm:$0xff] }
 0x6dc   :  { %6585 = vrcp.f32 %v3182_v63  ;;  %3583 = vmatprep.mubr.f32.mxu0 %v8674_v2  ;;  %3654 = vmatprep.mubr.f32.mxu1 %v8674_v2  ;;  %v6584_v41 = vpop.eup %6583  ;;  %v3195_v53 = vadd.f32 1.0, %v6582_v12  ;;  %v8130_v63 = vpack.c.bf16 %v3719_v46, %v3715_v50  ;;  %v8132_v31 = vpack.c.bf16 %v3721_v16, %v3717_v18  ;;  %v3722_v12 = vld [vmem:[#allocation10 + $0xc0] sm:$0xff]  ;;  %v3740_v46 = vld [vmem:[#allocation10 + $0x150] sm:$0xff] }
 0x6dd   :  { %6587 = vrcp.f32 %v3188_v30  ;;  %v3718_v30 = vld [vmem:[#allocation10 + $0xa0] sm:$0xff]  ;;  %v8170_v50 = vpack.c.bf16 %v3742_v39, %v3738_v29  ;;  %v3744_v18 = vld [vmem:[#allocation10 + $0x170] sm:$0xff]  ;;  %v3942_v29 = vld [vmem:[#allocation13 + $0x8] sm:$0xff] }
 0x6de   :  { %5910 = vmatpush1.bf16.msra.mxu0 %v8747_v33  ;;  %5942 = vmatpush1.bf16.msra.mxu1 %v8748_v14  ;;  %6589 = vrcp.f32 %v3195_v53  ;;  %v8134_v47 = vpack.c.bf16 %v3718_v30, %v3714_v55  ;;  %v3716_v33 = vld [vmem:[#allocation10 + $0x90] sm:$0xff]  ;;  %v3731_v53 = vld [vmem:[#allocation10 + $0x108] sm:$0xff]  ;;  %v8173_v16 = vpack.c.bf16 %v3744_v18, %v3740_v46  ;;  %v3944_v46 = vld [vmem:[#allocation13 + $0x18] sm:$0xff] }
 0x6df   :  { %5912 = vmatprep.subr.bf16.mxu0 %v8749_v57  ;;  %5944 = vmatprep.subr.bf16.mxu1 %v8750_v15  ;;  %v3720_v14 = vld [vmem:[#allocation10 + $0xb0] sm:$0xff]  ;;  %v3723_v15 = vld [vmem:[#allocation10 + $0xc8] sm:$0xff] }
 0x6e0   :  { %v8137_v57 = vpack.c.bf16 %v3720_v14, %v3716_v33  ;;  %v3747_v55 = vld [vmem:[#allocation10 + $0x188] sm:$0xff]  ;;  %v3749_v33 = vld [vmem:[#allocation10 + $0x198] sm:$0xff] }
 0x6e1   :  { %v3751_v30 = vld [vmem:[#allocation10 + $0x1a8] sm:$0xff] }
 0x6e2   :  { %5914 = vmatpush1.bf16.msra.mxu0 %v8751_v48  ;;  %5946 = vmatpush1.bf16.msra.mxu1 %v8752_v4  ;;  %v3727_v48 = vld [vmem:[#allocation10 + $0xe8] sm:$0xff]  ;;  %v3725_v4 = vld [vmem:[#allocation10 + $0xd8] sm:$0xff]  ;;  %v8178_v14 = vpack.c.bf16 %v3751_v30, %v3747_v55 }
 0x6e3   :  { %5916 = vmatprep.subr.bf16.mxu0 %v8753_v44  ;;  %5948 = vmatprep.subr.bf16.mxu1 %v8754_v0  ;;  %v8142_v44 = vpack.c.bf16 %v3727_v48, %v3723_v15  ;;  %v3729_v0 = vld [vmem:[#allocation10 + $0xf8] sm:$0xff]  ;;  %v3746_v48 = vld [vmem:[#allocation10 + $0x180] sm:$0xff]  ;;  %v3946_v39 = vld [vmem:[#allocation13 + $0x28] sm:$0xff] }
 0x6e4   :  { %v3753_v15 = vld [vmem:[#allocation10 + $0x1b8] sm:$0xff]  ;;  %v8202_v18 = vpack.c.bf16 %v3946_v39, %v3942_v29 }
 0x6e5   :  { %v3948_v55 = vld [vmem:[#allocation13 + $0x38] sm:$0xff] }
 0x6e6   :  { %v6586_v59 = vpop.eup %6585  ;;  %5918 = vmatpush1.bf16.msra.mxu0 %v8755_v40  ;;  %5950 = vmatpush1.bf16.msra.mxu1 %v8756_v13  ;;  %v3724_v13 = vld [vmem:[#allocation10 + $0xd0] sm:$0xff]  ;;  %v8204_v30 = vpack.c.bf16 %v3948_v55, %v3944_v46 }
 0x6e7   :  { %v6588_v10 = vpop.eup %6587  ;;  %v3200_v56 = vmul.f32 %v6586_v59, %v6584_v41  ;;  %5920 = vmatprep.subr.bf16.mxu0 %v7954_v26  ;;  %5952 = vmatprep.subr.bf16.mxu1 %v7956_v37  ;;  %v3703_v26 = vld [vmem:[#allocation10 + $0x28] sm:$0xff]  ;;  %v3701_v37 = vld [vmem:[#allocation10 + $0x18] sm:$0xff]  ;;  %v3726_v41 = vld [vmem:[#allocation10 + $0xe0] sm:$0xff]  ;;  %v8144_v59 = vpack.c.bf16 %v3729_v0, %v3725_v4  ;;  %v8180_v0 = vpack.c.bf16 %v3753_v15, %v3749_v33 }
 0x6e8   :  { %v3199_v58 = vmul.f32 %v6588_v10, %v7971_v62  ;;  %v8146_v40 = vpack.c.bf16 %v3726_v41, %v3722_v12  ;;  %v3728_v10 = vld [vmem:[#allocation10 + $0xf0] sm:$0xff]  ;;  %v3750_v4 = vld [vmem:[#allocation10 + $0x1a0] sm:$0xff] }
 0x6e9   :  { %v8182_v12 = vpack.c.bf16 %v3750_v4, %v3746_v48  ;;  %v3748_v41 = vld [vmem:[#allocation10 + $0x190] sm:$0xff]  ;;  %v8758_v48 = vld [vmem:[#allocation24_spill] sm:$0xff] }
 0x6ea   :  { %v8083_v6 = vadd.f32 %v3200_v56, %v3199_v58  ;;  %5922 = vmatpush1.bf16.msra.mxu0 %v7960_v36  ;;  %5954 = vmatpush1.bf16.msra.mxu1 %v7962_v27  ;;  %v3699_v27 = vld [vmem:[#allocation10 + $0x8] sm:$0xff]  ;;  %v8149_v56 = vpack.c.bf16 %v3728_v10, %v3724_v13  ;;  %v3752_v13 = vld [vmem:[#allocation10 + $0x1b0] sm:$0xff] }
 0x6eb   :  { %5924 = vmatprep.subr.bf16.mxu0 %v7966_v19  ;;  %5956 = vmatprep.subr.bf16.mxu1 %v7968_v20  ;;  %v6590_v19 = vpop.eup %6589  ;;  %v8106_v36 = vpack.c.bf16 %v3703_v26, %v3699_v27  ;;  %v3735_v58 = vld [vmem:[#allocation10 + $0x128] sm:$0xff]  ;;  %v3737_v27 = vld [vmem:[#allocation10 + $0x138] sm:$0xff]  ;;  %v3730_v26 = vld [vmem:[#allocation10 + $0x100] sm:$0xff]  ;;  %v8185_v10 = vpack.c.bf16 %v3752_v13, %v3748_v41 }
 0x6ec   :  { %6591 = vtanh.f32 %v8083_v6 }
 0x6ee   :  { %5926 = vmatpush1.bf16.msra.mxu0 %v7975_v21  ;;  %5958 = vmatpush1.bf16.msra.mxu1 %v7977_v49  ;;  %v3705_v21 = vld [vmem:[#allocation10 + $0x38] sm:$0xff]  ;;  %v3698_v49 = vld [vmem:[#allocation10] sm:$0xff] }
 0x6ef   :  { %5928 = vmatprep.subr.bf16.mxu0 %v7981_v9  ;;  %5960 = vmatprep.subr.bf16.mxu1 %v7983_v42  ;;  %v3702_v9 = vld [vmem:[#allocation10 + $0x20] sm:$0xff]  ;;  %v8108_v42 = vpack.c.bf16 %v3705_v21, %v3701_v37 }
 0x6f0   :  { %v3734_v37 = vld [vmem:[#allocation10 + $0x120] sm:$0xff] }
 0x6f2   :  { %5930 = vmatpush1.bf16.msra.mxu0 %v7988_v45  ;;  %5962 = vmatpush1.bf16.msra.mxu1 %v7990_v3  ;;  %v8110_v45 = vpack.c.bf16 %v3702_v9, %v3698_v49  ;;  %v3700_v3 = vld [vmem:[#allocation10 + $0x10] sm:$0xff]  ;;  %v8158_v49 = vpack.c.bf16 %v3734_v37, %v3730_v26  ;;  %v3761_v26 = vld [vmem:[#allocation10 + $0x1f8] sm:$0xff]  ;;  %v3754_v37 = vld [vmem:[#allocation10 + $0x1c0] sm:$0xff] }
 0x6f3   :  { %5932 = vmatprep.subr.bf16.mxu0 %v7994_v54  ;;  %5964 = vmatprep.subr.bf16.mxu1 %v7996_v22  ;;  %v3704_v54 = vld [vmem:[#allocation10 + $0x30] sm:$0xff] }
 0x6f4   :  { %v8113_v22 = vpack.c.bf16 %v3704_v54, %v3700_v3  ;;  %v3732_v9 = vld [vmem:[#allocation10 + $0x110] sm:$0xff] }
 0x6f5   :  { %v3736_v3 = vld [vmem:[#allocation10 + $0x130] sm:$0xff] }
 0x6f6   :  { %v6592_v62 = vpop.eup %6591  ;;  %5934 = vmatpush1.bf16.msra.mxu0 %v8000_v8  ;;  %5966 = vmatpush1.bf16.msra.mxu1 %v8002_v43  ;;  %v3707_v8 = vld [vmem:[#allocation10 + $0x48] sm:$0xff]  ;;  %v8161_v54 = vpack.c.bf16 %v3736_v3, %v3732_v9  ;;  %v3758_v9 = vld [vmem:[#allocation10 + $0x1e0] sm:$0xff] }
 0x6f7   :  { %v8100_v20 = vmul.f32 %v6592_v62, %v6590_v19  ;;  %5968 = vmatprep.subr.bf16.mxu0 %v8106_v36  ;;  %6000 = vmatprep.subr.bf16.mxu1 %v8108_v42  ;;  %v3711_v43 = vld [vmem:[#allocation10 + $0x68] sm:$0xff]  ;;  %v3733_v19 = vld [vmem:[#allocation10 + $0x118] sm:$0xff]  ;;  %v8154_v62 = vpack.c.bf16 %v3735_v58, %v3731_v53 }
 0x6f8   :  { %v8118_v1 = vpack.c.bf16 %v3711_v43, %v3707_v8  ;;  %v8156_v21 = vpack.c.bf16 %v3737_v27, %v3733_v19  ;;  %v3739_v8 = vld [vmem:[#allocation10 + $0x148] sm:$0xff]  ;;  %v3757_v19 = vld [vmem:[#allocation10 + $0x1d8] sm:$0xff] }
 0x6f9   :  { %8757 = vst [vmem:[#allocation23_spill] sm:$0xff] %v8100_v20  ;;  %3584 = vmatmul.mubr.f32.vlgmr.msra.gmra.mrb[4].mxu0 %v8100_v20  ;;  %3655 = vmatmul.mubr.f32.vlgmr.msra.gmra.mrb[36].mxu1 %v8100_v20  ;;  %v3743_v43 = vld [vmem:[#allocation10 + $0x168] sm:$0xff]  ;;  %v8192_v3 = vpack.c.bf16 %v3761_v26, %v3757_v19 }
 0x6fa   :  { %3826 = vmatprep.mubr.f32.mxu0 %v8674_v2  ;;  %3897 = vmatprep.mubr.f32.mxu1 %v8674_v2  ;;  %v8166_v17 = vpack.c.bf16 %v3743_v43, %v3739_v8  ;;  %v3755_v53 = vld [vmem:[#allocation10 + $0x1c8] sm:$0xff]  ;;  %v8194_v8 = vpack.c.bf16 %v3758_v9, %v3754_v37  ;;  %v3756_v43 = vld [vmem:[#allocation10 + $0x1d0] sm:$0xff] }
 0x6fb   :  { %5970 = vmatpush1.bf16.msra.mxu0 %v8110_v45  ;;  %6002 = vmatpush1.bf16.msra.mxu1 %v8113_v22  ;;  %v3759_v58 = vld [vmem:[#allocation10 + $0x1e8] sm:$0xff]  ;;  %v8197_v60 = vpack.c.bf16 %v3760_v23, %v3756_v43 }
 0x6fc   :  { %5972 = vmatprep.subr.bf16.mxu0 %v8118_v1  ;;  %6004 = vmatprep.subr.bf16.mxu1 %v8120_v11  ;;  %v8190_v27 = vpack.c.bf16 %v3759_v58, %v3755_v53  ;;  %v8759_v53 = vld [vmem:[#allocation25_spill] sm:$0xff] }
 0x6ff   :  { %5974 = vmatpush1.bf16.msra.mxu0 %v8122_v38  ;;  %6006 = vmatpush1.bf16.msra.mxu1 %v8125_v24 }
 0x700   :  { %5976 = vmatprep.subr.bf16.mxu0 %v8130_v63  ;;  %6008 = vmatprep.subr.bf16.mxu1 %v8132_v31 }
 0x703   :  { %5978 = vmatpush1.bf16.msra.mxu0 %v8134_v47  ;;  %6010 = vmatpush1.bf16.msra.mxu1 %v8137_v57 }
 0x704   :  { %5980 = vmatprep.subr.bf16.mxu0 %v8142_v44  ;;  %6012 = vmatprep.subr.bf16.mxu1 %v8144_v59 }
 0x707   :  { %5982 = vmatpush1.bf16.msra.mxu0 %v8146_v40  ;;  %6014 = vmatpush1.bf16.msra.mxu1 %v8149_v56 }
 0x708   :  { %5984 = vmatprep.subr.bf16.mxu0 %v8154_v62  ;;  %6016 = vmatprep.subr.bf16.mxu1 %v8156_v21 }
 0x70b   :  { %5986 = vmatpush1.bf16.msra.mxu0 %v8158_v49  ;;  %6018 = vmatpush1.bf16.msra.mxu1 %v8161_v54 }
 0x70c   :  { %5988 = vmatprep.subr.bf16.mxu0 %v8166_v17  ;;  %6020 = vmatprep.subr.bf16.mxu1 %v8168_v5 }
 0x70f   :  { %5990 = vmatpush1.bf16.msra.mxu0 %v8170_v50  ;;  %6022 = vmatpush1.bf16.msra.mxu1 %v8173_v16 }
 0x710   :  { %5992 = vmatprep.subr.bf16.mxu0 %v8178_v14  ;;  %6024 = vmatprep.subr.bf16.mxu1 %v8180_v0 }
 0x713   :  { %5994 = vmatpush1.bf16.msra.mxu0 %v8182_v12  ;;  %6026 = vmatpush1.bf16.msra.mxu1 %v8185_v10 }
 0x714   :  { %5996 = vmatprep.subr.bf16.mxu0 %v8190_v27  ;;  %6028 = vmatprep.subr.bf16.mxu1 %v8192_v3 }
 0x717   :  { %5998 = vmatpush1.bf16.msra.mxu0 %v8194_v8  ;;  %6030 = vmatpush1.bf16.msra.mxu1 %v8197_v60 }
 0x718   :  { %6032 = vmatprep.subr.bf16.mxu0 %v8202_v18  ;;  %6064 = vmatprep.subr.bf16.mxu1 %v8204_v30 }
 0x7ac   :  { %v3342_v33 = vpop.f32.mrb[26].mxu0  ;;  %v3413_v15 = vpop.f32.mrb[26].mxu1 }
 0x7ad   :  { %v3418_v4 = vadd.f32 %v3342_v33, %v8758_v48  ;;  %v3344_v41 = vpop.f32.mrb[27].mxu0  ;;  %v3415_v13 = vpop.f32.mrb[27].mxu1  ;;  %v6329_v43 = vadd.f32 %v3413_v15, %v8737_v7  ;;  %v3960_v7 = vld [vmem:[#allocation13 + $0x98] sm:$0xff] }
 0x7ae   :  { %v3419_v58 = vadd.f32 %v3344_v41, %v8759_v53  ;;  %v6330_v37 = vadd.f32 %v3415_v13, %v8694_v52 }
 0x7af   :  { %v5028_v19 = vmul.f32 -1.442695, %v3418_v4 }
 0x7b0   :  { %v5029_v26 = vmul.f32 -1.442695, %v3419_v58  ;;  %v5030_v9 = vmul.f32 -1.442695, %v6330_v37 }
 0x7b1   :  { %6593 = vpow2.f32 %v5028_v19 }
 0x7b2   :  { %6595 = vpow2.f32 %v5029_v26 }
 0x7b3   :  { %6597 = vpow2.f32 %v5030_v9 }
 0x7b4   :  { %6599 = vtanh.f32 %v6329_v43 }
 0x7bb   :  { %v6594_v23 = vpop.eup %6593 }
 0x7bc   :  { %v6596_v29 = vpop.eup %6595  ;;  %v3425_v39 = vadd.f32 1.0, %v6594_v23 }
 0x7bd   :  { %v3431_v46 = vadd.f32 1.0, %v6596_v29  ;;  %v6598_v55 = vpop.eup %6597 }
 0x7be   :  { %6601 = vrcp.f32 %v3425_v39  ;;  %v6600_v33 = vpop.eup %6599  ;;  %v3438_v53 = vadd.f32 1.0, %v6598_v55  ;;  %v3943_v55 = vld [vmem:[#allocation13 + $0x10] sm:$0xff] }
 0x7bf   :  { %6603 = vrcp.f32 %v3431_v46  ;;  %v3945_v46 = vld [vmem:[#allocation13 + $0x20] sm:$0xff] }
 0x7c0   :  { %6605 = vrcp.f32 %v3438_v53  ;;  %v3956_v53 = vld [vmem:[#allocation13 + $0x78] sm:$0xff] }
 0x7c8   :  { %v6602_v48 = vpop.eup %6601 }
 0x7c9   :  { %v6604_v4 = vpop.eup %6603  ;;  %v3443_v41 = vmul.f32 %v6602_v48, %v6600_v33  ;;  %v3947_v33 = vld [vmem:[#allocation13 + $0x30] sm:$0xff]  ;;  %v3950_v48 = vld [vmem:[#allocation13 + $0x48] sm:$0xff] }
 0x7ca   :  { %v3442_v58 = vmul.f32 %v6604_v4, %v8053_v34  ;;  %v3941_v34 = vld [vmem:[#allocation13] sm:$0xff]  ;;  %v3954_v4 = vld [vmem:[#allocation13 + $0x68] sm:$0xff]  ;;  %v8221_v51 = vpack.c.bf16 %v3947_v33, %v3943_v55 }
 0x7cc   :  { %v8213_v13 = vadd.f32 %v3443_v41, %v3442_v58  ;;  %v3585_v19 = vpop.f32.mrb[4].mxu0  ;;  %v3656_v15 = vpop.f32.mrb[36].mxu1  ;;  %v3952_v41 = vld [vmem:[#allocation13 + $0x58] sm:$0xff]  ;;  %8762 = vst [vmem:[#allocation39_spill] sm:$0xff] %v8221_v51 }
 0x7cd   :  { %v6339_v26 = vadd.f32 %v3585_v19, %v8739_v25  ;;  %v3587_v37 = vpop.f32.mrb[5].mxu0  ;;  %v3658_v9 = vpop.f32.mrb[37].mxu1  ;;  %v8228_v20 = vpack.c.bf16 %v3956_v53, %v3952_v41  ;;  %v3958_v25 = vld [vmem:[#allocation13 + $0x88] sm:$0xff] }
 0x7ce   :  { %8760 = vst [vmem:[#allocation37_spill] sm:$0xff] %v8213_v13  ;;  %v6340_v43 = vadd.f32 %v3587_v37, %v8740_v28  ;;  %6607 = vtanh.f32 %v8213_v13  ;;  %v6356_v39 = vadd.f32 %v3658_v9, %v8741_v35  ;;  %v6606_v58 = vpop.eup %6605  ;;  %v8219_v37 = vpack.c.bf16 %v3945_v46, %v3941_v34  ;;  %v3951_v35 = vld [vmem:[#allocation13 + $0x50] sm:$0xff]  ;;  %v3962_v13 = vld [vmem:[#allocation13 + $0xa8] sm:$0xff] }
 0x7cf   :  { %v5031_v23 = vmul.f32 -1.442695, %v6339_v26  ;;  %v3949_v26 = vld [vmem:[#allocation13 + $0x40] sm:$0xff]  ;;  %8765 = vst [vmem:[#allocation44_spill] sm:$0xff] %v8228_v20  ;;  %v3955_v28 = vld [vmem:[#allocation13 + $0x70] sm:$0xff]  ;;  %v8240_v53 = vpack.c.bf16 %v3962_v13, %v3958_v25 }
 0x7d0   :  { %v5032_v29 = vmul.f32 -1.442695, %v6340_v43  ;;  %v5033_v61 = vmul.f32 -1.442695, %v6356_v39  ;;  %8761 = vst [vmem:[#allocation38_spill] sm:$0xff] %v8219_v37  ;;  %v3953_v43 = vld [vmem:[#allocation13 + $0x60] sm:$0xff]  ;;  %v8236_v33 = vpack.c.bf16 %v3955_v28, %v3951_v35 }
 0x7d1   :  { %6609 = vpow2.f32 %v5031_v23  ;;  %v6355_v23 = vadd.f32 %v3656_v15, %v7431_v32  ;;  %v3964_v39 = vld [vmem:[#allocation13 + $0xb8] sm:$0xff]  ;;  %v8234_v15 = vpack.c.bf16 %v3953_v43, %v3949_v26  ;;  %8768 = vst [vmem:[#allocation47_spill] sm:$0xff] %v8240_v53  ;;  %v3970_v26 = vld [vmem:[#allocation13 + $0xe8] sm:$0xff]  ;;  %v3965_v35 = vld [vmem:[#allocation13 + $0xc0] sm:$0xff] }
 0x7d2   :  { %6611 = vpow2.f32 %v5032_v29  ;;  %v8226_v29 = vpack.c.bf16 %v3954_v4, %v3950_v48  ;;  %8767 = vst [vmem:[#allocation46_spill] sm:$0xff] %v8236_v33  ;;  %v3957_v48 = vld [vmem:[#allocation13 + $0x80] sm:$0xff]  ;;  %v3968_v43 = vld [vmem:[#allocation13 + $0xd8] sm:$0xff] }
 0x7d3   :  { %6613 = vpow2.f32 %v5033_v61  ;;  %8766 = vst [vmem:[#allocation45_spill] sm:$0xff] %v8234_v15  ;;  %v3961_v4 = vld [vmem:[#allocation13 + $0xa0] sm:$0xff]  ;;  %v3959_v61 = vld [vmem:[#allocation13 + $0x90] sm:$0xff]  ;;  %v3972_v28 = vld [vmem:[#allocation13 + $0xf8] sm:$0xff] }
 0x7d4   :  { %8764 = vst [vmem:[#allocation43_spill] sm:$0xff] %v8226_v29  ;;  %6615 = vtanh.f32 %v6355_v23  ;;  %v8248_v25 = vpack.c.bf16 %v3961_v4, %v3957_v48  ;;  %v3969_v13 = vld [vmem:[#allocation13 + $0xe0] sm:$0xff] }
 0x7d5   :  { %v8260_v48 = vpack.c.bf16 %v3969_v13, %v3965_v35  ;;  %v3988_v35 = vld [vmem:[#allocation13 + $0x178] sm:$0xff] }
 0x7d6   :  { %8770 = vst [vmem:[#allocation49_spill] sm:$0xff] %v8248_v25 }
 0x7d7   :  { %8774 = vst [vmem:[#allocation20_spill] sm:$0xff] %v8260_v48 }
 0x7d8   :  { %v6608_v19 = vpop.eup %6607 }
 0x7d9   :  { %v8224_v9 = vmul.f32 %v6608_v19, %v6606_v58  ;;  %v8242_v58 = vpack.c.bf16 %v3964_v39, %v3960_v7  ;;  %v3963_v19 = vld [vmem:[#allocation13 + $0xb0] sm:$0xff]  ;;  %v8256_v39 = vpack.c.bf16 %v3972_v28, %v3968_v43 }
 0x7da   :  { %v8250_v7 = vpack.c.bf16 %v3963_v19, %v3959_v61  ;;  %v3973_v61 = vld [vmem:[#allocation13 + $0x100] sm:$0xff]  ;;  %v3975_v43 = vld [vmem:[#allocation13 + $0x110] sm:$0xff] }
 0x7db   :  { %8763 = vst [vmem:[#allocation42_spill] sm:$0xff] %v8224_v9  ;;  %v6610_v34 = vpop.eup %6609  ;;  %3827 = vmatmul.mubr.f32.vlgmr.msra.gmra.mrb[28].mxu0 %v8224_v9  ;;  %3898 = vmatmul.mubr.f32.vlgmr.msra.gmra.mrb[28].mxu1 %v8224_v9  ;;  %8769 = vst [vmem:[#allocation48_spill] sm:$0xff] %v8242_v58  ;;  %v3978_v9 = vld [vmem:[#allocation13 + $0x128] sm:$0xff]  ;;  %v3977_v19 = vld [vmem:[#allocation13 + $0x120] sm:$0xff] }
 0x7dc   :  { %v6612_v46 = vpop.eup %6611  ;;  %v3668_v55 = vadd.f32 1.0, %v6610_v34  ;;  %6034 = vmatpush1.bf16.msra.mxu0 %v8219_v37  ;;  %6066 = vmatpush1.bf16.msra.mxu1 %v8221_v51  ;;  %v3966_v34 = vld [vmem:[#allocation13 + $0xc8] sm:$0xff]  ;;  %8771 = vst [vmem:[#allocation50_spill] sm:$0xff] %v8250_v7  ;;  %8773 = vst [vmem:[#allocation52_spill] sm:$0xff] %v8256_v39  ;;  %v3979_v28 = vld [vmem:[#allocation13 + $0x130] sm:$0xff] }
 0x7dd   :  { %v3674_v41 = vadd.f32 1.0, %v6612_v46  ;;  %6036 = vmatprep.subr.bf16.mxu0 %v8226_v29  ;;  %6068 = vmatprep.subr.bf16.mxu1 %v8228_v20  ;;  %v8254_v23 = vpack.c.bf16 %v3970_v26, %v3966_v34  ;;  %v3967_v46 = vld [vmem:[#allocation13 + $0xd0] sm:$0xff] }
 0x7de   :  { %6617 = vrcp.f32 %v3668_v55  ;;  %4069 = vmatprep.mubr.f32.mxu0 %v8674_v2  ;;  %4140 = vmatprep.mubr.f32.mxu1 %v8674_v2  ;;  %v3971_v55 = vld [vmem:[#allocation13 + $0xf0] sm:$0xff] }
 0x7df   :  { %6619 = vrcp.f32 %v3674_v41  ;;  %8772 = vst [vmem:[#allocation51_spill] sm:$0xff] %v8254_v23  ;;  %v3974_v41 = vld [vmem:[#allocation13 + $0x108] sm:$0xff]  ;;  %v8262_v4 = vpack.c.bf16 %v3971_v55, %v3967_v46  ;;  %v8272_v55 = vpack.c.bf16 %v3977_v19, %v3973_v61  ;;  %v3987_v51 = vld [vmem:[#allocation13 + $0x170] sm:$0xff] }
 0x7e0   :  { %6038 = vmatpush1.bf16.msra.mxu0 %v8234_v15  ;;  %6070 = vmatpush1.bf16.msra.mxu1 %v8236_v33  ;;  %v3976_v15 = vld [vmem:[#allocation13 + $0x118] sm:$0xff]  ;;  %v8266_v34 = vpack.c.bf16 %v3978_v9, %v3974_v41  ;;  %v3981_v9 = vld [vmem:[#allocation13 + $0x140] sm:$0xff]  ;;  %v3994_v19 = vld [vmem:[#allocation13 + $0x1a8] sm:$0xff] }
 0x7e1   :  { %6040 = vmatprep.subr.bf16.mxu0 %v8240_v53  ;;  %6072 = vmatprep.subr.bf16.mxu1 %v8242_v58  ;;  %v3980_v33 = vld [vmem:[#allocation13 + $0x138] sm:$0xff]  ;;  %8775 = vst [vmem:[#allocation24_spill] sm:$0xff] %v8262_v4  ;;  %v3982_v58 = vld [vmem:[#allocation13 + $0x148] sm:$0xff] }
 0x7e2   :  { %v8268_v26 = vpack.c.bf16 %v3980_v33, %v3976_v15  ;;  %v3986_v53 = vld [vmem:[#allocation13 + $0x168] sm:$0xff]  ;;  %v3985_v15 = vld [vmem:[#allocation13 + $0x160] sm:$0xff] }
 0x7e3   :  { %v8278_v20 = vpack.c.bf16 %v3986_v53, %v3982_v58  ;;  %v3989_v58 = vld [vmem:[#allocation13 + $0x180] sm:$0xff] }
 0x7e4   :  { %6042 = vmatpush1.bf16.msra.mxu0 %v8248_v25  ;;  %6074 = vmatpush1.bf16.msra.mxu1 %v8250_v7  ;;  %v6614_v25 = vpop.eup %6613  ;;  %v3984_v7 = vld [vmem:[#allocation13 + $0x158] sm:$0xff] }
 0x7e5   :  { %6044 = vmatprep.subr.bf16.mxu0 %v8254_v23  ;;  %6076 = vmatprep.subr.bf16.mxu1 %v8256_v39  ;;  %v6616_v13 = vpop.eup %6615  ;;  %v8274_v39 = vpack.c.bf16 %v3979_v28, %v3975_v43  ;;  %v3681_v23 = vadd.f32 1.0, %v6614_v25  ;;  %v8280_v29 = vpack.c.bf16 %v3988_v35, %v3984_v7  ;;  %v3992_v43 = vld [vmem:[#allocation13 + $0x198] sm:$0xff]  ;;  %v8287_v25 = vpack.c.bf16 %v3985_v15, %v3981_v9  ;;  %v3993_v7 = vld [vmem:[#allocation13 + $0x1a0] sm:$0xff] }
 0x7e6   :  { %v3996_v28 = vld [vmem:[#allocation13 + $0x1b8] sm:$0xff] }
 0x7e7   :  { %6621 = vrcp.f32 %v3681_v23  ;;  %v8295_v35 = vpack.c.bf16 %v3996_v28, %v3992_v43  ;;  %v4004_v9 = vld [vmem:[#allocation13 + $0x1f8] sm:$0xff]  ;;  %v3999_v43 = vld [vmem:[#allocation13 + $0x1d0] sm:$0xff] }
 0x7e8   :  { %v6618_v46 = vpop.eup %6617  ;;  %6046 = vmatpush1.bf16.msra.mxu0 %v8260_v48  ;;  %6078 = vmatpush1.bf16.msra.mxu1 %v8262_v4  ;;  %v3983_v48 = vld [vmem:[#allocation13 + $0x150] sm:$0xff]  ;;  %v3990_v4 = vld [vmem:[#allocation13 + $0x188] sm:$0xff] }
 0x7e9   :  { %v6620_v33 = vpop.eup %6619  ;;  %v3686_v41 = vmul.f32 %v6618_v46, %v6616_v13  ;;  %6048 = vmatprep.subr.bf16.mxu0 %v8266_v34  ;;  %6080 = vmatprep.subr.bf16.mxu1 %v8268_v26  ;;  %v8289_v53 = vpack.c.bf16 %v3987_v51, %v3983_v48  ;;  %v3991_v13 = vld [vmem:[#allocation13 + $0x190] sm:$0xff]  ;;  %v8300_v51 = vpack.c.bf16 %v3993_v7, %v3989_v58  ;;  %v3997_v48 = vld [vmem:[#allocation13 + $0x1c0] sm:$0xff] }
 0x7ea   :  { %v3685_v61 = vmul.f32 %v6620_v33, %v8083_v6  ;;  %v8293_v6 = vpack.c.bf16 %v3994_v19, %v3990_v4  ;;  %v3995_v46 = vld [vmem:[#allocation13 + $0x1b0] sm:$0xff]  ;;  %v3998_v33 = vld [vmem:[#allocation13 + $0x1c8] sm:$0xff]  ;;  %v4001_v19 = vld [vmem:[#allocation13 + $0x1e0] sm:$0xff] }
 0x7eb   :  { %v8302_v23 = vpack.c.bf16 %v3995_v46, %v3991_v13  ;;  %v4003_v28 = vld [vmem:[#allocation13 + $0x1f0] sm:$0xff]  ;;  %v8312_v58 = vpack.c.bf16 %v4001_v19, %v3997_v48  ;;  %v8782_v48 = vld [vmem:[#allocation34_spill] sm:$0xff] }
 0x7ec   :  { %v8283_v37 = vadd.f32 %v3686_v41, %v3685_v61  ;;  %6050 = vmatpush1.bf16.msra.mxu0 %v8272_v55  ;;  %6082 = vmatpush1.bf16.msra.mxu1 %v8274_v39  ;;  %v4002_v41 = vld [vmem:[#allocation13 + $0x1e8] sm:$0xff]  ;;  %v4000_v61 = vld [vmem:[#allocation13 + $0x1d8] sm:$0xff]  ;;  %v8314_v7 = vpack.c.bf16 %v4003_v28, %v3999_v43 }
 0x7ed   :  { %6052 = vmatprep.subr.bf16.mxu0 %v8278_v20  ;;  %6084 = vmatprep.subr.bf16.mxu1 %v8280_v29  ;;  %v8306_v4 = vpack.c.bf16 %v4002_v41, %v3998_v33  ;;  %v8308_v15 = vpack.c.bf16 %v4004_v9, %v4000_v61 }
 0x7ee   :  { %6623 = vtanh.f32 %v8283_v37 }
 0x7f0   :  { %6054 = vmatpush1.bf16.msra.mxu0 %v8287_v25  ;;  %6086 = vmatpush1.bf16.msra.mxu1 %v8289_v53 }
 0x7f1   :  { %6056 = vmatprep.subr.bf16.mxu0 %v8293_v6  ;;  %6088 = vmatprep.subr.bf16.mxu1 %v8295_v35  ;;  %v6622_v13 = vpop.eup %6621 }
 0x7f4   :  { %6058 = vmatpush1.bf16.msra.mxu0 %v8300_v51  ;;  %6090 = vmatpush1.bf16.msra.mxu1 %v8302_v23 }
 0x7f5   :  { %6060 = vmatprep.subr.bf16.mxu0 %v8306_v4  ;;  %6092 = vmatprep.subr.bf16.mxu1 %v8308_v15 }
 0x7f8   :  { %v6624_v46 = vpop.eup %6623  ;;  %6062 = vmatpush1.bf16.msra.mxu0 %v8312_v58  ;;  %6094 = vmatpush1.bf16.msra.mxu1 %v8314_v7 }
 0x7f9   :  { %v8320_v33 = vmul.f32 %v6624_v46, %v6622_v13  ;;  %6096 = vmatprep.subr.bf16.mxu0 %v8106_v36  ;;  %6128 = vmatprep.subr.bf16.mxu1 %v8108_v42 }
 0x7fb   :  { %4070 = vmatmul.mubr.f32.vlgmr.msra.gmra.mrb[2].mxu0 %v8320_v33  ;;  %4141 = vmatmul.mubr.f32.vlgmr.msra.gmra.mrb[34].mxu1 %v8320_v33 }
 0x7fc   :  { %6098 = vmatpush1.bf16.msra.mxu0 %v8110_v45  ;;  %6130 = vmatpush1.bf16.msra.mxu1 %v8113_v22  ;;  %v8776_v45 = vld [vmem:[#allocation26_spill] sm:$0xff] }
 0x7fd   :  { %6100 = vmatprep.subr.bf16.mxu0 %v8118_v1  ;;  %6132 = vmatprep.subr.bf16.mxu1 %v8120_v11 }
 0x7fe   :  { %4312 = vmatprep.mubr.f32.mxu0 %v8674_v2  ;;  %4383 = vmatprep.mubr.f32.mxu1 %v8674_v2 }
 0x800   :  { %6102 = vmatpush1.bf16.msra.mxu0 %v8122_v38  ;;  %6134 = vmatpush1.bf16.msra.mxu1 %v8125_v24  ;;  %v8777_v38 = vld [vmem:[#allocation27_spill] sm:$0xff] }
 0x801   :  { %6104 = vmatprep.subr.bf16.mxu0 %v8130_v63  ;;  %6136 = vmatprep.subr.bf16.mxu1 %v8132_v31 }
 0x804   :  { %6106 = vmatpush1.bf16.msra.mxu0 %v8134_v47  ;;  %6138 = vmatpush1.bf16.msra.mxu1 %v8137_v57 }
 0x805   :  { %6108 = vmatprep.subr.bf16.mxu0 %v8142_v44  ;;  %6140 = vmatprep.subr.bf16.mxu1 %v8144_v59  ;;  %v8778_v44 = vld [vmem:[#allocation30_spill] sm:$0xff] }
 0x808   :  { %6110 = vmatpush1.bf16.msra.mxu0 %v8146_v40  ;;  %6142 = vmatpush1.bf16.msra.mxu1 %v8149_v56 }
 0x809   :  { %6112 = vmatprep.subr.bf16.mxu0 %v8154_v62  ;;  %6144 = vmatprep.subr.bf16.mxu1 %v8156_v21 }
 0x80c   :  { %6114 = vmatpush1.bf16.msra.mxu0 %v8158_v49  ;;  %6146 = vmatpush1.bf16.msra.mxu1 %v8161_v54 }
 0x80d   :  { %6116 = vmatprep.subr.bf16.mxu0 %v8166_v17  ;;  %6148 = vmatprep.subr.bf16.mxu1 %v8168_v5 }
 0x810   :  { %6118 = vmatpush1.bf16.msra.mxu0 %v8170_v50  ;;  %6150 = vmatpush1.bf16.msra.mxu1 %v8173_v16 }
 0x811   :  { %6120 = vmatprep.subr.bf16.mxu0 %v8178_v14  ;;  %6152 = vmatprep.subr.bf16.mxu1 %v8180_v0  ;;  %v8779_v14 = vld [vmem:[#allocation37_spill] sm:$0xff] }
 0x814   :  { %6122 = vmatpush1.bf16.msra.mxu0 %v8182_v12  ;;  %6154 = vmatpush1.bf16.msra.mxu1 %v8185_v10 }
 0x815   :  { %6124 = vmatprep.subr.bf16.mxu0 %v8190_v27  ;;  %6156 = vmatprep.subr.bf16.mxu1 %v8192_v3  ;;  %v8780_v3 = vld [vmem:[#allocation33_spill] sm:$0xff] }
 0x818   :  { %6126 = vmatpush1.bf16.msra.mxu0 %v8194_v8  ;;  %6158 = vmatpush1.bf16.msra.mxu1 %v8197_v60 }
 0x819   :  { %6160 = vmatprep.subr.bf16.mxu0 %v8202_v18  ;;  %6192 = vmatprep.subr.bf16.mxu1 %v8204_v30  ;;  %v8781_v30 = vld [vmem:[#allocation32_spill] sm:$0xff] }
 0x8ae   :  { %v3828_v36 = vpop.f32.mrb[28].mxu0  ;;  %v3899_v42 = vpop.f32.mrb[28].mxu1 }
 0x8af   :  { %v3904_v22 = vadd.f32 %v3828_v36, %v8776_v45  ;;  %v3830_v1 = vpop.f32.mrb[29].mxu0  ;;  %v3901_v11 = vpop.f32.mrb[29].mxu1  ;;  %v6331_v59 = vadd.f32 %v3899_v42, %v8778_v44 }
 0x8b0   :  { %v3905_v24 = vadd.f32 %v3830_v1, %v8777_v38  ;;  %v6332_v47 = vadd.f32 %v3901_v11, %v8694_v52  ;;  %v8783_v1 = vld [vmem:[#allocation38_spill] sm:$0xff]  ;;  %v8784_v11 = vld [vmem:[#allocation39_spill] sm:$0xff] }
 0x8b1   :  { %v5034_v63 = vmul.f32 -1.442695, %v3904_v22 }
 0x8b2   :  { %v5035_v31 = vmul.f32 -1.442695, %v3905_v24  ;;  %v5036_v57 = vmul.f32 -1.442695, %v6332_v47  ;;  %v8785_v24 = vld [vmem:[#allocation43_spill] sm:$0xff]  ;;  %v8788_v47 = vld [vmem:[#allocation46_spill] sm:$0xff] }
 0x8b3   :  { %6625 = vpow2.f32 %v5034_v63  ;;  %v8786_v63 = vld [vmem:[#allocation44_spill] sm:$0xff] }
 0x8b4   :  { %6627 = vpow2.f32 %v5035_v31  ;;  %v8787_v31 = vld [vmem:[#allocation45_spill] sm:$0xff] }
 0x8b5   :  { %6629 = vpow2.f32 %v5036_v57  ;;  %v8789_v57 = vld [vmem:[#allocation47_spill] sm:$0xff] }
 0x8b6   :  { %6631 = vtanh.f32 %v6331_v59  ;;  %v8790_v59 = vld [vmem:[#allocation48_spill] sm:$0xff] }
 0x8bd   :  { %v6626_v40 = vpop.eup %6625 }
 0x8be   :  { %v6628_v56 = vpop.eup %6627  ;;  %v3911_v62 = vadd.f32 1.0, %v6626_v40  ;;  %v8791_v40 = vld [vmem:[#allocation49_spill] sm:$0xff] }
 0x8bf   :  { %v3917_v21 = vadd.f32 1.0, %v6628_v56  ;;  %v6630_v49 = vpop.eup %6629  ;;  %v8792_v56 = vld [vmem:[#allocation50_spill] sm:$0xff] }
 0x8c0   :  { %6633 = vrcp.f32 %v3911_v62  ;;  %v6632_v54 = vpop.eup %6631  ;;  %v3924_v16 = vadd.f32 1.0, %v6630_v49  ;;  %v8793_v62 = vld [vmem:[#allocation51_spill] sm:$0xff] }
 0x8c1   :  { %6635 = vrcp.f32 %v3917_v21  ;;  %v8794_v21 = vld [vmem:[#allocation52_spill] sm:$0xff] }
 0x8c2   :  { %6637 = vrcp.f32 %v3924_v16 }
 0x8ca   :  { %v6634_v17 = vpop.eup %6633 }
 0x8cb   :  { %v6636_v5 = vpop.eup %6635  ;;  %v3929_v50 = vmul.f32 %v6634_v17, %v6632_v54  ;;  %v8795_v17 = vld [vmem:[#allocation20_spill] sm:$0xff] }
 0x8cc   :  { %v3928_v0 = vmul.f32 %v6636_v5, %v8779_v14  ;;  %v6638_v43 = vpop.eup %6637  ;;  %v8796_v5 = vld [vmem:[#allocation24_spill] sm:$0xff] }
 0x8ce   :  { %v8365_v12 = vadd.f32 %v3929_v50, %v3928_v0  ;;  %v4071_v10 = vpop.f32.mrb[2].mxu0  ;;  %v4142_v27 = vpop.f32.mrb[34].mxu1 }
 0x8cf   :  { %v6337_v8 = vadd.f32 %v4071_v10, %v8780_v3  ;;  %v4073_v60 = vpop.f32.mrb[3].mxu0  ;;  %v4144_v18 = vpop.f32.mrb[35].mxu1  ;;  %v6353_v46 = vadd.f32 %v4142_v27, %v7431_v32 }
 0x8d0   :  { %v6338_v41 = vadd.f32 %v4073_v60, %v8781_v30  ;;  %6639 = vtanh.f32 %v8365_v12  ;;  %v6354_v19 = vadd.f32 %v4144_v18, %v8782_v48  ;;  %v4708_v60 = vld [vmem:[%s8576_s10 + $0x58] sm:$0xff] }
 0x8d1   :  { %v5037_v61 = vmul.f32 -1.442695, %v6337_v8  ;;  %v4707_v8 = vld [vmem:[%s8576_s10 + $0x50] sm:$0xff] }
 0x8d2   :  { %v5038_v9 = vmul.f32 -1.442695, %v6338_v41  ;;  %v5039_v13 = vmul.f32 -1.442695, %v6354_v19  ;;  %v6243_v18 = vpack.c.bf16 %v4708_v60, %v4707_v8  ;;  %v4709_v41 = vld [vmem:[%s8576_s10 + $0x60] sm:$0xff]  ;;  %v4711_v19 = vld [vmem:[%s8576_s10 + $0x70] sm:$0xff] }
 0x8d3   :  { %6641 = vpow2.f32 %v5037_v61  ;;  %v4710_v61 = vld [vmem:[%s8576_s10 + $0x68] sm:$0xff] }
 0x8d4   :  { %6643 = vpow2.f32 %v5038_v9  ;;  %v6247_v9 = vpack.c.bf16 %v4710_v61, %v4709_v41  ;;  %v4675_v61 = vld [vmem:[%s8575_s9 + $0x10] sm:$0xff] }
 0x8d5   :  { %6645 = vpow2.f32 %v5039_v13  ;;  %v4673_v13 = vld [vmem:[%s8575_s9] sm:$0xff] }
 0x8d6   :  { %6647 = vtanh.f32 %v6353_v46  ;;  %v4674_v46 = vld [vmem:[%s8575_s9 + $0x8] sm:$0xff] }
 0x8da   :  { %v6640_v28 = vpop.eup %6639 }
 0x8db   :  { %v8372_v36 = vmul.f32 %v6640_v28, %v6638_v43  ;;  %v4712_v43 = vld [vmem:[%s8576_s10 + $0x78] sm:$0xff] }
 0x8dc   :  { %v6251_v28 = vpack.c.bf16 %v4712_v43, %v4711_v19 }
 0x8dd   :  { %v6642_v42 = vpop.eup %6641  ;;  %4313 = vmatmul.mubr.f32.vlgmr.msra.gmra.mrb[30].mxu0 %v8372_v36  ;;  %4384 = vmatmul.mubr.f32.vlgmr.msra.gmra.mrb[30].mxu1 %v8372_v36 }
 0x8de   :  { %v6644_v45 = vpop.eup %6643  ;;  %v4154_v22 = vadd.f32 1.0, %v6642_v42  ;;  %6162 = vmatpush1.bf16.msra.mxu0 %v8783_v1  ;;  %6194 = vmatpush1.bf16.msra.mxu1 %v8784_v11  ;;  %v8470_v42 = vpack.c.bf16 %v4674_v46, %v4673_v13  ;;  %v8797_v1 = vld [vmem:[#allocation28_spill] sm:$0xff] }
 0x8df   :  { %v4160_v38 = vadd.f32 1.0, %v6644_v45  ;;  %6164 = vmatprep.subr.bf16.mxu0 %v8785_v24  ;;  %6196 = vmatprep.subr.bf16.mxu1 %v8786_v63  ;;  %v6646_v49 = vpop.eup %6645  ;;  %v8798_v63 = vld [vmem:[#allocation29_spill] sm:$0xff]  ;;  %v4678_v13 = vld [vmem:[%s8575_s9 + $0x28] sm:$0xff] }
 0x8e0   :  { %6649 = vrcp.f32 %v4154_v22  ;;  %4555 = vmatprep.mubr.f32.mxu0 %v8674_v2  ;;  %4626 = vmatprep.mubr.f32.mxu1 %v8674_v2  ;;  %v6648_v54 = vpop.eup %6647  ;;  %v4167_v14 = vadd.f32 1.0, %v6646_v49 }
 0x8e1   :  { %6651 = vrcp.f32 %v4160_v38 }
 0x8e2   :  { %6166 = vmatpush1.bf16.msra.mxu0 %v8787_v31  ;;  %6198 = vmatpush1.bf16.msra.mxu1 %v8788_v47  ;;  %6653 = vrcp.f32 %v4167_v14 }
 0x8e3   :  { %6168 = vmatprep.subr.bf16.mxu0 %v8789_v57  ;;  %6200 = vmatprep.subr.bf16.mxu1 %v8790_v59 }
 0x8e6   :  { %6170 = vmatpush1.bf16.msra.mxu0 %v8791_v40  ;;  %6202 = vmatpush1.bf16.msra.mxu1 %v8792_v56 }
 0x8e7   :  { %6172 = vmatprep.subr.bf16.mxu0 %v8793_v62  ;;  %6204 = vmatprep.subr.bf16.mxu1 %v8794_v21 }
 0x8ea   :  { %v6650_v2 = vpop.eup %6649  ;;  %6174 = vmatpush1.bf16.msra.mxu0 %v8795_v17  ;;  %6206 = vmatpush1.bf16.msra.mxu1 %v8796_v5 }
 0x8eb   :  { %v6652_v50 = vpop.eup %6651  ;;  %v4172_v16 = vmul.f32 %v6650_v2, %v6648_v54  ;;  %6176 = vmatprep.subr.bf16.mxu0 %v8266_v34  ;;  %6208 = vmatprep.subr.bf16.mxu1 %v8268_v26  ;;  %v4698_v34 = vld [vmem:[%s8576_s10 + $0x8] sm:$0xff] }
 0x8ec   :  { %v4171_v0 = vmul.f32 %v6652_v50, %v8283_v37 }
 0x8ee   :  { %v8395_v10 = vadd.f32 %v4172_v16, %v4171_v0  ;;  %6178 = vmatpush1.bf16.msra.mxu0 %v8272_v55  ;;  %6210 = vmatpush1.bf16.msra.mxu1 %v8274_v39  ;;  %v4697_v39 = vld [vmem:[%s8576_s10] sm:$0xff]  ;;  %v4699_v55 = vld [vmem:[%s8576_s10 + $0x10] sm:$0xff] }
 0x8ef   :  { %6180 = vmatprep.subr.bf16.mxu0 %v8278_v20  ;;  %6212 = vmatprep.subr.bf16.mxu1 %v8280_v29  ;;  %v6654_v20 = vpop.eup %6653  ;;  %v6223_v26 = vpack.c.bf16 %v4698_v34, %v4697_v39 }
 0x8f0   :  { %6655 = vtanh.f32 %v8395_v10 }
 0x8f2   :  { %6182 = vmatpush1.bf16.msra.mxu0 %v8287_v25  ;;  %6214 = vmatpush1.bf16.msra.mxu1 %v8289_v53  ;;  %v4700_v25 = vld [vmem:[%s8576_s10 + $0x18] sm:$0xff] }
 0x8f3   :  { %6184 = vmatprep.subr.bf16.mxu0 %v8293_v6  ;;  %6216 = vmatprep.subr.bf16.mxu1 %v8295_v35  ;;  %v6227_v53 = vpack.c.bf16 %v4700_v25, %v4699_v55  ;;  %v4701_v6 = vld [vmem:[%s8576_s10 + $0x20] sm:$0xff]  ;;  %v4702_v35 = vld [vmem:[%s8576_s10 + $0x28] sm:$0xff] }
 0x8f6   :  { %6186 = vmatpush1.bf16.msra.mxu0 %v8300_v51  ;;  %6218 = vmatpush1.bf16.msra.mxu1 %v8302_v23  ;;  %v6231_v51 = vpack.c.bf16 %v4702_v35, %v4701_v6  ;;  %v4703_v23 = vld [vmem:[%s8576_s10 + $0x30] sm:$0xff] }
 0x8f7   :  { %6188 = vmatprep.subr.bf16.mxu0 %v8306_v4  ;;  %6220 = vmatprep.subr.bf16.mxu1 %v8308_v15  ;;  %v4704_v4 = vld [vmem:[%s8576_s10 + $0x38] sm:$0xff] }
 0x8f8   :  { %v6235_v15 = vpack.c.bf16 %v4704_v4, %v4703_v23 }
 0x8fa   :  { %v6656_v37 = vpop.eup %6655  ;;  %6190 = vmatpush1.bf16.msra.mxu0 %v8312_v58  ;;  %6222 = vmatpush1.bf16.msra.mxu1 %v8314_v7  ;;  %v4705_v58 = vld [vmem:[%s8576_s10 + $0x40] sm:$0xff]  ;;  %v4706_v7 = vld [vmem:[%s8576_s10 + $0x48] sm:$0xff] }
 0x8fb   :  { %v8412_v29 = vmul.f32 %v6656_v37, %v6654_v20  ;;  %6224 = vmatprep.subr.bf16.mxu0 %v6223_v26  ;;  %v6239_v27 = vpack.c.bf16 %v4706_v7, %v4705_v58 }
 0x8fd   :  { %4556 = vmatmul.mubr.f32.vlgmr.msra.gmra.mrb[0].mxu0 %v8412_v29  ;;  %4627 = vmatmul.mubr.f32.vlgmr.msra.gmra.mrb[32].mxu1 %v8412_v29 }
 0x8fe   :  { %6226 = vmatpush3.bf16.msra.mxu0 %v6223_v26 }
 0x8ff   :  { %6228 = vmatprep.subr.bf16.mxu0 %v6227_v53 }
 0x902   :  { %6230 = vmatpush3.bf16.msra.mxu0 %v6227_v53 }
 0x903   :  { %6232 = vmatprep.subr.bf16.mxu0 %v6231_v51 }
 0x906   :  { %6234 = vmatpush3.bf16.msra.mxu0 %v6231_v51 }
 0x907   :  { %6236 = vmatprep.subr.bf16.mxu0 %v6235_v15 }
 0x90a   :  { %6238 = vmatpush3.bf16.msra.mxu0 %v6235_v15 }
 0x90b   :  { %6240 = vmatprep.subr.bf16.mxu0 %v6239_v27 }
 0x90e   :  { %6242 = vmatpush3.bf16.msra.mxu0 %v6239_v27 }
 0x90f   :  { %6244 = vmatprep.subr.bf16.mxu0 %v6243_v18 }
 0x912   :  { %6246 = vmatpush3.bf16.msra.mxu0 %v6243_v18 }
 0x913   :  { %6248 = vmatprep.subr.bf16.mxu0 %v6247_v9 }
 0x916   :  { %6250 = vmatpush3.bf16.msra.mxu0 %v6247_v9  ;;  %v4676_v9 = vld [vmem:[%s8575_s9 + $0x18] sm:$0xff] }
 0x917   :  { %6252 = vmatprep.subr.bf16.mxu0 %v6251_v28 }
 0x91a   :  { %6254 = vmatpush3.bf16.msra.mxu0 %v6251_v28  ;;  %v6259_v28 = vpack.c.bf16 %v4676_v9, %v4675_v61 }
 0x91b   :  { %6256 = vmatprep.subr.bf16.mxu0 %v8470_v42 }
 0x9b0   :  { %v4314_v45 = vpop.f32.mrb[30].mxu0  ;;  %v4385_v22 = vpop.f32.mrb[30].mxu1 }
 0x9b1   :  { %v4390_v11 = vadd.f32 %v4314_v45, %v8797_v1  ;;  %v4316_v38 = vpop.f32.mrb[31].mxu0  ;;  %v4387_v24 = vpop.f32.mrb[31].mxu1  ;;  %v6333_v56 = vadd.f32 %v4385_v22, %v8778_v44  ;;  %v4679_v45 = vld [vmem:[%s8575_s9 + $0x30] sm:$0xff]  ;;  %v4680_v22 = vld [vmem:[%s8575_s9 + $0x38] sm:$0xff]  ;;  %v8799_v1 = vld [vmem:[#allocation23_spill] sm:$0xff] }
 0x9b2   :  { %v4391_v31 = vadd.f32 %v4316_v38, %v8798_v63  ;;  %v6334_v59 = vadd.f32 %v4387_v24, %v8694_v52  ;;  %v8801_v38 = vld [vmem:[#allocation31_spill] sm:$0xff]  ;;  %v8802_v24 = vld [vmem:[#allocation53_spill] sm:$0xff] }
 0x9b3   :  { %v5040_v47 = vmul.f32 -1.442695, %v4390_v11  ;;  %v8800_v11 = vld [vmem:[#allocation21_spill] sm:$0xff] }
 0x9b4   :  { %v5041_v57 = vmul.f32 -1.442695, %v4391_v31  ;;  %v5042_v40 = vmul.f32 -1.442695, %v6334_v59  ;;  %v4683_v31 = vld [vmem:[%s8575_s9 + $0x50] sm:$0xff]  ;;  %v8804_v59 = vld [vmem:[#allocation35_spill] sm:$0xff] }
 0x9b5   :  { %6657 = vpow2.f32 %v5040_v47  ;;  %v4684_v47 = vld [vmem:[%s8575_s9 + $0x58] sm:$0xff] }
 0x9b6   :  { %6659 = vpow2.f32 %v5041_v57  ;;  %v8803_v57 = vld [vmem:[#allocation36_spill] sm:$0xff] }
 0x9b7   :  { %6661 = vpow2.f32 %v5042_v40  ;;  %v6275_v40 = vpack.c.bf16 %v4684_v47, %v4683_v31 }
 0x9b8   :  { %6663 = vtanh.f32 %v6333_v56  ;;  %v4685_v56 = vld [vmem:[%s8575_s9 + $0x60] sm:$0xff] }
 0x9bf   :  { %v6658_v62 = vpop.eup %6657 }
 0x9c0   :  { %v6660_v21 = vpop.eup %6659  ;;  %v4397_v49 = vadd.f32 1.0, %v6658_v62  ;;  %v4686_v62 = vld [vmem:[%s8575_s9 + $0x68] sm:$0xff] }
 0x9c1   :  { %v4403_v54 = vadd.f32 1.0, %v6660_v21  ;;  %v6662_v2 = vpop.eup %6661  ;;  %v6279_v21 = vpack.c.bf16 %v4686_v62, %v4685_v56 }
 0x9c2   :  { %6665 = vrcp.f32 %v4397_v49  ;;  %v6664_v17 = vpop.eup %6663  ;;  %v4410_v14 = vadd.f32 1.0, %v6662_v2  ;;  %v4687_v49 = vld [vmem:[%s8575_s9 + $0x70] sm:$0xff] }
 0x9c3   :  { %6667 = vrcp.f32 %v4403_v54  ;;  %v4688_v54 = vld [vmem:[%s8575_s9 + $0x78] sm:$0xff] }
 0x9c4   :  { %6669 = vrcp.f32 %v4410_v14  ;;  %v6283_v2 = vpack.c.bf16 %v4688_v54, %v4687_v49  ;;  %v8809_v14 = vld [vmem:[#allocation42_spill] sm:$0xff] }
 0x9cc   :  { %v6666_v5 = vpop.eup %6665 }
 0x9cd   :  { %v6668_v50 = vpop.eup %6667  ;;  %v4415_v16 = vmul.f32 %v6666_v5, %v6664_v17  ;;  %v8805_v17 = vld [vmem:[#allocation40_spill] sm:$0xff]  ;;  %v8806_v5 = vld [vmem:[#allocation19_spill] sm:$0xff] }
 0x9ce   :  { %v4414_v0 = vmul.f32 %v6668_v50, %v8365_v12  ;;  %v6670_v6 = vpop.eup %6669  ;;  %v8807_v50 = vld [vmem:[#allocation41_spill] sm:$0xff] }
 0x9d0   :  { %v4557_v52 = vpop.f32.mrb[0].mxu0  ;;  %v4628_v20 = vpop.f32.mrb[32].mxu1  ;;  %v4416_v37 = vadd.f32 %v4415_v16, %v4414_v0  ;;  %v8808_v16 = vld [vmem:[#allocation22_spill] sm:$0xff]  ;;  %v5046_v0 = vld [vmem:[%s8577_s11] ss:$0 sm:$0xff]  ;;  %s6766_s11 = smov [#allocation15]  }
 0x9d1   :  { %v6335_v44 = vadd.f32 %v4557_v52, %v8780_v3  ;;  %v4559_v39 = vpop.f32.mrb[1].mxu0  ;;  %v4630_v34 = vpop.f32.mrb[33].mxu1  ;;  %v6351_v51 = vadd.f32 %v4628_v20, %v7431_v32  ;;  %s4951_s26 = sshll.u32 %s6766_s11, 4  ;;  %s4952_s26 = int_to_ptr.vmem [resolvable:$true] %s4951_s26 }
 0x9d2   :  { %v6336_v26 = vadd.f32 %v4559_v39, %v8781_v30  ;;  %6671 = vtanh.f32 %v4416_v37  ;;  %v6352_v53 = vadd.f32 %v4630_v34, %v8782_v48  ;;  %s6733_s27 = scalar_lea.vmem %s4952_s26, 1024  ;;  %p6738_p3 = scmp.lt.s32.totalorder %s4952_s26, %s4952_s26 }
 0x9d3   :  { %v5043_v55 = vmul.f32 -1.442695, %v6335_v44  ;;  %p6734_p2 = scmp.ne.s32.totalorder %s4952_s26, %s6733_s27  ;;  %p6739_p4 = scmp.lt.s32.totalorder %s6733_s27, %s6733_s27 }
 0x9d4   :  { %v5044_v25 = vmul.f32 -1.442695, %v6336_v26  ;;  %v5045_v12 = vmul.f32 -1.442695, %v6352_v53 }
 0x9d5   :  { %6673 = vpow2.f32 %v5043_v55  ;;  %p6740_p5 = por %p6739_p4, %p6738_p3 }
 0x9d6   :  { %6675 = vpow2.f32 %v5044_v25 }
 0x9d7   :  { %6677 = vpow2.f32 %v5045_v12  ;;  %p6741_p6 = pnand %p6740_p5, %p6734_p2 }
 0x9d8   :  { %6679 = vtanh.f32 %v6351_v51 }
 0x9dc   :  { %v6672_v35 = vpop.eup %6671 }
 0x9dd   :  { %v8482_v23 = vmul.f32 %v6672_v35, %v6670_v6 }
 0x9df   :  { %v6674_v4 = vpop.eup %6673 }
 0x9e0   :  { %v6676_v3 = vpop.eup %6675  ;;  %v4640_v15 = vadd.f32 1.0, %v6674_v4 }
 0x9e1   :  { %v4646_v30 = vadd.f32 1.0, %v6676_v3  ;;  %v6678_v58 = vpop.eup %6677 }
 0x9e2   :  { %6681 = vrcp.f32 %v4640_v15  ;;  %v6680_v7 = vpop.eup %6679  ;;  %v4653_v60 = vadd.f32 1.0, %v6678_v58 }
 0x9e3   :  { %6683 = vrcp.f32 %v4646_v30 }
 0x9e4   :  { %6685 = vrcp.f32 %v4653_v60 }
 0x9ec   :  { %v6682_v27 = vpop.eup %6681 }
 0x9ed   :  { %v6684_v8 = vpop.eup %6683  ;;  %v4658_v48 = vmul.f32 %v6682_v27, %v6680_v7 }
 0x9ee   :  { %v4657_v18 = vmul.f32 %v6684_v8, %v8395_v10  ;;  %v6686_v32 = vpop.eup %6685  ;;  %v4677_v10 = vld [vmem:[%s8575_s9 + $0x20] sm:$0xff] }
 0x9ef   :  { %v6263_v46 = vpack.c.bf16 %v4678_v13, %v4677_v10 }
 0x9f0   :  { %v4659_v41 = vadd.f32 %v4658_v48, %v4657_v18 }
 0x9f2   :  { %6687 = vtanh.f32 %v4659_v41 }
 0x9fc   :  { %v6688_v19 = vpop.eup %6687 }
 0x9fd   :  { %v4661_v43 = vmul.f32 %v6688_v19, %v6686_v32 }
 0x9ff   :  { %5127 = vmatprep.mubr.f32.mxu0 %v4661_v43 }
 0xa00   :  { %5128 = vmatmul.mubr.f32.vlgmr.msra.gmra.mrb[32].mxu0 %v8412_v29  ;;  %v6267_v29 = vpack.c.bf16 %v4680_v22, %v4679_v45 }
 0xa01   :  { %6258 = vmatpush3.bf16.msra.mxu0 %v8470_v42  ;;  %5130 = vmatprep.mubr.f32.mxu0 %v8320_v33  ;;  %v4681_v33 = vld [vmem:[%s8575_s9 + $0x40] sm:$0xff]  ;;  %v4682_v42 = vld [vmem:[%s8575_s9 + $0x48] sm:$0xff] }
 0xa02   :  { %6260 = vmatprep.subr.bf16.mxu0 %v6259_v28  ;;  %v6271_v63 = vpack.c.bf16 %v4682_v42, %v4681_v33 }
 0xa04   :  { %5131 = vmatmul.mubr.f32.gmra.mrb[34].mxu0 %v8799_v1 }
 0xa05   :  { %6262 = vmatpush3.bf16.msra.mxu0 %v6259_v28  ;;  %5133 = vmatprep.mubr.f32.mxu0 %v8800_v11 }
 0xa06   :  { %6264 = vmatprep.subr.bf16.mxu0 %v6263_v46 }
 0xa08   :  { %5134 = vmatmul.mubr.f32.gmra.mrb[36].mxu0 %v8801_v38 }
 0xa09   :  { %6266 = vmatpush3.bf16.msra.mxu0 %v6263_v46  ;;  %5136 = vmatprep.mubr.f32.mxu0 %v8802_v24 }
 0xa0a   :  { %6268 = vmatprep.subr.bf16.mxu0 %v6267_v29 }
 0xa0c   :  { %5137 = vmatmul.mubr.f32.gmra.mrb[38].mxu0 %v8803_v57 }
 0xa0d   :  { %6270 = vmatpush3.bf16.msra.mxu0 %v6267_v29  ;;  %5171 = vmatprep.mubr.f32.mxu0 %v8804_v59 }
 0xa0e   :  { %6272 = vmatprep.subr.bf16.mxu0 %v6271_v63 }
 0xa11   :  { %6274 = vmatpush3.bf16.msra.mxu0 %v6271_v63 }
 0xa12   :  { %6276 = vmatprep.subr.bf16.mxu0 %v6275_v40 }
 0xa15   :  { %6278 = vmatpush3.bf16.msra.mxu0 %v6275_v40 }
 0xa16   :  { %6280 = vmatprep.subr.bf16.mxu0 %v6279_v21 }
 0xa19   :  { %6282 = vmatpush3.bf16.msra.mxu0 %v6279_v21 }
 0xa1a   :  { %6284 = vmatprep.subr.bf16.mxu0 %v6283_v2 }
 0xa1d   :  { %6286 = vmatpush3.bf16.msra.mxu0 %v6283_v2 }
 0xa20   :  { %5172 = vmatmul.mubr.f32.vlgmr.msra.gmra.mrb[32].mxu0 %v8805_v17 }
 0xa21   :  { %5174 = vmatprep.mubr.f32.mxu0 %v8806_v5 }
 0xa24   :  { %5175 = vmatmul.mubr.f32.gmra.mrb[34].mxu0 %v8807_v50 }
 0xa25   :  { %5177 = vmatprep.mubr.f32.mxu0 %v8808_v16 }
 0xa28   :  { %5178 = vmatmul.mubr.f32.gmra.mrb[36].mxu0 %v8809_v14 }
 0xa29   :  { %5180 = vmatprep.mubr.f32.mxu0 %v8372_v36 }
 0xa2c   :  { %5181 = vmatmul.mubr.f32.gmra.mrb[38].mxu0 %v8482_v23 }
 0xaf3   :  { %v5173_v52 = vpop.f32.mrb[32].mxu0 }
 0xaf4   :  { %v4931_v20 = vadd.f32 %v5173_v52, %v5046_v0  ;;  %v4884_v37 = vpop.f32.mrb[33].mxu0 }
 0xaf5   :  { %v4930_v44 = vadd.f32 %v5046_v0, %v4884_v37 }
 0xaf6   :  { %4939 = vst.msk [vmem:[#allocation15 + $0x8] sm:$0xff] %vm78_vm0, %v4931_v20 }
 0xaf7   :  { %4938 = vst.msk [vmem:[#allocation15] sm:$0xff] %vm78_vm0, %v4930_v44  ;;  %v5176_v39 = vpop.f32.mrb[34].mxu0 }
 0xaf8   :  { %v4933_v34 = vadd.f32 %v5176_v39, %v5046_v0  ;;  %v4894_v26 = vpop.f32.mrb[35].mxu0 }
 0xaf9   :  { %v4932_v55 = vadd.f32 %v5046_v0, %v4894_v26 }
 0xafa   :  { %4941 = vst.msk [vmem:[#allocation15 + $0x18] sm:$0xff] %vm78_vm0, %v4933_v34 }
 0xafb   :  { %4940 = vst.msk [vmem:[#allocation15 + $0x10] sm:$0xff] %vm78_vm0, %v4932_v55  ;;  %v5179_v36 = vpop.f32.mrb[36].mxu0 }
 0xafc   :  { %v4935_v25 = vadd.f32 %v5179_v36, %v5046_v0  ;;  %v4904_v53 = vpop.f32.mrb[37].mxu0 }
 0xafd   :  { %v4934_v6 = vadd.f32 %v5046_v0, %v4904_v53 }
 0xafe   :  { %4943 = vst.msk [vmem:[#allocation15 + $0x28] sm:$0xff] %vm78_vm0, %v4935_v25 }
 0xaff   :  { %4942 = vst.msk [vmem:[#allocation15 + $0x20] sm:$0xff] %vm78_vm0, %v4934_v6  ;;  %v5182_v35 = vpop.f32.mrb[38].mxu0 }
 0xb00   :  { %v4937_v12 = vadd.f32 %v5182_v35, %v5046_v0  ;;  %v4914_v51 = vpop.f32.mrb[39].mxu0 }
 0xb01   :  { %v4936_v23 = vadd.f32 %v5046_v0, %v4914_v51 }
 0xb02   :  { %4945 = vst.msk [vmem:[#allocation15 + $0x38] sm:$0xff] %vm78_vm0, %v4937_v12 }
 0xb03   :  { %4944 = vst.msk [vmem:[#allocation15 + $0x30] sm:$0xff] %vm78_vm0, %v4936_v23 }
 0xb04   :  { %6744 = shalt.err (!%p6741_p6)
}
 0xb05   :  { %s6745_s28 = scalar_lea.hbm %s8578_s12, 1024 }
 0xb06   :  { %p6746_p7 = scmp.ne.s32.totalorder %s8578_s12, %s6745_s28  ;;  %p6749_p8 = scmp.lt.u32.totalorder %s6745_s28, %s8578_s12 }
 0xb08   :  { %p6751_p9 = pnand %p6749_p8, %p6746_p7 }
 0xb0a   :  { %6754 = shalt.err (!%p6751_p9)
}
 0xb0b   :  { %s6767_s16 = smov 128   ;;  %s6768_s2 = smov 8  }
 0xb0c   :  { %4957 = dma.vmem_to_hbm [thread:$0]  %s4952_s26, 1024, %s8578_s12, [#allocation12], %s6767_s16, %s6767_s16, %s6768_s2  }
 0xb0d   :  { %6759 = dma.done.wait [#allocation12], 1024  }
 0xb0e   :  { %6760 = vsyncadd [#allocation12], 4294966272 }
 0xb0f   :  { %4961 = vsyncpa [#allocation11], 1 }
 0xb10   :  { %4962 = vsyncpa [#allocation14], 1 }
 0xb11   :  { %4963 = vsyncpa [#allocation12], 1 }

</bundles_post_ra>
